<compile_context>
chip_gen: v5e
topology: v5e:2x2
jax: 0.10.0
libtpu: 0.0.40
codegen_flags: <defaults>
</compile_context>

<pallas_src>
import numpy as np
import jax
import jax.numpy as jnp
from jax.experimental import pallas as pl
from jax.experimental.pallas import tpu as pltpu


def sine_layer_kernel(x_ref, wt_ref, b_ref, o_ref):
    """One batch tile of sin(x @ W^T + b).

    x_ref:  (TM, in_f)    activation tile (f32 or bf16)
    wt_ref: (in_f, out_f) weight pre-transposed to (K, N) -> MXU-ready, no in-kernel transpose
    b_ref:  (1, out_f)    f32 bias
    o_ref:  (TM, out_f)   output tile
    """
    acc = jnp.dot(x_ref[...], wt_ref[...], preferred_element_type=jnp.float32)
    acc = acc + b_ref[...]                            # broadcast over batch rows, f32
    o_ref[...] = jnp.sin(acc).astype(o_ref.dtype)     # sin kept in f32


def _round_up(v, m):
    return ((v + m - 1) // m) * m


def sine_layer(x, weight, bias, *, tm=2048, compute_dtype=None):
    """SineLayer forward: sin(x @ weight.T + bias).

    x:       (..., in_f)
    weight:  (out_f, in_f) PyTorch nn.Linear layout
    bias:    (out_f,)
    tm:      requested batch tile (rows / grid step). 1024-4096 amortizes the
             ~0.35us/step pipeline overhead; automatically capped by the VMEM
             budget (v7x-safe) and split so >=2 blocks feed both v7x TCs.
    compute_dtype: optional matmul-input dtype (jnp.bfloat16 on v6e/v7x).
             Accumulation, bias add and sin stay in f32.
    """
    orig_shape = x.shape
    in_f = orig_shape[-1]
    out_f, in_f_w = weight.shape
    assert in_f == in_f_w, "weight shape mismatch"

    # Flatten leading batch dims so the grid tiles one big row axis.
    x2 = x.reshape(-1, in_f)
    B = x2.shape[0]

    # One-time (K, N) transpose outside the kernel (cheap, not per-tile work).
    w_t = weight.T
    b2 = bias.reshape(1, out_f).astype(jnp.float32)

    if compute_dtype is not None:
        x_c = x2.astype(compute_dtype)
        w_t = w_t.astype(compute_dtype)
    else:
        x_c = x2

    out_dtype = x.dtype
    x_itm = x_c.dtype.itemsize
    o_itm = jnp.dtype(out_dtype).itemsize
    w_itm = w_t.dtype.itemsize

    # ---- VMEM-aware tile selection (conservative budget; v7x has 64 MiB/TC) ----
    vmem_budget = 48 * 1024 * 1024
    resident = in_f * out_f * w_itm + _round_up(out_f, 128) * 4   # weight + bias, single-buffered
    per_row = 2 * (in_f * x_itm + out_f * o_itm)                  # double-buffered x + out tiles
    tm_cap = max(8, (vmem_budget - resident) // per_row)

    tm_eff = min(tm, _round_up(B, 8), tm_cap)
    if B >= 64:
        # Guarantee >=2 grid blocks so the "parallel" axis spans both v7x TensorCores.
        tm_eff = min(tm_eff, _round_up(pl.cdiv(B, 2), 8))
    tm_eff = max(8, (tm_eff // 8) * 8)

    n_blocks = pl.cdiv(B, tm_eff)   # ragged last block handled by masked stores (no jnp.pad copy)

    vmem_needed = 2 * tm_eff * (in_f * x_itm + out_f * o_itm) + resident
    vmem_limit = int(min(max(2 * vmem_needed, 32 * 1024 * 1024), 56 * 1024 * 1024))

    cost = pl.CostEstimate(
        flops=2 * B * in_f * out_f,
        transcendentals=B * out_f,
        bytes_accessed=B * in_f * x_itm + in_f * out_f * w_itm + out_f * 4
                       + B * out_f * o_itm,
    )

    out = pl.pallas_call(
        sine_layer_kernel,
        out_shape=jax.ShapeDtypeStruct((B, out_f), out_dtype),
        grid_spec=pltpu.PrefetchScalarGridSpec(
            num_scalar_prefetch=0,
            grid=(n_blocks,),
            in_specs=[
                # activations: tiled over batch, default double-buffering for DMA/compute overlap
                pl.BlockSpec((tm_eff, in_f), lambda i: (i, 0)),
                # weight: grid-invariant, fetched once, single VMEM buffer
                pl.BlockSpec((in_f, out_f), lambda i: (0, 0),
                             pipeline_mode=pl.Buffered(1)),
                # bias: grid-invariant, single buffer
                pl.BlockSpec((1, out_f), lambda i: (0, 0),
                             pipeline_mode=pl.Buffered(1)),
            ],
            out_specs=pl.BlockSpec((tm_eff, out_f), lambda i: (i, 0)),
        ),
        compiler_params=pltpu.CompilerParams(
            dimension_semantics=("parallel",),   # independent batch tiles -> megacore sharding
            vmem_limit_bytes=vmem_limit,
        ),
        cost_estimate=cost,
    )(x_c, w_t, b2)

    return out.reshape(*orig_shape[:-1], out_f)


def init_sine_layer_params(key, in_features, out_features, is_first=False, omega_0=30.0):
    """Matches SineLayer.init_weights(): uniform weight, zero bias."""
    if is_first:
        bound = (1.0 / in_features) * omega_0
    else:
        bound = float(np.sqrt(3.0 / in_features))
    weight = jax.random.uniform(
        key, (out_features, in_features), dtype=jnp.float32,
        minval=-bound, maxval=bound)
    bias = jnp.zeros((out_features,), dtype=jnp.float32)
    return weight, bias


def sine_layer_ref(x, weight, bias):
    # Pure-JAX reference (same semantics as the PyTorch forward).
    return jnp.sin(x @ weight.T + bias)


if __name__ == "__main__":
    key = jax.random.PRNGKey(0)
    k_x, k_w = jax.random.split(key)

    # Small SIREN-like shapes: (2, 150) coordinate batch (flattens to B=300 ->
    # exercises the 2-block megacore grid AND the ragged last block), 128 -> 128
    # features (lane-dense multiples of 128).
    batch_dims = (2, 150)
    in_features = 128
    out_features = 128

    x = jax.random.normal(k_x, (*batch_dims, in_features), dtype=jnp.float32)
    weight, bias = init_sine_layer_params(
        k_w, in_features, out_features, is_first=True, omega_0=30.0)

    ref = sine_layer_ref(x, weight, bias)

    # Default f32 path (matches the PyTorch module).
    out = jax.block_until_ready(sine_layer(x, weight, bias))
    np.testing.assert_allclose(np.asarray(out), np.asarray(ref), rtol=1e-5, atol=1e-5)

    # bf16 MXU path (v6e/v7x): bf16 matmul inputs, f32 accumulation + bias + sin.
    # Loose tolerance: sin amplifies argument rounding error.
    out_bf16 = jax.block_until_ready(
        sine_layer(x, weight, bias, compute_dtype=jnp.bfloat16))
    np.testing.assert_allclose(np.asarray(out_bf16), np.asarray(ref),
                               rtol=5e-2, atol=1e-1)

    print("KERNEL_OK")
</pallas_src>

<mosaic_0001>
module attributes {stable_mosaic.version = 11 : i64} {
  func.func @sine_layer_kernel(%arg0: i32, %arg1: memref<152x128xf32, #tpu.memory_space<vmem>>, %arg2: memref<128x128xf32, #tpu.memory_space<vmem>>, %arg3: memref<1x128xf32, #tpu.memory_space<vmem>>, %arg4: memref<152x128xf32, #tpu.memory_space<vmem>>) attributes {dimension_semantics = [#tpu.dimension_semantics<parallel>], iteration_bounds = array<i64: 2>, scalar_prefetch = 0 : i64, scratch_operands = 0 : i64, tpu.core_type = #tpu.core_type<tc>, window_params = [{transform_indices = @transform_0, window_bounds = array<i64: 152, 128>}, {pipeline_mode = #tpu.pipeline_mode<synchronous>, transform_indices = @transform_1, window_bounds = array<i64: 128, 128>}, {pipeline_mode = #tpu.pipeline_mode<synchronous>, transform_indices = @transform_2, window_bounds = array<i64: 1, 128>}, {transform_indices = @transform_3, window_bounds = array<i64: 152, 128>}]} {
    %c0 = arith.constant 0 : index
    %c0_0 = arith.constant 0 : index
    %0 = vector.load %arg1[%c0, %c0_0] : memref<152x128xf32, #tpu.memory_space<vmem>>, vector<152x128xf32>
    %c0_1 = arith.constant 0 : index
    %c0_2 = arith.constant 0 : index
    %1 = vector.load %arg2[%c0_1, %c0_2] : memref<128x128xf32, #tpu.memory_space<vmem>>, vector<128x128xf32>
    %cst = arith.constant dense<0.000000e+00> : vector<152x128xf32>
    %2 = tpu.matmul %0, %1, %cst {dimension_numbers = #tpu.dot_dimension_numbers<[1], [0], [0], [1], [0, 0, 1, 1], [], []>} : vector<152x128xf32>, vector<128x128xf32>, vector<152x128xf32> -> vector<152x128xf32>
    %c0_3 = arith.constant 0 : index
    %c0_4 = arith.constant 0 : index
    %3 = vector.load %arg3[%c0_3, %c0_4] : memref<1x128xf32, #tpu.memory_space<vmem>>, vector<1x128xf32>
    %4 = vector.broadcast %3 : vector<1x128xf32> to vector<152x128xf32>
    %5 = arith.addf %2, %4 : vector<152x128xf32>
    %6 = math.sin %5 : vector<152x128xf32>
    %c0_5 = arith.constant 0 : index
    %c0_6 = arith.constant 0 : index
    %7 = vector.load %arg4[%c0_5, %c0_6] : memref<152x128xf32, #tpu.memory_space<vmem>>, vector<152x128xf32>
    tpu.vector_store %arg4[%c0_5, %c0_6], %6 {strides = array<i32>} : memref<152x128xf32, #tpu.memory_space<vmem>>, vector<152x128xf32>,
    return
  }
  func.func @transform_0(%arg0: i32) -> (i32, i32) {
    %c0_i32 = arith.constant 0 : i32
    %c0_i32_0 = arith.constant 0 : i32
    return %arg0, %c0_i32 : i32, i32
  }
  func.func @transform_1(%arg0: i32) -> (i32, i32) {
    %c0_i32 = arith.constant 0 : i32
    %c0_i32_0 = arith.constant 0 : i32
    %c0_i32_1 = arith.constant 0 : i32
    return %c0_i32, %c0_i32_0 : i32, i32
  }
  func.func @transform_2(%arg0: i32) -> (i32, i32) {
    %c0_i32 = arith.constant 0 : i32
    %c0_i32_0 = arith.constant 0 : i32
    %c0_i32_1 = arith.constant 0 : i32
    return %c0_i32, %c0_i32_0 : i32, i32
  }
  func.func @transform_3(%arg0: i32) -> (i32, i32) {
    %c0_i32 = arith.constant 0 : i32
    %c0_i32_0 = arith.constant 0 : i32
    return %arg0, %c0_i32 : i32, i32
  }
}

</mosaic_0001>

<bundles_post_ra>
// kernel: tpu_custom_call.1
= control target key start
LH: loop header
LB: loop body
LE: loop exit
PB: predicated region body
PF: predicated region fallthrough
CT: control target
= control target key end

     0   :  { %8 = vsyncpa [#allocation3], 0  ;;  %s6024_s0 = inlined_call_operand.hbm [shape: f32[300,128], index: 0, kind: input, shape index: {}]   ;;  %s6025_s1 = inlined_call_operand.hbm [shape: f32[128,128], index: 1, kind: input, shape index: {}]   ;;  %s6026_s2 = inlined_call_operand.vmem [shape: f32[1,128], index: 2, kind: input, shape index: {}]   ;;  %s6027_s3 = inlined_call_operand.hbm [shape: f32[300,128], index: 3, kind: output, shape index: {}]  }
   0x1   :  { %10 = vsyncpa [#allocation3 + $0x1], 0 }
   0x2   :  { %11 = vsyncpa [#allocation6], 0 }
   0x3   :  { %12 = vsyncpa [#allocation4], 0 }
   0x4   :  { %14 = vsyncpa [#allocation4 + $0x1], 0  ;;  %s3742_s12 = smov 0   ;;  %s3744_s13 = smov 0  }
   0x5   :  { %s3746_s14 = smov 0   ;;  %s3748_s15 = smov 0  }
   0x6 LB: > { %s3763_s16 = sadd.s32 4294967295, %s3708_s15   ;;  %s3386_s17 = sadd.s32 4294967294, %s3708_s15   ;;  %s3708_s15 = sphi %s3748_s15, %s6069_s15   ;;  %s3704_s14 = sphi %s3746_s14, %s6068_s14   ;;  %s3700_s13 = sphi %s3744_s13, %s6067_s13   ;;  %s3696_s12 = sphi %s3742_s12, %s6066_s12  }
   0x7   : > { %p40_p0 = scmp.ne.s32.totalorder %s3700_s13, %s3696_s12  ;;  %p41_p1 = scmp.eq.s32.totalorder %s3763_s16, 0 }
   0x8   : > { %p106_p2 = scmp.eq.s32.totalorder %s3763_s16, 1  ;;  %p112_p3 = scmp.eq.s32.totalorder %s3386_s17, 1 }
   0x9   : > { %p3772_p4 = por %p41_p1, %p40_p0  ;;  %p3387_p5 = scmp.ge.s32.totalorder %s3708_s15, 1 }
   0xa   : > { %p3777_p6 = por %p112_p3, %p40_p0  ;;  %p119_p7 = scmp.lt.s32.totalorder %s3708_s15, 3 }
   0xb   : > { %s130_s22 = sshll.u32 %s6025_s1, 4  ;;  %s3710_s24 = smov [#allocation5]   ;;  %s131_s22 = int_to_ptr.hbm [resolvable:$true] %s130_s22 }
   0xc   : > { %p3785_p8 = pnand %p3387_p5, %p119_p7  ;;  %s132_s25 = sshll.u32 %s3710_s24, 4  ;;  %s133_s25 = int_to_ptr.vmem [resolvable:$true] %s132_s25 }
   0xd   : > { %s3795_s26 = sadd.s32 1, %s3708_s15   ;;  %s6028_s27 = smov 128  }
   0xe   : > { %p3513_p9 = pneg %p3785_p8  ;;  %s3712_s28 = smov 8  }
   0xf   : > { %s24_s29 = ssub.s32 %s3708_s15, %s3795_s26  ;;  %s27_s30 = sadd.s32 1, %s3704_s14 }
  0x10   : > { %p3514_p10 = pnand %p3513_p9, %p41_p1  ;;  %p25_p12 = scmp.eq.s32.totalorder %s24_s29, 0 }
  0x11   : > { %p34_p13 = scmp.ne.s32.totalorder %s3704_s14, %s3700_s13  ;;  %p35_p0 = scmp.eq.s32.totalorder %s3708_s15, 0 }
  0x12   : > { %3516 = dma.hbm_to_vmem [thread:$0]  (!%p3514_p10), %s131_s22, 2048, %s133_s25, [#allocation6], %s6028_s27, %s6028_s27, %s3712_s28  }
  0x13   : > { %p3526_p3 = scmp.lt.s32.totalorder %s3708_s15, 2  ;;  %p36_p5 = por %p35_p0, %p34_p13 }
  0x14   : > { %s3808_s4 = scalar_select %p25_p12, %s3704_s14, %s27_s30  }
  0x15   : > { %p3812_p7 = por %p106_p2, %p34_p13  ;;  %s149_s6 = sand.u32 1, %s3704_s14  }
  0x16   : > { %s3453_s7 = smul.u32 152, %s3708_s15  ;;  %p3821_p9 = pnand %p3526_p3, %p36_p5 }
  0x17   : > { %s3503_s8 = smul.u32 152, %s149_s6  ;;  %s150_s24 = scalar_lea.sflag [#allocation3], %s149_s6 }
  0x18   : > { %s158_s11 = scalar_lea.hbm %s6024_s0, %s3453_s7  ;;  %p3612_p10 = pneg %p3821_p9 }
  0x19   : > { %s159_s20 = sshll.u32 %s158_s11, 4  ;;  %s153_s21 = scalar_lea.vmem [#allocation2], %s3503_s8  ;;  %s160_s20 = int_to_ptr.hbm [resolvable:$true] %s159_s20 }
  0x1a   : > { %s161_s22 = sshll.u32 %s153_s21, 4  ;;  %s3608_s25 = sshra.s32 %s160_s20, 4  ;;  %s162_s22 = int_to_ptr.vmem [resolvable:$true] %s161_s22  ;;  %s3609_s25 = int_to_ptr.hbm [resolvable:$true] %s3608_s25 }
  0x1b   : > { %s3610_s29 = scalar_lea.hbm %s3609_s25, 152  ;;  %s3615_s9 = scalar_lea.hbm %s6024_s0, 304 }
  0x1c   : > { %p3611_p2 = scmp.ne.s32.totalorder %s3609_s25, %s3610_s29  ;;  %p3616_p0 = scmp.lt.s32.totalorder %s3609_s25, %s6024_s0 }
  0x1d   : > { %p3617_p3 = scmp.lt.s32.totalorder %s3615_s9, %s3610_s29 }
  0x1e   : > { %p3613_p12 = pnand %p3612_p10, %p3611_p2 }
  0x1f   : > { %p3618_p5 = por %p3617_p3, %p3616_p0 }
  0x20   : > { %p3614_p13 = pneg %p3613_p12 }
  0x22   : > { %p3619_p11 = pnand %p3618_p5, %p3614_p13 }
  0x24   : > { %3622 = shalt.err (!%p3619_p11)
}
  0x25   : > { %s6034_s6 = smov 128   ;;  %173 = sbr.rel (%p3785_p8) target bundleno = 961 (0x3c1), region = 32 }
  0x26   : > { %3520 = dma.hbm_to_vmem [thread:$0]  (!%p3821_p9), %s160_s20, 2432, %s162_s22, %s150_s24, %s6034_s6, %s6034_s6, %s3712_s28  }
  0x27   : > { %s3841_s8 = sand.u32 (!%p3785_p8), 1, %s3700_s13  }
  0x28   : > { %s3504_s27 = smul.u32 (!%p3785_p8), 152, %s3841_s8  ;;  %s176_s11 = scalar_lea.sflag (!%p3785_p8), [#allocation3], %s3841_s8 }
  0x2a   : > { %s3847_s21 = scalar_lea.vmem [#allocation2], %s3504_s27 }
  0x2b   : > { %3683 = dma.done.wait (%p3772_p4), %s176_s11, 2432  }
  0x2c   : > { %3685 = vsyncadd (%p3772_p4), %s176_s11, 4294964864 }
  0x2d   : > { %3687 = dma.done.wait (%p41_p1), [#allocation6], 2048  }
  0x2e   : > { %3689 = vsyncadd (%p41_p1), [#allocation6], 4294965248  ;;  %v244_v0 = vld [vmem:[#allocation5 + $0x78] sm:$0xff]  ;;  %v243_v1 = vld [vmem:[#allocation5 + $0x70] sm:$0xff]  ;;  %s4190_s28 = scalar_lea.vmem [#allocation7], %s3504_s27  ;;  %s3454_s9 = smul.u32 152, %s3763_s16 }
  0x2f   : > { %249 = vmatpush.msra.mxu0 %v244_v0  ;;  %3455 = vmatpush.msra.mxu1 %v244_v0  ;;  %v242_v2 = vld [vmem:[#allocation5 + $0x68] sm:$0xff]  ;;  %v241_v3 = vld [vmem:[#allocation5 + $0x60] sm:$0xff]  ;;  %v240_v4 = vld [vmem:[#allocation5 + $0x58] sm:$0xff]  ;;  %s3300_s11 = sshll.u32 %s4190_s28, 4  ;;  %s3288_s16 = scalar_lea.sflag [#allocation4], %s3841_s8  ;;  %s3301_s11 = int_to_ptr.vmem [resolvable:$true] %s3300_s11 }
  0x30   : > { %3456 = vmatpush.msra.mxu2 %v244_v0  ;;  %3457 = vmatpush.msra.mxu3 %v244_v0  ;;  %v239_v5 = vld [vmem:[#allocation5 + $0x50] sm:$0xff]  ;;  %v238_v6 = vld [vmem:[#allocation5 + $0x48] sm:$0xff]  ;;  %v237_v7 = vld [vmem:[#allocation5 + $0x40] sm:$0xff]  ;;  %v3713_v0 = vmov 683565275   ;;  %s3299_s27 = scalar_lea.hbm %s6027_s3, %s3454_s9  ;;  %s3658_s22 = scalar_lea.hbm %s6027_s3, 304 }
  0x31   : > { %250 = vmatpush.msra.mxu0 %v243_v1  ;;  %3458 = vmatpush.msra.mxu1 %v243_v1  ;;  %v236_v8 = vld [vmem:[#allocation5 + $0x38] sm:$0xff]  ;;  %v235_v9 = vld [vmem:[#allocation5 + $0x30] sm:$0xff]  ;;  %v234_v10 = vld [vmem:[#allocation5 + $0x28] sm:$0xff] }
  0x32   : > { %3459 = vmatpush.msra.mxu2 %v243_v1  ;;  %3460 = vmatpush.msra.mxu3 %v243_v1  ;;  %v233_v11 = vld [vmem:[#allocation5 + $0x20] sm:$0xff]  ;;  %v232_v12 = vld [vmem:[#allocation5 + $0x18] sm:$0xff]  ;;  %v231_v13 = vld [vmem:[#allocation5 + $0x10] sm:$0xff] }
  0x33   : > { %251 = vmatpush.msra.mxu0 %v242_v2  ;;  %3461 = vmatpush.msra.mxu1 %v242_v2  ;;  %v230_v14 = vld [vmem:[#allocation5 + $0x8] sm:$0xff]  ;;  %v229_v15 = vld [vmem:[#allocation5] sm:$0xff]  ;;  %v215_v17 = vld [vmem:[%s3847_s21 + $0x28] sm:$0xff] }
  0x34   : > { %3462 = vmatpush.msra.mxu2 %v242_v2  ;;  %3463 = vmatpush.msra.mxu3 %v242_v2  ;;  %v210_v16 = vld [vmem:[%s3847_s21] sm:$0xff]  ;;  %v219_v18 = vld [vmem:[%s3847_s21 + $0x48] sm:$0xff]  ;;  %v224_v19 = vld [vmem:[%s3847_s21 + $0x70] sm:$0xff]  ;;  %v3714_v2 = vmov 2475754826  }
  0x35   : > { %252 = vmatpush.msra.mxu0 %v241_v3  ;;  %3464 = vmatpush.msra.mxu1 %v241_v3  ;;  %v211_v20 = vld [vmem:[%s3847_s21 + $0x8] sm:$0xff]  ;;  %v216_v21 = vld [vmem:[%s3847_s21 + $0x30] sm:$0xff]  ;;  %v225_v23 = vld [vmem:[%s3847_s21 + $0x78] sm:$0xff] }
  0x36   : > { %3465 = vmatpush.msra.mxu2 %v241_v3  ;;  %3466 = vmatpush.msra.mxu3 %v241_v3  ;;  %v220_v22 = vld [vmem:[%s3847_s21 + $0x50] sm:$0xff]  ;;  %v217_v25 = vld [vmem:[%s3847_s21 + $0x38] sm:$0xff]  ;;  %v226_v27 = vld [vmem:[%s3847_s21 + $0x80] sm:$0xff] }
  0x37   : > { %253 = vmatpush.msra.mxu0 %v240_v4  ;;  %3467 = vmatpush.msra.mxu1 %v240_v4  ;;  %v212_v24 = vld [vmem:[%s3847_s21 + $0x10] sm:$0xff]  ;;  %v221_v26 = vld [vmem:[%s3847_s21 + $0x58] sm:$0xff]  ;;  %v218_v29 = vld [vmem:[%s3847_s21 + $0x40] sm:$0xff] }
  0x38   : > { %3468 = vmatpush.msra.mxu2 %v240_v4  ;;  %3469 = vmatpush.msra.mxu3 %v240_v4  ;;  %v213_v28 = vld [vmem:[%s3847_s21 + $0x18] sm:$0xff]  ;;  %v222_v30 = vld [vmem:[%s3847_s21 + $0x60] sm:$0xff]  ;;  %v227_v31 = vld [vmem:[%s3847_s21 + $0x88] sm:$0xff]  ;;  %v3715_v4 = vmov 2131351028  }
  0x39   : > { %254 = vmatpush.msra.mxu0 %v239_v5  ;;  %3470 = vmatpush.msra.mxu1 %v239_v5  ;;  %v214_v32 = vld [vmem:[%s3847_s21 + $0x20] sm:$0xff]  ;;  %v223_v33 = vld [vmem:[%s3847_s21 + $0x68] sm:$0xff]  ;;  %v228_v34 = vld [vmem:[%s3847_s21 + $0x90] sm:$0xff]  ;;  %s3302_s21 = sshll.u32 %s3299_s27, 4  ;;  %s3303_s21 = int_to_ptr.hbm [resolvable:$true] %s3302_s21 }
  0x3a   : > { %3471 = vmatpush.msra.mxu2 %v239_v5  ;;  %3472 = vmatpush.msra.mxu3 %v239_v5  ;;  %v3879_v35 = vld [vmem:[%s6026_s2] ss:$0 sm:$0xff]  ;;  %s3652_s18 = sshra.s32 %s3303_s21, 4  ;;  %s3653_s18 = int_to_ptr.hbm [resolvable:$true] %s3652_s18 }
  0x3b   : > { %255 = vmatpush.msra.mxu0 %v238_v6  ;;  %3473 = vmatpush.msra.mxu1 %v238_v6  ;;  %s3654_s23 = scalar_lea.hbm %s3653_s18, 152  ;;  %p3659_p11 = scmp.lt.s32.totalorder %s3653_s18, %s6027_s3 }
  0x3c   : > { %3474 = vmatpush.msra.mxu2 %v238_v6  ;;  %3475 = vmatpush.msra.mxu3 %v238_v6  ;;  %v3716_v6 = vmov 2102212464   ;;  %p3655_p1 = scmp.ne.s32.totalorder %s3653_s18, %s3654_s23  ;;  %p3660_p9 = scmp.lt.s32.totalorder %s3658_s22, %s3654_s23 }
  0x3d   : > { %256 = vmatpush.msra.mxu0 %v237_v7  ;;  %3476 = vmatpush.msra.mxu1 %v237_v7 }
  0x3e   : > { %3477 = vmatpush.msra.mxu2 %v237_v7  ;;  %3478 = vmatpush.msra.mxu3 %v237_v7  ;;  %p3656_p4 = pnand %p3655_p1, %p3812_p7  ;;  %p3661_p2 = por %p3660_p9, %p3659_p11 }
  0x3f   : > { %257 = vmatpush.msra.mxu0 %v236_v8  ;;  %3479 = vmatpush.msra.mxu1 %v236_v8 }
  0x40   : > { %3480 = vmatpush.msra.mxu2 %v236_v8  ;;  %3481 = vmatpush.msra.mxu3 %v236_v8  ;;  %v3717_v8 = vmov 920167782   ;;  %p3657_p8 = pneg %p3656_p4 }
  0x41   : > { %258 = vmatpush.msra.mxu0 %v235_v9  ;;  %3482 = vmatpush.msra.mxu1 %v235_v9 }
  0x42   : > { %3483 = vmatpush.msra.mxu2 %v235_v9  ;;  %3484 = vmatpush.msra.mxu3 %v235_v9  ;;  %p3662_p10 = pnand %p3661_p2, %p3657_p8 }
  0x43   : > { %259 = vmatpush.msra.mxu0 %v234_v10  ;;  %3485 = vmatpush.msra.mxu1 %v234_v10 }
  0x44   : > { %3486 = vmatpush.msra.mxu2 %v234_v10  ;;  %3487 = vmatpush.msra.mxu3 %v234_v10 }
  0x45   : > { %260 = vmatpush.msra.mxu0 %v233_v11  ;;  %3488 = vmatpush.msra.mxu1 %v233_v11 }
  0x46   : > { %3489 = vmatpush.msra.mxu2 %v233_v11  ;;  %3490 = vmatpush.msra.mxu3 %v233_v11 }
  0x47   : > { %261 = vmatpush.msra.mxu0 %v232_v12  ;;  %3491 = vmatpush.msra.mxu1 %v232_v12 }
  0x48   : > { %3492 = vmatpush.msra.mxu2 %v232_v12  ;;  %3493 = vmatpush.msra.mxu3 %v232_v12 }
  0x49   : > { %262 = vmatpush.msra.mxu0 %v231_v13  ;;  %3494 = vmatpush.msra.mxu1 %v231_v13 }
  0x4a   : > { %3495 = vmatpush.msra.mxu2 %v231_v13  ;;  %3496 = vmatpush.msra.mxu3 %v231_v13 }
  0x4b   : > { %263 = vmatpush.msra.mxu0 %v230_v14  ;;  %3497 = vmatpush.msra.mxu1 %v230_v14 }
  0x4c   : > { %3498 = vmatpush.msra.mxu2 %v230_v14  ;;  %3499 = vmatpush.msra.mxu3 %v230_v14 }
  0x4d   : > { %264 = vmatpush.msra.mxu0 %v229_v15  ;;  %3500 = vmatpush.msra.mxu1 %v229_v15 }
  0x4e   : > { %3501 = vmatpush.msra.mxu2 %v229_v15  ;;  %3502 = vmatpush.msra.mxu3 %v229_v15 }
  0x4f   : > { %265 = vmatmul.f32.vlgmr.msra.gmra.mxu0 %v210_v16  ;;  %280 = vmatmul.f32.vlgmr.msra.gmra.mxu1 %v215_v17  ;;  %v3718_v17 = vmov 1326507024  }
  0x50   : > { %292 = vmatmul.f32.vlgmr.msra.gmra.mxu2 %v219_v18  ;;  %307 = vmatmul.f32.vlgmr.msra.gmra.mxu3 %v224_v19 }
  0x57   : > { %268 = vmatmul.f32.gmra.mxu0 %v211_v20  ;;  %283 = vmatmul.f32.gmra.mxu1 %v216_v21 }
  0x58   : > { %295 = vmatmul.f32.gmra.mxu2 %v220_v22  ;;  %310 = vmatmul.f32.gmra.mxu3 %v225_v23 }
  0x5f   : > { %271 = vmatmul.f32.gmra.mxu0 %v212_v24  ;;  %286 = vmatmul.f32.gmra.mxu1 %v217_v25 }
  0x60   : > { %298 = vmatmul.f32.gmra.mxu2 %v221_v26  ;;  %313 = vmatmul.f32.gmra.mxu3 %v226_v27 }
  0x67   : > { %274 = vmatmul.f32.gmra.mxu0 %v213_v28  ;;  %289 = vmatmul.f32.gmra.mxu1 %v218_v29 }
  0x68   : > { %301 = vmatmul.f32.gmra.mxu2 %v222_v30  ;;  %316 = vmatmul.f32.gmra.mxu3 %v227_v31 }
  0x6f   : > { %277 = vmatmul.f32.gmra.mxu0 %v214_v32 }
  0x70   : > { %304 = vmatmul.f32.gmra.mxu2 %v223_v33  ;;  %319 = vmatmul.f32.gmra.mxu3 %v228_v34 }
  0xcc   : > { %v266_v36 = vpop.f32.mrf.mxu0  ;;  %v281_v37 = vpop.f32.mrf.mxu1 }
  0xcd   : > { %v3882_v38 = vadd.f32 %v3879_v35, %v266_v36  ;;  %v3885_v39 = vadd.f32 %v3879_v35, %v281_v37 }
  0xcf   : > { %v323_v40 = vand.u32 2147483647, %v3882_v38  ;;  %v326_v41 = vand.u32 2139095040, %v3882_v38  ;;  %v1098_v42 = vand.u32 2147483647, %v3885_v39  ;;  %v1101_v43 = vand.u32 2139095040, %v3885_v39 }
  0xd1   : > { %v327_v44 = vshrl.u32 %v326_v41, 23  ;;  %v330_v45 = vand.u32 8388607, %v323_v40  ;;  %v1102_v46 = vshrl.u32 %v1101_v43, 23  ;;  %v1105_v47 = vand.u32 8388607, %v1098_v42 }
  0xd3   : > { %v3393_v48 = vadd.s32 4294967169, %v327_v44  ;;  %v331_v49 = vor.u32 8388608, %v330_v45  ;;  %v3408_v50 = vadd.s32 4294967169, %v1102_v46  ;;  %v1106_v52 = vor.u32 8388608, %v1105_v47  ;;  %v293_v54 = vpop.f32.mrf.mxu2 }
  0xd4   : > { %v3898_v59 = vadd.f32 %v3879_v35, %v293_v54 }
  0xd5   : > { %v333_v51 = vadd.s32 1, %v3393_v48  ;;  %v1108_v53 = vadd.s32 1, %v3408_v50  ;;  %v3895_v56 = vshll.u32 %v331_v49, 8  ;;  %v3904_v62 = vshll.u32 %v1106_v52, 8 }
  0xd6   : > { %v1721_v15 = vand.u32 2139095040, %v3898_v59 }
  0xd7   : > { %vm334_vm0 = vcmp.gt.s32.totalorder %v333_v51, 0  ;;  %vm1109_vm1 = vcmp.gt.s32.totalorder %v1108_v53, 0  ;;  %v372_v10 = vand.u32 65535, %v3895_v56  ;;  %v373_v11 = vshrl.u32 %v3895_v56, 16 }
  0xd8   : > { %v335_v55 = vsel %vm334_vm0, %v333_v51, 0  ;;  %v1110_v58 = vsel %vm1109_vm1, %v1108_v53, 0  ;;  %v3926_v25 = vand.u32 65535, %v3904_v62  ;;  %v3957_v45 = vshrl.u32 %v3904_v62, 16 }
  0xd9   : > { %v337_v57 = vand.u32 31, %v335_v55  ;;  %v3900_v60 = vshrl.u32 %v335_v55, 5  ;;  %v3902_v61 = vand.u32 31, %v1110_v58  ;;  %v3963_v52 = vshrl.u32 %v1110_v58, 5 }
  0xdb   : > { %v338_v63 = vsub.s32 32, %v337_v57  ;;  %v340_v1 = vshll.u32 %v3713_v0, %v337_v57  ;;  %v343_v3 = vshll.u32 %v3714_v2, %v337_v57  ;;  %v346_v5 = vshll.u32 %v3715_v4, %v337_v57 }
  0xdc   : > { %v349_v7 = vshll.u32 %v3716_v6, %v337_v57  ;;  %v352_v9 = vshll.u32 %v3717_v8, %v337_v57  ;;  %vm355_vm2 = vcmp.lt.s32.totalorder %v3900_v60, 1  ;;  %vm358_vm3 = vcmp.lt.s32.totalorder %v3900_v60, 4 }
  0xdd   : > { %v341_v12 = vshrl.u32 %v3714_v2, %v338_v63  ;;  %v344_v13 = vshrl.u32 %v3715_v4, %v338_v63  ;;  %v347_v14 = vshrl.u32 %v3716_v6, %v338_v63  ;;  %v350_v16 = vshrl.u32 %v3717_v8, %v338_v63 }
  0xde   : > { %v353_v18 = vshrl.u32 %v3718_v17, %v338_v63  ;;  %v3922_v22 = vsub.s32 32, %v3902_v61  ;;  %vm357_vm4 = vcmp.lt.s32.totalorder %v3900_v60, 3  ;;  %v339_v26 = vshrl.u32 %v3713_v0, %v338_v63 }
  0xdf   : > { %v342_v19 = vor.u32 %v341_v12, %v340_v1  ;;  %v345_v20 = vor.u32 %v344_v13, %v343_v3  ;;  %v348_v21 = vor.u32 %v347_v14, %v346_v5  ;;  %v351_v23 = vor.u32 %v350_v16, %v349_v7 }
  0xe0   : > { %v354_v24 = vor.u32 %v353_v18, %v352_v9  ;;  %vm356_vm5 = vcmp.lt.s32.totalorder %v3900_v60, 2  ;;  %v1115_v31 = vshll.u32 %v3713_v0, %v3902_v61  ;;  %v1118_v32 = vshll.u32 %v3714_v2, %v3902_v61 }
  0xe1   : > { %v363_v27 = vsel %vm355_vm2, %v342_v19, %v345_v20  ;;  %v367_v28 = vsel %vm355_vm2, %v345_v20, %v348_v21  ;;  %v364_v29 = vsel %vm358_vm3, %v351_v23, 920167782  ;;  %v360_v33 = vsel %vm358_vm3, %v348_v21, 2102212464 }
  0xe2   : > { %v368_v30 = vsel %vm358_vm3, %v354_v24, 1326507024  ;;  %v365_v34 = vsel %vm357_vm4, %v348_v21, %v364_v29  ;;  %v1116_v37 = vshrl.u32 %v3714_v2, %v3922_v22  ;;  %v1119_v44 = vshrl.u32 %v3715_v4, %v3922_v22 }
  0xe3   : > { %v369_v36 = vsel %vm357_vm4, %v351_v23, %v368_v30  ;;  %v366_v41 = vsel %vm356_vm5, %v363_v27, %v365_v34  ;;  %v359_v50 = vsel %vm355_vm2, %v339_v26, %v342_v19  ;;  %v361_v51 = vsel %vm357_vm4, %v345_v20, %v360_v33 }
  0xe4   : > { %v370_v43 = vsel %vm356_vm5, %v367_v28, %v369_v36  ;;  %v396_v48 = vand.u32 65535, %v366_v41  ;;  %v397_v49 = vshrl.u32 %v366_v41, 16  ;;  %v3965_v53 = vor.u32 %v1116_v37, %v1115_v31 }
  0xe5   : > { %v374_v46 = vand.u32 65535, %v370_v43  ;;  %v375_v47 = vshrl.u32 %v370_v43, 16  ;;  %v3967_v57 = vor.u32 %v1119_v44, %v1118_v32  ;;  %v1121_v63 = vshll.u32 %v3715_v4, %v3902_v61 }
  0xe6   : > { %v399_v3 = vmul.u32 %v397_v49, %v372_v10  ;;  %v400_v5 = vmul.u32 %v396_v48, %v373_v11  ;;  %v1122_v7 = vshrl.u32 %v3716_v6, %v3922_v22  ;;  %v398_v13 = vmul.u32 %v396_v48, %v372_v10 }
  0xe7   : > { %v377_v54 = vmul.u32 %v375_v47, %v372_v10  ;;  %v378_v55 = vmul.u32 %v374_v46, %v373_v11  ;;  %v376_v1 = vmul.u32 %v374_v46, %v372_v10  ;;  %v379_v9 = vmul.u32 %v375_v47, %v373_v11 }
  0xe8   : > { %v401_v58 = vmul.u32 %v397_v49, %v373_v11  ;;  %v402_v19 = vshll.u32 %v399_v3, 16  ;;  %v404_v21 = vshll.u32 %v400_v5, 16  ;;  %v1124_v23 = vshll.u32 %v3716_v6, %v3902_v61 }
  0xe9   : > { %v380_v12 = vshll.u32 %v377_v54, 16  ;;  %v381_v14 = vshrl.u32 %v377_v54, 16  ;;  %v382_v16 = vshll.u32 %v378_v55, 16  ;;  %v383_v18 = vshrl.u32 %v378_v55, 16 }
  0xea   : > { %v3719_v24 = vmov 0   ;;  %vm406_vm7 = vc.u32 %v398_v13, %v402_v19  ;;  %v408_v27 = vadd.s32 %v402_v19, %v398_v13  ;;  %v1125_v28 = vshrl.u32 %v3717_v8, %v3922_v22 }
  0xeb   : > { %vm384_vm6 = vc.u32 %v376_v1, %v380_v12  ;;  %v386_v20 = vadd.s32 %v380_v12, %v376_v1  ;;  %v407_v11 = vsel %vm406_vm7, 1, %v3719_v24  ;;  %v1127_v29 = vshll.u32 %v3717_v8, %v3902_v61 }
  0xec   : > { %v385_v26 = vsel %vm384_vm6, 1, %v3719_v24  ;;  %v409_v31 = vadd.s32 %v407_v11, %v401_v58  ;;  %vm410_vm9 = vc.u32 %v408_v27, %v404_v21  ;;  %v1123_v32 = vor.u32 %v1122_v7, %v1121_v63 }
  0xed   : > { %v387_v10 = vadd.s32 %v385_v26, %v379_v9  ;;  %vm388_vm8 = vc.u32 %v386_v20, %v382_v16  ;;  %v411_v34 = vsel %vm410_vm9, 1, %v3719_v24  ;;  %v1126_v36 = vor.u32 %v1125_v28, %v1124_v23 }
  0xee   : > { %v389_v30 = vsel %vm388_vm8, 1, %v3719_v24  ;;  %v1128_v37 = vshrl.u32 %v3718_v17, %v3922_v22  ;;  %v403_v41 = vshrl.u32 %v399_v3, 16  ;;  %v413_v43 = vadd.s32 %v411_v34, %v409_v31 }
  0xef   : > { %v391_v33 = vadd.s32 %v389_v30, %v387_v10  ;;  %vm1130_vm10 = vcmp.lt.s32.totalorder %v3963_v52, 1  ;;  %vm1132_vm11 = vcmp.lt.s32.totalorder %v3963_v52, 3  ;;  %vm1131_vm12 = vcmp.lt.s32.totalorder %v3963_v52, 2 }
  0xf0   : > { %v1129_v61 = vor.u32 %v1128_v37, %v1127_v29  ;;  %vm1133_vm13 = vcmp.lt.s32.totalorder %v3963_v52, 4  ;;  %v405_v46 = vshrl.u32 %v400_v5, 16  ;;  %v414_v47 = vadd.s32 %v413_v43, %v403_v41 }
  0xf1   : > { %v392_v44 = vadd.s32 %v391_v33, %v381_v14  ;;  %v1138_v48 = vsel %vm1130_vm10, %v3965_v53, %v3967_v57  ;;  %v1139_v49 = vsel %vm1133_vm13, %v1126_v36, 920167782  ;;  %v3997_v55 = vadd.s32 %v408_v27, %v404_v21 }
  0xf2   : > { %v1140_v63 = vsel %vm1132_vm11, %v1123_v32, %v1139_v49  ;;  %v1142_v1 = vsel %vm1130_vm10, %v3967_v57, %v1123_v32  ;;  %v362_v3 = vsel %vm356_vm5, %v359_v50, %v361_v51  ;;  %v415_v5 = vadd.s32 %v414_v47, %v405_v46 }
  0xf3   : > { %v3995_v54 = vadd.s32 %v392_v44, %v383_v18  ;;  %v1141_v7 = vsel %vm1131_vm12, %v1138_v48, %v1140_v63  ;;  %v1143_v9 = vsel %vm1133_vm13, %v1129_v61, 1326507024  ;;  %v1718_v50 = vand.u32 2147483647, %v3898_v59 }
  0xf4   : > { %v1144_v12 = vsel %vm1132_vm11, %v1126_v36, %v1143_v9  ;;  %v1171_v13 = vand.u32 65535, %v1141_v7  ;;  %v419_v58 = vadd.s32 1, %v415_v5  ;;  %v1172_v60 = vshrl.u32 %v1141_v7, 16 }
  0xf5   : > { %vm418_vm14 = vc.u32 %v3995_v54, %v3997_v55  ;;  %v1145_v14 = vsel %vm1131_vm12, %v1142_v1, %v1144_v12  ;;  %v416_v51 = vmul.u32 %v3895_v56, %v362_v3  ;;  %v1722_v26 = vshrl.u32 %v1721_v15, 23 }
  0xf6   : > { %v1149_v16 = vand.u32 65535, %v1145_v14  ;;  %v1150_v18 = vshrl.u32 %v1145_v14, 16  ;;  %v1175_v19 = vmul.u32 %v1171_v13, %v3957_v45  ;;  %v420_v20 = vsel %vm418_vm14, %v419_v58, %v415_v5 }
  0xf7   : > { %v1173_v21 = vmul.u32 %v1171_v13, %v3926_v25  ;;  %v1174_v23 = vmul.u32 %v1172_v60, %v3926_v25  ;;  %v421_v27 = vadd.s32 %v420_v20, %v416_v51  ;;  %v1114_v56 = vshrl.u32 %v3713_v0, %v3922_v22 }
  0xf8   : > { %v1151_v28 = vmul.u32 %v1149_v16, %v3926_v25  ;;  %v1152_v10 = vmul.u32 %v1150_v18, %v3926_v25  ;;  %v1153_v11 = vmul.u32 %v1149_v16, %v3957_v45  ;;  %v1135_v29 = vsel %vm1133_vm13, %v1123_v32, 2102212464 }
  0xf9   : > { %v1177_v30 = vshll.u32 %v1174_v23, 16  ;;  %v1179_v31 = vshll.u32 %v1175_v19, 16  ;;  %v422_v33 = vadd.s32 536870912, %v421_v27  ;;  %v1176_v15 = vmul.u32 %v1172_v60, %v3957_v45 }
  0xfa   : > { %v1155_v34 = vshll.u32 %v1152_v10, 16  ;;  %v1157_v36 = vshll.u32 %v1153_v11, 16  ;;  %v1154_v37 = vmul.u32 %v1150_v18, %v3957_v45  ;;  %v3420_v25 = vadd.s32 4294967169, %v1722_v26 }
  0xfb   : > { %vm1181_vm15 = vc.u32 %v1173_v21, %v1177_v30  ;;  %v1183_v41 = vadd.s32 %v1177_v30, %v1173_v21  ;;  %v423_v43 = vshrl.u32 %v422_v33, 30  ;;  %v1725_v46 = vand.u32 8388607, %v1718_v50 }
  0xfc   : > { %vm1159_vm0 = vc.u32 %v1151_v28, %v1155_v34  ;;  %v1161_v44 = vadd.s32 %v1155_v34, %v1151_v28  ;;  %v1182_v22 = vsel %vm1181_vm15, 1, %v3719_v24  ;;  %v1134_v45 = vsel %vm1130_vm10, %v1114_v56, %v3965_v53 }
  0xfd   : > { %v1160_v61 = vsel %vm1159_vm0, 1, %v3719_v24  ;;  %v1184_v32 = vadd.s32 %v1182_v22, %v1176_v15  ;;  %vm1185_vm1 = vc.u32 %v1183_v41, %v1179_v31  ;;  %v424_v47 = vshll.u32 %v423_v43, 30 }
  0xfe   : > { %v1162_v48 = vadd.s32 %v1160_v61, %v1154_v37  ;;  %vm1163_vm2 = vc.u32 %v1161_v44, %v1157_v36  ;;  %v1136_v49 = vsel %vm1132_vm11, %v3967_v57, %v1135_v29  ;;  %v1186_v1 = vsel %vm1185_vm1, 1, %v3719_v24 }
  0xff   : > { %v1164_v63 = vsel %vm1163_vm2, 1, %v3719_v24  ;;  %v1728_v3 = vadd.s32 1, %v3420_v25  ;;  %v425_v5 = vsub.s32 %v421_v27, %v424_v47  ;;  %v1156_v7 = vshrl.u32 %v1152_v10, 16 }
 0x100   : > { %v1166_v9 = vadd.s32 %v1164_v63, %v1162_v48  ;;  %v1188_v12 = vadd.s32 %v1186_v1, %v1184_v32  ;;  %vm325_vm3 = vcmp.lt.s32.totalorder %v3882_v38, 0  ;;  %v447_v13 = vsub.s32 4, %v423_v43 }
 0x101   : > { %v1178_v58 = vshrl.u32 %v1174_v23, 16  ;;  %vm1729_vm4 = vcmp.gt.s32.totalorder %v1728_v3, 0  ;;  %vm426_vm5 = vcmp.lt.s32.totalorder %v425_v5, 0  ;;  %v427_v53 = vsub.s32 0, %v425_v5 }
 0x102   : > { %v1158_v14 = vshrl.u32 %v1153_v11, 16  ;;  %v1167_v60 = vadd.s32 %v1166_v9, %v1156_v7  ;;  %v1137_v57 = vsel %vm1131_vm12, %v1134_v45, %v1136_v49  ;;  %v1180_v51 = vshrl.u32 %v1175_v19, 16 }
 0x103   : > { %v1189_v16 = vadd.s32 %v1188_v12, %v1178_v58  ;;  %v1730_v18 = vsel %vm1729_vm4, %v1728_v3, 0  ;;  %v428_v20 = vsel %vm426_vm5, %v427_v53, %v425_v5  ;;  %v4049_v26 = vadd.s32 %v1183_v41, %v1179_v31 }
 0x104   : > { %v4047_v21 = vadd.s32 %v1167_v60, %v1158_v14  ;;  %v1726_v27 = vor.u32 8388608, %v1725_v46  ;;  %v429_v28 = vclz %v428_v20  ;;  %v448_v23 = vsel %vm325_vm3, %v447_v13, %v423_v43 }
 0x105   : > { %v1190_v10 = vadd.s32 %v1189_v16, %v1180_v51  ;;  %v1732_v56 = vand.u32 31, %v1730_v18  ;;  %vm4055_vm6 = vcmp.le.f32.partialorder %v323_v40, 0.7853982  ;;  %v417_v19 = vadd.s32 %v3997_v55, %v3995_v54 }
 0x106   : > { %v1191_v11 = vmul.u32 %v3904_v62, %v1137_v57  ;;  %v3394_v29 = vadd.s32 4294967294, %v429_v28  ;;  %vm1193_vm7 = vc.u32 %v4047_v21, %v4049_v26  ;;  %v450_v33 = vsel %vm4055_vm6, 0, %v448_v23 }
 0x107   : > { %v1194_v30 = vadd.s32 1, %v1190_v10  ;;  %v1733_v31 = vsub.s32 32, %v1732_v56  ;;  %v4066_v34 = vshrl.u32 %v1730_v18, 5  ;;  %v1735_v40 = vshll.u32 %v3713_v0, %v1732_v56 }
 0x108   : > { %v4069_v36 = vshll.u32 %v1726_v27, 8  ;;  %vm3395_vm8 = vcmp.lt.s32.totalorder %v3394_v29, 0  ;;  %v1738_v62 = vshll.u32 %v3714_v2, %v1732_v56  ;;  %v1741_v25 = vshll.u32 %v3715_v4, %v1732_v56 }
 0x109   : > { %v1195_v15 = vsel %vm1193_vm7, %v1194_v30, %v1190_v10  ;;  %v1736_v54 = vshrl.u32 %v3714_v2, %v1733_v31  ;;  %v432_v55 = vsel %vm3395_vm8, 0, %v3394_v29  ;;  %v1739_v41 = vshrl.u32 %v3715_v4, %v1733_v31 }
 0x10a   : > { %v1196_v37 = vadd.s32 %v1195_v15, %v1191_v11  ;;  %v433_v43 = vsub.s32 32, %v432_v55  ;;  %v437_v44 = vsub.s32 4294967266, %v432_v55  ;;  %v1742_v22 = vshrl.u32 %v3716_v6, %v1733_v31  ;;  %v308_v15 = vpop.f32.mrf.mxu3 }
 0x10b   : > { %v1744_v61 = vshll.u32 %v3716_v6, %v1732_v56  ;;  %v434_v32 = vshll.u32 %v425_v5, %v432_v55  ;;  %v1737_v47 = vor.u32 %v1736_v54, %v1735_v40  ;;  %v1745_v45 = vshrl.u32 %v3717_v8, %v1733_v31 }
 0x10c   : > { %v1197_v46 = vadd.s32 536870912, %v1196_v37  ;;  %v435_v48 = vshrl.u32 %v417_v19, %v433_v43  ;;  %v438_v49 = vadd.s32 127, %v437_v44  ;;  %v1740_v63 = vor.u32 %v1739_v41, %v1738_v62 }
 0x10d   : > { %v1748_v1 = vshrl.u32 %v3718_v17, %v1733_v31  ;;  %v467_v3 = vadd.s32 3, %v450_v33  ;;  %v1746_v9 = vor.u32 %v1745_v45, %v1744_v61  ;;  %v1743_v58 = vor.u32 %v1742_v22, %v1741_v25 }
 0x10e   : > { %v1198_v7 = vshrl.u32 %v1197_v46, 30  ;;  %v436_v12 = vor.u32 %v435_v48, %v434_v32  ;;  %v439_v13 = vshll.u32 %v438_v49, 23  ;;  %v1747_v53 = vshll.u32 %v3717_v8, %v1732_v56 }
 0x10f   : > { %vm1100_vm9 = vcmp.lt.s32.totalorder %v3885_v39, 0  ;;  %vm1750_vm10 = vcmp.lt.s32.totalorder %v4066_v34, 1  ;;  %v1767_v14 = vand.u32 65535, %v4069_v36  ;;  %v1768_v60 = vshrl.u32 %v4069_v36, 16 }
 0x110   : > { %v1199_v5 = vshll.u32 %v1198_v7, 30  ;;  %v440_v57 = vor.u32 4788187, %v439_v13  ;;  %v1749_v51 = vor.u32 %v1748_v1, %v1747_v53  ;;  %vm1753_vm11 = vcmp.lt.s32.totalorder %v4066_v34, 4 }
 0x111   : > { %v1758_v16 = vsel %vm1750_vm10, %v1737_v47, %v1740_v63  ;;  %v4087_v18 = vand.u32 3, %v467_v3  ;;  %vm1752_vm12 = vcmp.lt.s32.totalorder %v4066_v34, 3  ;;  %v1759_v27 = vsel %vm1753_vm11, %v1746_v9, 920167782 }
 0x112   : > { %v4089_v20 = vsub.s32 %v1196_v37, %v1199_v5  ;;  %v441_v28 = vand.u32 2147483647, %v440_v57  ;;  %v443_v23 = vcvt.s32.f32 %v436_v12  ;;  %vm1751_vm13 = vcmp.lt.s32.totalorder %v4066_v34, 2 }
 0x113   : > { %v1760_v10 = vsel %vm1752_vm12, %v1743_v58, %v1759_v27  ;;  %v1734_v19 = vshrl.u32 %v3713_v0, %v1733_v31  ;;  %v1222_v30 = vsub.s32 4, %v1198_v7  ;;  %v1762_v33 = vsel %vm1750_vm10, %v1740_v63, %v1743_v58 }
 0x114   : > { %vm1201_vm14 = vcmp.lt.s32.totalorder %v4089_v20, 0  ;;  %v1202_v56 = vsub.s32 0, %v4089_v20  ;;  %v1761_v11 = vsel %vm1751_vm13, %v1758_v16, %v1760_v10  ;;  %v444_v29 = vmul.f32 %v443_v23, %v441_v28 }
 0x115   : > { %v1763_v40 = vsel %vm1753_vm11, %v1749_v51, 1326507024  ;;  %v1755_v62 = vsel %vm1753_vm11, %v1743_v58, 2102212464  ;;  %v1791_v55 = vand.u32 65535, %v1761_v11  ;;  %v1792_v43 = vshrl.u32 %v1761_v11, 16 }
 0x116   : > { %v1203_v54 = vsel %vm1201_vm14, %v1202_v56, %v4089_v20  ;;  %v1764_v31 = vsel %vm1752_vm12, %v1746_v9, %v1763_v40  ;;  %v445_v37 = vxor.u32 2147483648, %v444_v29  ;;  %v1192_v44 = vadd.s32 %v4049_v26, %v4047_v21 }
 0x117   : > { %v1204_v41 = vclz %v1203_v54  ;;  %v1765_v25 = vsel %vm1751_vm13, %v1762_v33, %v1764_v31  ;;  %v4117_v22 = vsel %vm1750_vm10, %v1734_v19, %v1737_v47  ;;  %v4120_v32 = vadd.f32 %v3879_v35, %v308_v15 }
 0x118   : > { %v1769_v61 = vand.u32 65535, %v1765_v25  ;;  %v446_v46 = vsel %vm325_vm3, %v445_v37, %v444_v29  ;;  %v4126_v48 = vsel %vm1100_vm9, %v1222_v30, %v1198_v7  ;;  %v1770_v49 = vshrl.u32 %v1765_v25, 16 }
 0x119   : > { %v3409_v45 = vadd.s32 4294967294, %v1204_v41  ;;  %v4131_v21 = vsel %vm4055_vm6, %v3882_v38, %v446_v46  ;;  %v4135_v26 = vsel %vm1752_vm12, %v1740_v63, %v1755_v62  ;;  %v1793_v1 = vmul.u32 %v1791_v55, %v1767_v14 }
 0x11a   : > { %v1773_v47 = vmul.u32 %v1769_v61, %v1768_v60  ;;  %v451_v3 = vmul.f32 %v4131_v21, %v4131_v21  ;;  %v1772_v9 = vmul.u32 %v1770_v49, %v1767_v14  ;;  %v4139_v12 = vmul.u32 %v1792_v43, %v1767_v14 }
 0x11b   : > { %vm3410_vm15 = vcmp.lt.s32.totalorder %v3409_v45, 0  ;;  %v1771_v13 = vmul.u32 %v1769_v61, %v1767_v14  ;;  %v1774_v58 = vmul.u32 %v1770_v49, %v1768_v60  ;;  %v4141_v53 = vmul.u32 %v1791_v55, %v1768_v60 }
 0x11c   : > { %v1207_v7 = vsel %vm3410_vm15, 0, %v3409_v45  ;;  %v452_v52 = vmul.f32 -0.001358992, %v451_v3  ;;  %v459_v5 = vmul.f32 -0.00019511016, %v451_v3  ;;  %v1777_v51 = vshll.u32 %v1773_v47, 16 }
 0x11d   : > { %v1208_v57 = vsub.s32 32, %v1207_v7  ;;  %v1212_v63 = vsub.s32 4294967266, %v1207_v7  ;;  %v1775_v16 = vshll.u32 %v1772_v9, 16  ;;  %v1778_v27 = vshrl.u32 %v1773_v47, 16 }
 0x11e   : > { %v1796_v28 = vmul.u32 %v1792_v43, %v1768_v60  ;;  %v453_v23 = vadd.f32 0.041655596, %v452_v52  ;;  %v460_v10 = vadd.f32 0.008332121, %v459_v5  ;;  %v1209_v56 = vshll.u32 %v4089_v20, %v1207_v7 }
 0x11f   : > { %v1210_v19 = vshrl.u32 %v1192_v44, %v1208_v57  ;;  %v1213_v11 = vadd.s32 127, %v1212_v63  ;;  %vm1779_vm0 = vc.u32 %v1771_v13, %v1775_v16  ;;  %v1781_v29 = vadd.s32 %v1775_v16, %v1771_v13 }
 0x120   : > { %v1797_v14 = vshll.u32 %v4139_v12, 16  ;;  %v454_v30 = vmul.f32 %v453_v23, %v451_v3  ;;  %v461_v33 = vmul.f32 %v460_v10, %v451_v3  ;;  %v1780_v15 = vsel %vm1779_vm0, 1, %v3719_v24 }
 0x121   : > { %v1211_v40 = vor.u32 %v1210_v19, %v1209_v56  ;;  %vm4148_vm1 = vcmp.le.f32.partialorder %v1098_v42, 0.7853982  ;;  %v1214_v60 = vshll.u32 %v1213_v11, 23  ;;  %v1776_v62 = vshrl.u32 %v1772_v9, 16 }
 0x122   : > { %v1782_v20 = vadd.s32 %v1780_v15, %v1774_v58  ;;  %vm1783_vm2 = vc.u32 %v1781_v29, %v1777_v51  ;;  %v455_v31 = vadd.f32 -0.4999988, %v454_v30  ;;  %v462_v55 = vadd.f32 -0.16666654, %v461_v33 }
 0x123   : > { %v1784_v37 = vsel %vm1783_vm2, 1, %v3719_v24  ;;  %v1799_v41 = vshll.u32 %v4141_v53, 16  ;;  %vm470_vm3 = vcmp.eq.s32.totalorder %v4087_v18, 0  ;;  %v1215_v25 = vor.u32 4788187, %v1214_v60 }
 0x124   : > { %v1786_v43 = vadd.s32 %v1784_v37, %v1782_v20  ;;  %vm1801_vm4 = vc.u32 %v1793_v1, %v1797_v14  ;;  %v1803_v44 = vadd.s32 %v1797_v14, %v1793_v1  ;;  %v456_v42 = vmul.f32 %v455_v31, %v451_v3 }
 0x125   : > { %v463_v61 = vmul.f32 %v462_v55, %v451_v3  ;;  %vm469_vm5 = vcmp.lt.s32.totalorder %v4087_v18, 2  ;;  %v1218_v46 = vcvt.s32.f32 %v1211_v40  ;;  %v1802_v45 = vsel %vm1801_vm4, 1, %v3719_v24  ;;  %v269_v55 = vpop.f32.mrf.mxu0 }
 0x126   : > { %vm466_vm6 = vweird.f32 %v3882_v38  ;;  %v1216_v49 = vand.u32 2147483647, %v1215_v25  ;;  %v1787_v47 = vadd.s32 %v1786_v43, %v1776_v62  ;;  %v1804_v9 = vadd.s32 %v1802_v45, %v1796_v28 }
 0x127   : > { %vm1805_vm7 = vc.u32 %v1803_v44, %v1799_v41  ;;  %v457_v7 = vadd.f32 1.0, %v456_v42  ;;  %v464_v13 = vadd.f32 1.0, %v463_v61  ;;  %v1798_v58 = vshrl.u32 %v4139_v12, 16 }
 0x128   : > { %v1806_v52 = vsel %vm1805_vm7, 1, %v3719_v24  ;;  %v1219_v1 = vmul.f32 %v1218_v46, %v1216_v49  ;;  %v1788_v5 = vadd.s32 %v1787_v47, %v1778_v27  ;;  %v2493_v57 = vand.u32 2147483647, %v4120_v32 }
 0x129   : > { %v1808_v3 = vadd.s32 %v1806_v52, %v1804_v9  ;;  %v465_v51 = vmul.f32 %v464_v13, %v4131_v21  ;;  %vm473_vm8 = vcmp.eq.s32.totalorder %v4087_v18, 2  ;;  %v474_v63 = vxor.u32 2147483648, %v457_v7 }
 0x12a   : > { %v2496_v16 = vand.u32 2139095040, %v4120_v32  ;;  %v1220_v28 = vxor.u32 2147483648, %v1219_v1  ;;  %v1800_v23 = vshrl.u32 %v4141_v53, 16  ;;  %v1807_v10 = vadd.s32 %v1803_v44, %v1799_v41 }
 0x12b   : > { %v1809_v56 = vadd.s32 %v1808_v3, %v1798_v58  ;;  %v471_v12 = vxor.u32 2147483648, %v465_v51  ;;  %v1225_v27 = vsel %vm4148_vm1, 0, %v4126_v48  ;;  %v1757_v21 = vsel %vm1751_vm13, %v4117_v22, %v4135_v26 }
 0x12c   : > { %v2497_v19 = vshrl.u32 %v2496_v16, 23  ;;  %v1221_v11 = vsel %vm1100_vm9, %v1220_v28, %v1219_v1  ;;  %vm1813_vm10 = vc.u32 %v1788_v5, %v1807_v10  ;;  %v2500_v53 = vand.u32 8388607, %v2493_v57 }
 0x12d   : > { %v1810_v29 = vadd.s32 %v1809_v56, %v1800_v23  ;;  %v472_v14 = vsel %vm470_vm3, %v457_v7, %v471_v12  ;;  %v475_v48 = vsel %vm473_vm8, %v474_v63, %v465_v51  ;;  %v1224_v34 = vsel %vm4148_vm1, %v3885_v39, %v1221_v11 }
 0x12e   : > { %v3435_v22 = vadd.s32 4294967169, %v2497_v19  ;;  %v476_v26 = vsel %vm469_vm5, %v472_v14, %v475_v48  ;;  %v1226_v30 = vmul.f32 %v1224_v34, %v1224_v34  ;;  %v1242_v33 = vadd.s32 3, %v1225_v27 }
 0x12f   : > { %v1814_v40 = vadd.s32 1, %v1810_v29  ;;  %v477_v15 = vsel %vm466_vm6, nan, %v476_v26  ;;  %v1811_v60 = vmul.u32 %v4069_v36, %v1757_v21  ;;  %v2501_v62 = vor.u32 8388608, %v2500_v53 }
 0x130   : > { %v2503_v20 = vadd.s32 1, %v3435_v22  ;;  %3268 = vst [vmem:[%s4190_s28] sm:$0xff] %v477_v15  ;;  %v1227_v54 = vmul.f32 -0.001358992, %v1226_v30  ;;  %v1234_v31 = vmul.f32 -0.00019511016, %v1226_v30  ;;  %v1243_v38 = vand.u32 3, %v1242_v33 }
 0x131   : > { %v1815_v18 = vsel %vm1813_vm10, %v1814_v40, %v1810_v29  ;;  %v4194_v42 = vshll.u32 %v2501_v62, 8  ;;  %v4197_v61 = vadd.f32 %v3879_v35, %v269_v55  ;;  %vm1720_vm11 = vcmp.lt.s32.totalorder %v3898_v59, 0 }
 0x132   : > { %v1816_v37 = vadd.s32 %v1815_v18, %v1811_v60  ;;  %vm2504_vm9 = vcmp.gt.s32.totalorder %v2503_v20, 0  ;;  %v1228_v41 = vadd.f32 0.041655596, %v1227_v54  ;;  %v1235_v25 = vadd.f32 0.008332121, %v1234_v31 }
 0x133   : > { %v2505_v43 = vsel %vm2504_vm9, %v2503_v20, 0  ;;  %vm4204_vm12 = vcmp.le.f32.partialorder %v1718_v50, 0.7853982  ;;  %v4208_v58 = vadd.s32 %v1807_v10, %v1788_v5  ;;  %v478_v35 = vand.u32 2147483647, %v4197_v61 }
 0x134   : > { %v1817_v44 = vadd.s32 536870912, %v1816_v37  ;;  %v2507_v36 = vand.u32 31, %v2505_v43  ;;  %v1229_v46 = vmul.f32 %v1228_v41, %v1226_v30  ;;  %v1236_v45 = vmul.f32 %v1235_v25, %v1226_v30 }
 0x135   : > { %vm1245_vm13 = vcmp.eq.s32.totalorder %v1243_v38, 0  ;;  %vm1248_vm14 = vcmp.eq.s32.totalorder %v1243_v38, 2  ;;  %v4211_v1 = vshrl.u32 %v2505_v43, 5  ;;  %v4214_v3 = vand.u32 65535, %v4194_v42 }
 0x136   : > { %v1818_v49 = vshrl.u32 %v1817_v44, 30  ;;  %v4200_v47 = vsub.s32 32, %v2507_v36  ;;  %v1230_v9 = vadd.f32 -0.4999988, %v1229_v46  ;;  %v1237_v7 = vadd.f32 -0.16666654, %v1236_v45 }
 0x137   : > { %v481_v51 = vand.u32 2139095040, %v4197_v61  ;;  %vm1244_vm15 = vcmp.lt.s32.totalorder %v1243_v38, 2  ;;  %v4218_v28 = vshrl.u32 %v4194_v42, 16  ;;  %vm1241_vm0 = vweird.f32 %v3885_v39 }
 0x138   : > { %v1819_v52 = vshll.u32 %v1818_v49, 30  ;;  %v1231_v63 = vmul.f32 %v1230_v9, %v1226_v30  ;;  %v1238_v16 = vmul.f32 %v1237_v7, %v1226_v30  ;;  %v1842_v50 = vsub.s32 4, %v1818_v49 }
 0x139   : > { %v2510_v23 = vshll.u32 %v3713_v0, %v2507_v36  ;;  %v2511_v10 = vshrl.u32 %v3714_v2, %v4200_v47  ;;  %v2514_v56 = vshrl.u32 %v3715_v4, %v4200_v47  ;;  %v2513_v21 = vshll.u32 %v3714_v2, %v2507_v36 }
 0x13a   : > { %v1820_v5 = vsub.s32 %v1816_v37, %v1819_v52  ;;  %v1232_v12 = vadd.f32 1.0, %v1231_v63  ;;  %v1239_v27 = vadd.f32 1.0, %v1238_v16  ;;  %v2520_v19 = vshrl.u32 %v3717_v8, %v4200_v47 }
 0x13b   : > { %v2516_v29 = vshll.u32 %v3715_v4, %v2507_v36  ;;  %v2517_v53 = vshrl.u32 %v3716_v6, %v4200_v47  ;;  %v1843_v22 = vsel %vm1720_vm11, %v1842_v50, %v1818_v49  ;;  %v2519_v26 = vshll.u32 %v3716_v6, %v2507_v36 }
 0x13c   : > { %vm1821_vm1 = vcmp.lt.s32.totalorder %v1820_v5, 0  ;;  %v1822_v11 = vsub.s32 0, %v1820_v5  ;;  %v1240_v14 = vmul.f32 %v1239_v27, %v1224_v34  ;;  %v1249_v48 = vxor.u32 2147483648, %v1232_v12 }
 0x13d   : > { %v2512_v33 = vor.u32 %v2511_v10, %v2510_v23  ;;  %v2515_v40 = vor.u32 %v2514_v56, %v2513_v21  ;;  %v2523_v15 = vshrl.u32 %v3718_v17, %v4200_v47  ;;  %v2521_v20 = vor.u32 %v2520_v19, %v2519_v26 }
 0x13e   : > { %v1823_v30 = vsel %vm1821_vm1, %v1822_v11, %v1820_v5  ;;  %v1246_v60 = vxor.u32 2147483648, %v1240_v14  ;;  %v482_v54 = vshrl.u32 %v481_v51, 23  ;;  %v1845_v31 = vsel %vm4204_vm12, 0, %v1843_v22 }
 0x13f   : > { %v1824_v62 = vclz %v1823_v30  ;;  %v2518_v34 = vor.u32 %v2517_v53, %v2516_v29  ;;  %v2522_v18 = vshll.u32 %v3717_v8, %v2507_v36  ;;  %v4242_v55 = vand.u32 8388607, %v478_v35 }
 0x140   : > { %v1247_v37 = vsel %vm1245_vm13, %v1232_v12, %v1246_v60  ;;  %v1250_v41 = vsel %vm1248_vm14, %v1249_v48, %v1240_v14  ;;  %vm2525_vm2 = vcmp.lt.s32.totalorder %v4211_v1, 1  ;;  %vm2528_vm3 = vcmp.lt.s32.totalorder %v4211_v1, 4 }
 0x141   : > { %v3421_v25 = vadd.s32 4294967294, %v1824_v62  ;;  %v1251_v43 = vsel %vm1244_vm15, %v1247_v37, %v1250_v41  ;;  %v2524_v44 = vor.u32 %v2523_v15, %v2522_v18  ;;  %v2533_v46 = vsel %vm2525_vm2, %v2512_v33, %v2515_v40 }
 0x142   : > { %v1252_v36 = vsel %vm1241_vm0, nan, %v1251_v43  ;;  %vm2527_vm5 = vcmp.lt.s32.totalorder %v4211_v1, 3  ;;  %v2534_v45 = vsel %vm2528_vm3, %v2521_v20, 920167782  ;;  %v1862_v9 = vadd.s32 3, %v1845_v31 }
 0x143   : > { %vm3422_vm4 = vcmp.lt.s32.totalorder %v3421_v25, 0  ;;  %3273 = vst [vmem:[%s4190_s28 + $0x28] sm:$0xff] %v1252_v36  ;;  %vm2526_vm6 = vcmp.lt.s32.totalorder %v4211_v1, 2  ;;  %v2535_v38 = vsel %vm2527_vm5, %v2518_v34, %v2534_v45  ;;  %v2537_v51 = vsel %vm2525_vm2, %v2515_v40, %v2518_v34 }
 0x144   : > { %v1827_v49 = vsel %vm3422_vm4, 0, %v3421_v25  ;;  %v2536_v39 = vsel %vm2526_vm6, %v2533_v46, %v2535_v38  ;;  %v2509_v63 = vshrl.u32 %v3713_v0, %v4200_v47  ;;  %v2538_v16 = vsel %vm2528_vm3, %v2524_v44, 1326507024 }
 0x145   : > { %v1828_v7 = vsub.s32 32, %v1827_v49  ;;  %v1832_v52 = vsub.s32 4294967266, %v1827_v49  ;;  %v2566_v50 = vand.u32 65535, %v2536_v39  ;;  %v2567_v23 = vshrl.u32 %v2536_v39, 16 }
 0x146   : > { %v1829_v10 = vshll.u32 %v1820_v5, %v1827_v49  ;;  %v2539_v27 = vsel %vm2527_vm5, %v2521_v20, %v2538_v16  ;;  %v4271_v21 = vand.u32 3, %v1862_v9  ;;  %v2530_v19 = vsel %vm2528_vm3, %v2518_v34, 2102212464 }
 0x147   : > { %v1830_v56 = vshrl.u32 %v4208_v58, %v1828_v7  ;;  %v1833_v12 = vadd.s32 127, %v1832_v52  ;;  %v2540_v47 = vsel %vm2526_vm6, %v2537_v51, %v2539_v27  ;;  %v2569_v11 = vmul.u32 %v2567_v23, %v4214_v3 }
 0x148   : > { %v2544_v14 = vand.u32 65535, %v2540_v47  ;;  %v2545_v5 = vshrl.u32 %v2540_v47, 16  ;;  %v2529_v58 = vsel %vm2525_vm2, %v2509_v63, %v2512_v33  ;;  %v2568_v48 = vmul.u32 %v2566_v50, %v4214_v3 }
 0x149   : > { %v1831_v29 = vor.u32 %v1830_v56, %v1829_v10  ;;  %v1834_v53 = vshll.u32 %v1833_v12, 23  ;;  %v2570_v22 = vmul.u32 %v2566_v50, %v4218_v28  ;;  %v2572_v26 = vshll.u32 %v2569_v11, 16 }
 0x14a   : > { %v2531_v15 = vsel %vm2527_vm5, %v2515_v40, %v2530_v19  ;;  %v2547_v60 = vmul.u32 %v2545_v5, %v4214_v3  ;;  %v3396_v62 = vadd.s32 4294967169, %v482_v54  ;;  %v2548_v31 = vmul.u32 %v2544_v14, %v4218_v28 }
 0x14b   : > { %v1835_v30 = vor.u32 4788187, %v1834_v53  ;;  %v1838_v20 = vcvt.s32.f32 %v1831_v29  ;;  %v2571_v34 = vmul.u32 %v2567_v23, %v4218_v28  ;;  %vm2576_vm7 = vc.u32 %v2568_v48, %v2572_v26 }
 0x14c   : > { %v2546_v33 = vmul.u32 %v2544_v14, %v4214_v3  ;;  %v2550_v37 = vshll.u32 %v2547_v60, 16  ;;  %v2577_v41 = vsel %vm2576_vm7, 1, %v3719_v24  ;;  %v2549_v25 = vmul.u32 %v2545_v5, %v4218_v28 }
 0x14d   : > { %v1836_v18 = vand.u32 2147483647, %v1835_v30  ;;  %v2574_v43 = vshll.u32 %v2570_v22, 16  ;;  %v2578_v44 = vadd.s32 %v2572_v26, %v2568_v48  ;;  %v2579_v40 = vadd.s32 %v2577_v41, %v2571_v34 }
 0x14e   : > { %v2552_v36 = vshll.u32 %v2548_v31, 16  ;;  %vm2554_vm8 = vc.u32 %v2546_v33, %v2550_v37  ;;  %v2556_v54 = vadd.s32 %v2550_v37, %v2546_v33  ;;  %v2532_v45 = vsel %vm2526_vm6, %v2529_v58, %v2531_v15 }
 0x14f   : > { %v1839_v46 = vmul.f32 %v1838_v20, %v1836_v18  ;;  %v2555_v49 = vsel %vm2554_vm8, 1, %v3719_v24  ;;  %vm2580_vm10 = vc.u32 %v2578_v44, %v2574_v43  ;;  %v488_v9 = vadd.s32 1, %v3396_v62 }
 0x150   : > { %v2557_v38 = vadd.s32 %v2555_v49, %v2549_v25  ;;  %vm2558_vm9 = vc.u32 %v2556_v54, %v2552_v36  ;;  %v2581_v7 = vsel %vm2580_vm10, 1, %v3719_v24  ;;  %v2573_v52 = vshrl.u32 %v2569_v11, 16 }
 0x151   : > { %v1840_v3 = vxor.u32 2147483648, %v1839_v46  ;;  %v2559_v28 = vsel %vm2558_vm9, 1, %v3719_v24  ;;  %v2583_v39 = vadd.s32 %v2581_v7, %v2579_v40  ;;  %vm489_vm13 = vcmp.gt.s32.totalorder %v488_v9, 0 }
 0x152   : > { %v2551_v63 = vshrl.u32 %v2547_v60, 16  ;;  %v2561_v1 = vadd.s32 %v2559_v28, %v2557_v38  ;;  %v490_v16 = vsel %vm489_vm13, %v488_v9, 0  ;;  %v2575_v23 = vshrl.u32 %v2570_v22, 16 }
 0x153   : > { %v1841_v51 = vsel %vm1720_vm11, %v1840_v3, %v1839_v46  ;;  %v2584_v10 = vadd.s32 %v2583_v39, %v2573_v52  ;;  %v492_v56 = vand.u32 31, %v490_v16  ;;  %v2553_v27 = vshrl.u32 %v2548_v31, 16 }
 0x154   : > { %v1844_v50 = vsel %vm4204_vm12, %v3898_v59, %v1841_v51  ;;  %v2562_v19 = vadd.s32 %v2561_v1, %v2551_v63  ;;  %v2586_v47 = vmul.u32 %v4194_v42, %v2532_v45  ;;  %v486_v29 = vor.u32 8388608, %v4242_v55 }
 0x155   : > { %v1846_v12 = vmul.f32 %v1844_v50, %v1844_v50  ;;  %v2585_v11 = vadd.s32 %v2584_v10, %v2575_v23  ;;  %v4302_v53 = vsub.s32 32, %v492_v56  ;;  %v495_v14 = vshll.u32 %v3713_v0, %v492_v56 }
 0x156   : > { %v4305_v48 = vadd.s32 %v2562_v19, %v2553_v27  ;;  %v4307_v13 = vadd.s32 %v2578_v44, %v2574_v43  ;;  %v498_v30 = vshll.u32 %v3714_v2, %v492_v56  ;;  %v501_v60 = vshll.u32 %v3715_v4, %v492_v56 }
 0x157   : > { %v1847_v5 = vmul.f32 -0.001358992, %v1846_v12  ;;  %v1854_v58 = vmul.f32 -0.00019511016, %v1846_v12  ;;  %v2589_v22 = vadd.s32 1, %v2585_v11  ;;  %v496_v26 = vshrl.u32 %v3714_v2, %v4302_v53 }
 0x158   : > { %v499_v42 = vshrl.u32 %v3715_v4, %v4302_v53  ;;  %vm2588_vm11 = vc.u32 %v4305_v48, %v4307_v13  ;;  %v4317_v20 = vshrl.u32 %v490_v16, 5  ;;  %v502_v34 = vshrl.u32 %v3716_v6, %v4302_v53 }
 0x159   : > { %v1848_v55 = vadd.f32 0.041655596, %v1847_v5  ;;  %v1855_v15 = vadd.f32 0.008332121, %v1854_v58  ;;  %v2590_v62 = vsel %vm2588_vm11, %v2589_v22, %v2585_v11  ;;  %v4319_v31 = vor.u32 %v496_v26, %v495_v14 }
 0x15a   : > { %v2591_v37 = vadd.s32 %v2590_v62, %v2586_v47  ;;  %v504_v41 = vshll.u32 %v3716_v6, %v492_v56  ;;  %v4324_v25 = vor.u32 %v499_v42, %v498_v30  ;;  %v505_v43 = vshrl.u32 %v3717_v8, %v4302_v53 }
 0x15b   : > { %v1849_v18 = vmul.f32 %v1848_v55, %v1846_v12  ;;  %v1856_v33 = vmul.f32 %v1855_v15, %v1846_v12  ;;  %v507_v44 = vshll.u32 %v3717_v8, %v492_v56  ;;  %v508_v40 = vshrl.u32 %v3718_v17, %v4302_v53 }
 0x15c   : > { %v2592_v54 = vadd.s32 536870912, %v2591_v37  ;;  %v4331_v45 = vor.u32 %v502_v34, %v501_v60  ;;  %v506_v49 = vor.u32 %v505_v43, %v504_v41  ;;  %vm510_vm12 = vcmp.lt.s32.totalorder %v4317_v20, 1 }
 0x15d   : > { %v1850_v46 = vadd.f32 -0.4999988, %v1849_v18  ;;  %v1857_v36 = vadd.f32 -0.16666654, %v1856_v33  ;;  %v509_v9 = vor.u32 %v508_v40, %v507_v44  ;;  %vm512_vm14 = vcmp.lt.s32.totalorder %v4317_v20, 3 }
 0x15e   : > { %v4335_v7 = vshrl.u32 %v2592_v54, 30  ;;  %vm513_vm15 = vcmp.lt.s32.totalorder %v4317_v20, 4  ;;  %vm1864_vm0 = vcmp.lt.s32.totalorder %v4271_v21, 2  ;;  %v4341_v52 = vshll.u32 %v486_v29, 8 }
 0x15f   : > { %v1851_v3 = vmul.f32 %v1850_v46, %v1846_v12  ;;  %v1858_v38 = vmul.f32 %v1857_v36, %v1846_v12  ;;  %v519_v28 = vsel %vm513_vm15, %v506_v49, 920167782  ;;  %v518_v1 = vsel %vm510_vm12, %v4319_v31, %v4324_v25 }
 0x160   : > { %v2594_v63 = vshll.u32 %v4335_v7, 30  ;;  %vm1865_vm1 = vcmp.eq.s32.totalorder %v4271_v21, 0  ;;  %vm511_vm2 = vcmp.lt.s32.totalorder %v4317_v20, 2  ;;  %v520_v16 = vsel %vm512_vm14, %v4331_v45, %v519_v28 }
 0x161   : > { %v1852_v39 = vadd.f32 1.0, %v1851_v3  ;;  %v1859_v51 = vadd.f32 1.0, %v1858_v38  ;;  %v523_v23 = vsel %vm513_vm15, %v509_v9, 1326507024  ;;  %v522_v27 = vsel %vm510_vm12, %v4324_v25, %v4331_v45 }
 0x162   : > { %v2595_v12 = vsub.s32 %v2591_v37, %v2594_v63  ;;  %vm1868_vm3 = vcmp.eq.s32.totalorder %v4271_v21, 2  ;;  %v521_v19 = vsel %vm511_vm2, %v518_v1, %v520_v16  ;;  %v524_v47 = vsel %vm512_vm14, %v506_v49, %v523_v23 }
 0x163   : > { %v1860_v10 = vmul.f32 %v1859_v51, %v1844_v50  ;;  %v1869_v56 = vxor.u32 2147483648, %v1852_v39  ;;  %v527_v11 = vand.u32 65535, %v4341_v52  ;;  %v528_v14 = vshrl.u32 %v4341_v52, 16 }
 0x164   : > { %vm2596_vm4 = vcmp.lt.s32.totalorder %v2595_v12, 0  ;;  %v2597_v50 = vsub.s32 0, %v2595_v12  ;;  %v494_v58 = vshrl.u32 %v3713_v0, %v4302_v53  ;;  %v525_v22 = vsel %vm511_vm2, %v522_v27, %v524_v47  ;;  %v284_v27 = vpop.f32.mrf.mxu1 }
 0x165   : > { %v1866_v29 = vxor.u32 2147483648, %v1860_v10  ;;  %v1870_v5 = vsel %vm1868_vm3, %v1869_v56, %v1860_v10  ;;  %v551_v26 = vand.u32 65535, %v521_v19  ;;  %v529_v55 = vand.u32 65535, %v525_v22 }
 0x166   : > { %v2598_v42 = vsel %vm2596_vm4, %v2597_v50, %v2595_v12  ;;  %v530_v15 = vshrl.u32 %v525_v22, 16  ;;  %vm1861_vm5 = vweird.f32 %v3898_v59  ;;  %v552_v34 = vshrl.u32 %v521_v19, 16 }
 0x167   : > { %v1867_v30 = vsel %vm1865_vm1, %v1852_v39, %v1866_v29  ;;  %v2599_v62 = vclz %v2598_v42  ;;  %v533_v53 = vmul.u32 %v529_v55, %v528_v14  ;;  %v2587_v37 = vadd.s32 %v4307_v13, %v4305_v48 }
 0x168   : > { %v1871_v60 = vsel %vm1864_vm0, %v1867_v30, %v1870_v5  ;;  %v532_v33 = vmul.u32 %v530_v15, %v527_v11  ;;  %v514_v43 = vsel %vm510_vm12, %v494_v58, %v4319_v31  ;;  %v531_v44 = vmul.u32 %v529_v55, %v527_v11 }
 0x169   : > { %v1872_v18 = vsel %vm1861_vm5, nan, %v1871_v60  ;;  %v3436_v41 = vadd.s32 4294967294, %v2599_v62  ;;  %v553_v59 = vmul.u32 %v551_v26, %v527_v11  ;;  %v534_v21 = vmul.u32 %v530_v15, %v528_v14 }
 0x16a   : > { %3277 = vst [vmem:[%s4190_s28 + $0x48] sm:$0xff] %v1872_v18  ;;  %v535_v40 = vshll.u32 %v532_v33, 16  ;;  %v537_v46 = vshll.u32 %v533_v53, 16  ;;  %v554_v36 = vmul.u32 %v552_v34, %v527_v11  ;;  %v555_v9 = vmul.u32 %v551_v26, %v528_v14  ;;  %v4393_v26 = vld [vmem:[%s6026_s2] ss:$0 sm:$0xff] }
 0x16b   : > { %vm3437_vm6 = vcmp.lt.s32.totalorder %v3436_v41, 0  ;;  %vm2495_vm8 = vcmp.lt.s32.totalorder %v4120_v32, 0  ;;  %v536_v13 = vshrl.u32 %v532_v33, 16  ;;  %v556_v31 = vmul.u32 %v552_v34, %v528_v14 }
 0x16c   : > { %v2602_v54 = vsel %vm3437_vm6, 0, %v3436_v41  ;;  %vm539_vm7 = vc.u32 %v531_v44, %v535_v40  ;;  %v541_v49 = vadd.s32 %v535_v40, %v531_v44  ;;  %v557_v39 = vshll.u32 %v554_v36, 16 }
 0x16d   : > { %v2603_v3 = vsub.s32 32, %v2602_v54  ;;  %v2607_v48 = vsub.s32 4294967266, %v2602_v54  ;;  %v540_v38 = vsel %vm539_vm7, 1, %v3719_v24  ;;  %v2604_v51 = vshll.u32 %v2595_v12, %v2602_v54 }
 0x16e   : > { %v542_v28 = vadd.s32 %v540_v38, %v534_v21  ;;  %vm543_vm10 = vc.u32 %v541_v49, %v537_v46  ;;  %v559_v10 = vshll.u32 %v555_v9, 16  ;;  %vm561_vm9 = vc.u32 %v553_v59, %v557_v39 }
 0x16f   : > { %v2605_v63 = vshrl.u32 %v2587_v37, %v2603_v3  ;;  %v2608_v1 = vadd.s32 127, %v2607_v48  ;;  %v544_v16 = vsel %vm543_vm10, 1, %v3719_v24  ;;  %v563_v56 = vadd.s32 %v557_v39, %v553_v59 }
 0x170   : > { %v546_v23 = vadd.s32 %v544_v16, %v542_v28  ;;  %v515_v11 = vsel %vm513_vm15, %v4331_v45, 2102212464  ;;  %v562_v29 = vsel %vm561_vm9, 1, %v3719_v24  ;;  %v2617_v50 = vsub.s32 4, %v4335_v7  ;;  %v296_v45 = vpop.f32.mrf.mxu2 }
 0x171   : > { %v2606_v19 = vor.u32 %v2605_v63, %v2604_v51  ;;  %v2609_v47 = vshll.u32 %v2608_v1, 23  ;;  %v564_v14 = vadd.s32 %v562_v29, %v556_v31  ;;  %vm565_vm13 = vc.u32 %v563_v56, %v559_v10 }
 0x172   : > { %v547_v12 = vadd.s32 %v546_v23, %v536_v13  ;;  %v538_v58 = vshrl.u32 %v533_v53, 16  ;;  %v566_v22 = vsel %vm565_vm13, 1, %v3719_v24  ;;  %v4396_v30 = vadd.f32 %v4393_v26, %v284_v27 }
 0x173   : > { %v2610_v5 = vor.u32 4788187, %v2609_v47  ;;  %v2613_v42 = vcvt.s32.f32 %v2606_v19  ;;  %v516_v55 = vsel %vm512_vm14, %v4324_v25, %v515_v11  ;;  %v558_v15 = vshrl.u32 %v554_v36, 16 }
 0x174   : > { %v568_v60 = vadd.s32 %v566_v22, %v564_v14  ;;  %v548_v34 = vadd.s32 %v547_v12, %v538_v58  ;;  %v1253_v18 = vand.u32 2147483647, %v4396_v30  ;;  %v1256_v33 = vand.u32 2139095040, %v4396_v30 }
 0x175   : > { %v2611_v62 = vand.u32 2147483647, %v2610_v5  ;;  %v2618_v53 = vsel %vm2495_vm8, %v2617_v50, %v4335_v7  ;;  %v560_v37 = vshrl.u32 %v555_v9, 16  ;;  %v4407_v44 = vadd.f32 %v4393_v26, %v296_v45 }
 0x176   : > { %v569_v41 = vadd.s32 %v568_v60, %v558_v15  ;;  %v567_v59 = vadd.s32 %v563_v56, %v559_v10  ;;  %v1257_v25 = vshrl.u32 %v1256_v33, 23  ;;  %v1260_v21 = vand.u32 8388607, %v1253_v18 }
 0x177   : > { %v2614_v40 = vmul.f32 %v2613_v42, %v2611_v62  ;;  %v517_v46 = vsel %vm511_vm2, %v514_v43, %v516_v55  ;;  %vm2494_vm11 = vcmp.le.f32.partialorder %v2493_v57, 0.7853982  ;;  %v1876_v3 = vand.u32 2139095040, %v4407_v44 }
 0x178   : > { %v570_v36 = vadd.s32 %v569_v41, %v560_v37  ;;  %vm573_vm12 = vc.u32 %v548_v34, %v567_v59  ;;  %v3411_v7 = vadd.s32 4294967169, %v1257_v25  ;;  %v2620_v49 = vsel %vm2494_vm11, 0, %v2618_v53 }
 0x179   : > { %v2615_v54 = vxor.u32 2147483648, %v2614_v40  ;;  %v571_v13 = vmul.u32 %v4341_v52, %v517_v46  ;;  %v1261_v38 = vor.u32 8388608, %v1260_v21  ;;  %v2637_v39 = vadd.s32 3, %v2620_v49 }
 0x17a   : > { %v574_v9 = vadd.s32 1, %v570_v36  ;;  %v1263_v28 = vadd.s32 1, %v3411_v7  ;;  %v1873_v63 = vand.u32 2147483647, %v4407_v44  ;;  %v1877_v1 = vshrl.u32 %v1876_v3, 23 }
 0x17b   : > { %v2616_v48 = vsel %vm2495_vm8, %v2615_v54, %v2614_v40  ;;  %v4421_v56 = vshll.u32 %v1261_v38, 8  ;;  %vm480_vm15 = vcmp.lt.s32.totalorder %v4197_v61, 0  ;;  %v4424_v47 = vand.u32 3, %v2637_v39 }
 0x17c   : > { %v2619_v20 = vsel %vm2494_vm11, %v4120_v32, %v2616_v48  ;;  %v575_v43 = vsel %vm573_vm12, %v574_v9, %v570_v36  ;;  %vm1264_vm14 = vcmp.gt.s32.totalorder %v1263_v28, 0  ;;  %v4426_v29 = vadd.s32 %v567_v59, %v548_v34 }
 0x17d   : > { %v2621_v31 = vmul.f32 %v2619_v20, %v2619_v20  ;;  %v576_v57 = vadd.s32 %v575_v43, %v571_v13  ;;  %v1265_v51 = vsel %vm1264_vm14, %v1263_v28, 0  ;;  %v3423_v12 = vadd.s32 4294967169, %v1877_v1 }
 0x17e   : > { %v1267_v52 = vand.u32 31, %v1265_v51  ;;  %v4430_v14 = vand.u32 8388607, %v1873_v63  ;;  %v4433_v45 = vand.u32 65535, %v4421_v56  ;;  %vm4437_vm0 = vcmp.le.f32.partialorder %v478_v35, 0.7853982 }
 0x17f   : > { %v2622_v16 = vmul.f32 -0.001358992, %v2621_v31  ;;  %v2629_v23 = vmul.f32 -0.00019511016, %v2621_v31  ;;  %v577_v10 = vadd.s32 536870912, %v576_v57  ;;  %vm2640_vm1 = vcmp.eq.s32.totalorder %v4424_v47, 0 }
 0x180   : > { %v1268_v50 = vsub.s32 32, %v1267_v52  ;;  %v1270_v15 = vshll.u32 %v3713_v0, %v1267_v52  ;;  %v1273_v62 = vshll.u32 %v3714_v2, %v1267_v52  ;;  %vm2643_vm2 = vcmp.eq.s32.totalorder %v4424_v47, 2 }
 0x181   : > { %v2623_v27 = vadd.f32 0.041655596, %v2622_v16  ;;  %v2630_v19 = vadd.f32 0.008332121, %v2629_v23  ;;  %v578_v11 = vshrl.u32 %v577_v10, 30  ;;  %v4449_v35 = vshrl.u32 %v1265_v51, 5 }
 0x182   : > { %v1271_v60 = vshrl.u32 %v3714_v2, %v1268_v50  ;;  %v1274_v37 = vshrl.u32 %v3715_v4, %v1268_v50  ;;  %v1276_v41 = vshll.u32 %v3715_v4, %v1267_v52  ;;  %v1277_v40 = vshrl.u32 %v3716_v6, %v1268_v50 }
 0x183   : > { %v2624_v5 = vmul.f32 %v2623_v27, %v2621_v31  ;;  %v2631_v58 = vmul.f32 %v2630_v19, %v2621_v31  ;;  %v579_v22 = vshll.u32 %v578_v11, 30  ;;  %v602_v55 = vsub.s32 4, %v578_v11 }
 0x184   : > { %v4454_v59 = vshrl.u32 %v4421_v56, 16  ;;  %vm2639_vm3 = vcmp.lt.s32.totalorder %v4424_v47, 2  ;;  %vm2636_vm5 = vweird.f32 %v4120_v32  ;;  %v1272_v54 = vor.u32 %v1271_v60, %v1270_v15 }
 0x185   : > { %v2625_v34 = vadd.f32 -0.4999988, %v2624_v5  ;;  %v2632_v33 = vadd.f32 -0.16666654, %v2631_v58  ;;  %v4444_v53 = vsub.s32 %v576_v57, %v579_v22  ;;  %v603_v36 = vsel %vm480_vm15, %v602_v55, %v578_v11 }
 0x186   : > { %v1279_v7 = vshll.u32 %v3716_v6, %v1267_v52  ;;  %v1280_v49 = vshrl.u32 %v3717_v8, %v1268_v50  ;;  %v1275_v13 = vor.u32 %v1274_v37, %v1273_v62  ;;  %v1282_v43 = vshll.u32 %v3717_v8, %v1267_v52 }
 0x187   : > { %v2626_v25 = vmul.f32 %v2625_v34, %v2621_v31  ;;  %v2633_v21 = vmul.f32 %v2632_v33, %v2621_v31  ;;  %vm581_vm4 = vcmp.lt.s32.totalorder %v4444_v53, 0  ;;  %v582_v46 = vsub.s32 0, %v4444_v53 }
 0x188   : > { %v1281_v28 = vor.u32 %v1280_v49, %v1279_v7  ;;  %v1283_v31 = vshrl.u32 %v3718_v17, %v1268_v50  ;;  %v1278_v51 = vor.u32 %v1277_v40, %v1276_v41  ;;  %vm1285_vm6 = vcmp.lt.s32.totalorder %v4449_v35, 1 }
 0x189   : > { %v2627_v9 = vadd.f32 1.0, %v2626_v25  ;;  %v2634_v3 = vadd.f32 1.0, %v2633_v21  ;;  %v583_v48 = vsel %vm581_vm4, %v582_v46, %v4444_v53  ;;  %v1269_v16 = vshrl.u32 %v3713_v0, %v1268_v50 }
 0x18a   : > { %v584_v38 = vclz %v583_v48  ;;  %vm1287_vm7 = vcmp.lt.s32.totalorder %v4449_v35, 3  ;;  %v1883_v23 = vadd.s32 1, %v3423_v12  ;;  %v605_v27 = vsel %vm4437_vm0, 0, %v603_v36 }
 0x18b   : > { %v2635_v39 = vmul.f32 %v2634_v3, %v2619_v20  ;;  %v2644_v57 = vxor.u32 2147483648, %v2627_v9  ;;  %vm1286_vm8 = vcmp.lt.s32.totalorder %v4449_v35, 2  ;;  %vm1288_vm10 = vcmp.lt.s32.totalorder %v4449_v35, 4 }
 0x18c   : > { %v3397_v1 = vadd.s32 4294967294, %v584_v38  ;;  %v1284_v20 = vor.u32 %v1283_v31, %v1282_v43  ;;  %v1293_v52 = vsel %vm1285_vm6, %v1272_v54, %v1275_v13  ;;  %v1294_v19 = vsel %vm1288_vm10, %v1281_v28, 920167782 }
 0x18d   : > { %v2641_v10 = vxor.u32 2147483648, %v2635_v39  ;;  %v2645_v50 = vsel %vm2643_vm2, %v2644_v57, %v2635_v39  ;;  %v1295_v5 = vsel %vm1287_vm7, %v1278_v51, %v1294_v19  ;;  %v1290_v15 = vsel %vm1288_vm10, %v1278_v51, 2102212464 }
 0x18e   : > { %vm3398_vm9 = vcmp.lt.s32.totalorder %v3397_v1, 0  ;;  %v1296_v34 = vsel %vm1286_vm8, %v1293_v52, %v1295_v5  ;;  %v1297_v33 = vsel %vm1285_vm6, %v1275_v13, %v1278_v51  ;;  %v1298_v41 = vsel %vm1288_vm10, %v1284_v20, 1326507024 }
 0x18f   : > { %v2642_v11 = vsel %vm2640_vm1, %v2627_v9, %v2641_v10  ;;  %v587_v12 = vsel %vm3398_vm9, 0, %v3397_v1  ;;  %v1326_v40 = vand.u32 65535, %v1296_v34  ;;  %v1289_v32 = vsel %vm1285_vm6, %v1269_v16, %v1272_v54 }
 0x190   : > { %v2646_v58 = vsel %vm2639_vm3, %v2642_v11, %v2645_v50  ;;  %v588_v22 = vsub.s32 32, %v587_v12  ;;  %v592_v55 = vsub.s32 4294967266, %v587_v12  ;;  %v589_v62 = vshll.u32 %v4444_v53, %v587_v12 }
 0x191   : > { %v2647_v60 = vsel %vm2636_vm5, nan, %v2646_v58  ;;  %v1291_v53 = vsel %vm1287_vm7, %v1275_v13, %v1290_v15  ;;  %v1299_v25 = vsel %vm1287_vm7, %v1281_v28, %v1298_v41  ;;  %v1327_v21 = vshrl.u32 %v1296_v34, 16 }
 0x192   : > { %3282 = vst [vmem:[%s4190_s28 + $0x70] sm:$0xff] %v2647_v60  ;;  %v590_v47 = vshrl.u32 %v4426_v29, %v588_v22  ;;  %v593_v37 = vadd.s32 127, %v592_v55  ;;  %v1300_v29 = vsel %vm1286_vm8, %v1297_v33, %v1299_v25  ;;  %vm1884_vm13 = vcmp.gt.s32.totalorder %v1883_v23, 0 }
 0x193   : > { %v1304_v7 = vand.u32 65535, %v1300_v29  ;;  %v1305_v49 = vshrl.u32 %v1300_v29, 16  ;;  %v1329_v9 = vmul.u32 %v1327_v21, %v4433_v45  ;;  %v1330_v3 = vmul.u32 %v1326_v40, %v4454_v59 }
 0x194   : > { %v591_v46 = vor.u32 %v590_v47, %v589_v62  ;;  %v594_v36 = vshll.u32 %v593_v37, 23  ;;  %v4509_v48 = vadd.s32 3, %v605_v27  ;;  %v4513_v13 = vsel %vm1286_vm8, %v1289_v32, %v1291_v53 }
 0x195   : > { %v1328_v38 = vmul.u32 %v1326_v40, %v4433_v45  ;;  %v1306_v28 = vmul.u32 %v1304_v7, %v4433_v45  ;;  %v1307_v43 = vmul.u32 %v1305_v49, %v4433_v45  ;;  %v1308_v31 = vmul.u32 %v1304_v7, %v4454_v59 }
 0x196   : > { %v595_v54 = vor.u32 4788187, %v594_v36  ;;  %v1885_v39 = vsel %vm1884_vm13, %v1883_v23, 0  ;;  %v598_v51 = vcvt.s32.f32 %v591_v46  ;;  %v1332_v1 = vshll.u32 %v1329_v9, 16 }
 0x197   : > { %v1334_v16 = vshll.u32 %v1330_v3, 16  ;;  %v1310_v10 = vshll.u32 %v1307_v43, 16  ;;  %v1312_v27 = vshll.u32 %v1308_v31, 16  ;;  %v1331_v20 = vmul.u32 %v1327_v21, %v4454_v59 }
 0x198   : > { %v596_v57 = vand.u32 2147483647, %v595_v54  ;;  %v1346_v35 = vmul.u32 %v4421_v56, %v4513_v13  ;;  %v1309_v19 = vmul.u32 %v1305_v49, %v4454_v59  ;;  %vm1336_vm11 = vc.u32 %v1328_v38, %v1332_v1 }
 0x199   : > { %v1338_v11 = vadd.s32 %v1332_v1, %v1328_v38  ;;  %vm1314_vm12 = vc.u32 %v1306_v28, %v1310_v10  ;;  %v1316_v45 = vadd.s32 %v1310_v10, %v1306_v28  ;;  %v1337_v23 = vsel %vm1336_vm11, 1, %v3719_v24 }
 0x19a   : > { %v599_v52 = vmul.f32 %v598_v51, %v596_v57  ;;  %v1887_v50 = vand.u32 31, %v1885_v39  ;;  %v1315_v5 = vsel %vm1314_vm12, 1, %v3719_v24  ;;  %v1339_v58 = vadd.s32 %v1337_v23, %v1331_v20 }
 0x19b   : > { %vm1340_vm14 = vc.u32 %v1338_v11, %v1334_v16  ;;  %v1317_v22 = vadd.s32 %v1315_v5, %v1309_v19  ;;  %vm1318_vm1 = vc.u32 %v1316_v45, %v1312_v27  ;;  %v1333_v55 = vshrl.u32 %v1329_v9, 16 }
 0x19c   : > { %v600_v12 = vxor.u32 2147483648, %v599_v52  ;;  %v1341_v56 = vsel %vm1340_vm14, 1, %v3719_v24  ;;  %v1319_v15 = vsel %vm1318_vm1, 1, %v3719_v24  ;;  %v4529_v62 = vsub.s32 32, %v1887_v50 }
 0x19d   : > { %v1343_v60 = vadd.s32 %v1341_v56, %v1339_v58  ;;  %v1311_v33 = vshrl.u32 %v1307_v43, 16  ;;  %v1321_v47 = vadd.s32 %v1319_v15, %v1317_v22  ;;  %v4534_v37 = vshrl.u32 %v1885_v39, 5 }
 0x19e   : > { %v601_v59 = vsel %vm480_vm15, %v600_v12, %v599_v52  ;;  %v1313_v40 = vshrl.u32 %v1308_v31, 16  ;;  %v1335_v32 = vshrl.u32 %v1330_v3, 16  ;;  %v4536_v21 = vadd.s32 %v1338_v11, %v1334_v16 }
 0x19f   : > { %v604_v34 = vsel %vm4437_vm0, %v4197_v61, %v601_v59  ;;  %v1344_v53 = vadd.s32 %v1343_v60, %v1333_v55  ;;  %v1322_v25 = vadd.s32 %v1321_v47, %v1311_v33  ;;  %v1890_v46 = vshll.u32 %v3713_v0, %v1887_v50 }
 0x1a0   : > { %v606_v41 = vmul.f32 %v604_v34, %v604_v34  ;;  %v1893_v36 = vshll.u32 %v3714_v2, %v1887_v50  ;;  %v1891_v42 = vshrl.u32 %v3714_v2, %v4529_v62  ;;  %v1894_v54 = vshrl.u32 %v3715_v4, %v4529_v62 }
 0x1a1   : > { %v1345_v49 = vadd.s32 %v1344_v53, %v1335_v32  ;;  %v4542_v9 = vadd.s32 %v1322_v25, %v1313_v40  ;;  %v1897_v3 = vshrl.u32 %v3716_v6, %v4529_v62  ;;  %v1899_v13 = vshll.u32 %v3716_v6, %v1887_v50 }
 0x1a2   : > { %v607_v29 = vmul.f32 -0.001358992, %v606_v41  ;;  %v614_v7 = vmul.f32 -0.00019511016, %v606_v41  ;;  %v1900_v31 = vshrl.u32 %v3717_v8, %v4529_v62  ;;  %v1896_v39 = vshll.u32 %v3715_v4, %v1887_v50 }
 0x1a3   : > { %v1349_v43 = vadd.s32 1, %v1345_v49  ;;  %vm1348_vm15 = vc.u32 %v4542_v9, %v4536_v21  ;;  %v1902_v57 = vshll.u32 %v3717_v8, %v1887_v50  ;;  %v1903_v51 = vshrl.u32 %v3718_v17, %v4529_v62 }
 0x1a4   : > { %v608_v38 = vadd.f32 0.041655596, %v607_v29  ;;  %v615_v28 = vadd.f32 0.008332121, %v614_v7  ;;  %v1901_v27 = vor.u32 %v1900_v31, %v1899_v13  ;;  %v4557_v52 = vor.u32 %v1891_v42, %v1890_v46 }
 0x1a5   : > { %v1350_v10 = vsel %vm1348_vm15, %v1349_v43, %v1345_v49  ;;  %v4559_v19 = vor.u32 %v1894_v54, %v1893_v36  ;;  %v4561_v11 = vor.u32 %v1897_v3, %v1896_v39  ;;  %v1904_v12 = vor.u32 %v1903_v51, %v1902_v57 }
 0x1a6   : > { %v609_v1 = vmul.f32 %v608_v38, %v606_v41  ;;  %v616_v16 = vmul.f32 %v615_v28, %v606_v41  ;;  %v1351_v20 = vadd.s32 %v1350_v10, %v1346_v35  ;;  %v623_v5 = vand.u32 3, %v4509_v48 }
 0x1a7   : > { %v1881_v58 = vor.u32 8388608, %v4430_v14  ;;  %vm1908_vm0 = vcmp.lt.s32.totalorder %v4534_v37, 4  ;;  %vm1905_vm2 = vcmp.lt.s32.totalorder %v4534_v37, 1  ;;  %vm1907_vm3 = vcmp.lt.s32.totalorder %v4534_v37, 3 }
 0x1a8   : > { %v610_v45 = vadd.f32 -0.4999988, %v609_v1  ;;  %v617_v23 = vadd.f32 -0.16666654, %v616_v16  ;;  %v1352_v50 = vadd.s32 536870912, %v1351_v20  ;;  %v1913_v48 = vsel %vm1905_vm2, %v4557_v52, %v4559_v19 }
 0x1a9   : > { %v1914_v35 = vsel %vm1908_vm0, %v1901_v27, 920167782  ;;  %v1917_v14 = vsel %vm1905_vm2, %v4559_v19, %v4561_v11  ;;  %v1918_v33 = vsel %vm1908_vm0, %v1904_v12, 1326507024  ;;  %vm1906_vm4 = vcmp.lt.s32.totalorder %v4534_v37, 2 }
 0x1aa   : > { %v611_v22 = vmul.f32 %v610_v45, %v606_v41  ;;  %v618_v55 = vmul.f32 %v617_v23, %v606_v41  ;;  %v4569_v56 = vshrl.u32 %v1352_v50, 30  ;;  %v1915_v60 = vsel %vm1907_vm3, %v4561_v11, %v1914_v35 }
 0x1ab   : > { %v1919_v41 = vsel %vm1907_vm3, %v1901_v27, %v1918_v33  ;;  %v4589_v40 = vshll.u32 %v1881_v58, 8  ;;  %vm621_vm5 = vweird.f32 %v4197_v61  ;;  %vm624_vm6 = vcmp.lt.s32.totalorder %v623_v5, 2 }
 0x1ac   : > { %v612_v59 = vadd.f32 1.0, %v611_v22  ;;  %v619_v15 = vadd.f32 1.0, %v618_v55  ;;  %v1354_v47 = vshll.u32 %v4569_v56, 30  ;;  %v1920_v25 = vsel %vm1906_vm4, %v1917_v14, %v1919_v41 }
 0x1ad   : > { %vm625_vm7 = vcmp.eq.s32.totalorder %v623_v5, 0  ;;  %v1916_v36 = vsel %vm1906_vm4, %v1913_v48, %v1915_v60  ;;  %vm628_vm8 = vcmp.eq.s32.totalorder %v623_v5, 2  ;;  %v1923_v7 = vshrl.u32 %v4589_v40, 16 }
 0x1ae   : > { %v620_v32 = vmul.f32 %v619_v15, %v604_v34  ;;  %v629_v53 = vxor.u32 2147483648, %v612_v59  ;;  %v1355_v46 = vsub.s32 %v1351_v20, %v1354_v47  ;;  %v1924_v49 = vand.u32 65535, %v1920_v25  ;;  %v311_v15 = vpop.f32.mrf.mxu3 }
 0x1af   : > { %v1922_v42 = vand.u32 65535, %v4589_v40  ;;  %v1925_v54 = vshrl.u32 %v1920_v25, 16  ;;  %v1946_v28 = vand.u32 65535, %v1916_v36  ;;  %v1947_v57 = vshrl.u32 %v1916_v36, 16 }
 0x1b0   : > { %v626_v29 = vxor.u32 2147483648, %v620_v32  ;;  %vm1356_vm10 = vcmp.lt.s32.totalorder %v1355_v46, 0  ;;  %v1357_v34 = vsub.s32 0, %v1355_v46  ;;  %v630_v13 = vsel %vm628_vm8, %v629_v53, %v620_v32 }
 0x1b1   : > { %v1928_v38 = vmul.u32 %v1924_v49, %v1923_v7  ;;  %v1927_v39 = vmul.u32 %v1925_v54, %v1922_v42  ;;  %v1889_v16 = vshrl.u32 %v3713_v0, %v4529_v62  ;;  %v1926_v10 = vmul.u32 %v1924_v49, %v1922_v42 }
 0x1b2   : > { %v627_v3 = vsel %vm625_vm7, %v612_v59, %v626_v29  ;;  %v1358_v31 = vsel %vm1356_vm10, %v1357_v34, %v1355_v46  ;;  %v1347_v20 = vadd.s32 %v4536_v21, %v4542_v9  ;;  %v1929_v23 = vmul.u32 %v1925_v54, %v1923_v7 }
 0x1b3   : > { %v631_v43 = vsel %vm624_vm6, %v627_v3, %v630_v13  ;;  %v1359_v1 = vclz %v1358_v31  ;;  %v1930_v27 = vshll.u32 %v1927_v39, 16  ;;  %v1932_v12 = vshll.u32 %v1928_v38, 16 }
 0x1b4   : > { %v632_v51 = vsel %vm621_vm5, nan, %v631_v43  ;;  %v1949_v50 = vmul.u32 %v1947_v57, %v1922_v42  ;;  %v1950_v58 = vmul.u32 %v1946_v28, %v1923_v7  ;;  %v1910_v61 = vsel %vm1908_vm0, %v4561_v11, 2102212464 }
 0x1b5   : > { %3269 = vst [vmem:[%s4190_s28 + $0x8] sm:$0xff] %v632_v51  ;;  %v3412_v45 = vadd.s32 4294967294, %v1359_v1  ;;  %vm1934_vm9 = vc.u32 %v1926_v10, %v1930_v27  ;;  %v1936_v5 = vadd.s32 %v1930_v27, %v1926_v10  ;;  %v1931_v22 = vshrl.u32 %v1927_v39, 16  ;;  %v272_v39 = vpop.f32.mrf.mxu0 }
 0x1b6   : > { %v1935_v62 = vsel %vm1934_vm9, 1, %v3719_v24  ;;  %v1952_v48 = vshll.u32 %v1949_v50, 16  ;;  %v1948_v59 = vmul.u32 %v1946_v28, %v1922_v42  ;;  %v1951_v47 = vmul.u32 %v1947_v57, %v1923_v7 }
 0x1b7   : > { %vm3413_vm13 = vcmp.lt.s32.totalorder %v3412_v45, 0  ;;  %v1937_v35 = vadd.s32 %v1935_v62, %v1929_v23  ;;  %vm1938_vm11 = vc.u32 %v1936_v5, %v1932_v12  ;;  %v1954_v41 = vshll.u32 %v1950_v58, 16 }
 0x1b8   : > { %v1362_v55 = vsel %vm3413_vm13, 0, %v3412_v45  ;;  %v1939_v14 = vsel %vm1938_vm11, 1, %v3719_v24  ;;  %vm1956_vm12 = vc.u32 %v1948_v59, %v1952_v48  ;;  %v1958_v11 = vadd.s32 %v1952_v48, %v1948_v59 }
 0x1b9   : > { %v1363_v21 = vsub.s32 32, %v1362_v55  ;;  %v1367_v9 = vsub.s32 4294967266, %v1362_v55  ;;  %v1364_v60 = vshll.u32 %v1355_v46, %v1362_v55  ;;  %v1941_v33 = vadd.s32 %v1939_v14, %v1937_v35 }
 0x1ba   : > { %v1377_v25 = vsub.s32 4, %v4569_v56  ;;  %v1957_v29 = vsel %vm1956_vm12, 1, %v3719_v24  ;;  %v4614_v49 = vadd.f32 %v4393_v26, %v311_v15  ;;  %vm1960_vm14 = vc.u32 %v1958_v11, %v1954_v41 }
 0x1bb   : > { %v1365_v32 = vshrl.u32 %v1347_v20, %v1363_v21  ;;  %v1368_v53 = vadd.s32 127, %v1367_v9  ;;  %v1942_v36 = vadd.s32 %v1941_v33, %v1931_v22  ;;  %v1959_v42 = vadd.s32 %v1957_v29, %v1951_v47 }
 0x1bc   : > { %vm1255_vm1 = vcmp.lt.s32.totalorder %v4396_v30, 0  ;;  %v1933_v46 = vshrl.u32 %v1928_v38, 16  ;;  %v1961_v7 = vsel %vm1960_vm14, 1, %v3719_v24  ;;  %v2648_v3 = vand.u32 2147483647, %v4614_v49 }
 0x1bd   : > { %v1366_v34 = vor.u32 %v1365_v32, %v1364_v60  ;;  %v1369_v54 = vshll.u32 %v1368_v53, 23  ;;  %v1909_v28 = vsel %vm1905_vm2, %v1889_v16, %v4557_v52  ;;  %v1953_v43 = vshrl.u32 %v1949_v50, 16 }
 0x1be   : > { %v1963_v31 = vadd.s32 %v1961_v7, %v1959_v42  ;;  %v1378_v57 = vsel %vm1255_vm1, %v1377_v25, %v4569_v56  ;;  %v1911_v38 = vsel %vm1907_vm3, %v4559_v19, %v1910_v61  ;;  %v1943_v51 = vadd.s32 %v1942_v36, %v1933_v46 }
 0x1bf   : > { %v1370_v13 = vor.u32 4788187, %v1369_v54  ;;  %v2651_v1 = vand.u32 2139095040, %v4614_v49  ;;  %v1373_v27 = vcvt.s32.f32 %v1366_v34  ;;  %v1955_v20 = vshrl.u32 %v1950_v58, 16 }
 0x1c0   : > { %v1964_v45 = vadd.s32 %v1963_v31, %v1953_v43  ;;  %v1962_v23 = vadd.s32 %v1958_v11, %v1954_v41  ;;  %v2655_v16 = vand.u32 8388607, %v2648_v3  ;;  %v4632_v12 = vadd.f32 %v4393_v26, %v272_v39 }
 0x1c1   : > { %v1371_v10 = vand.u32 2147483647, %v1370_v13  ;;  %v2652_v52 = vshrl.u32 %v2651_v1, 23  ;;  %v1912_v5 = vsel %vm1906_vm4, %v1909_v28, %v1911_v38  ;;  %vm1254_vm15 = vcmp.le.f32.partialorder %v1253_v18, 0.7853982 }
 0x1c2   : > { %v1965_v19 = vadd.s32 %v1964_v45, %v1955_v20  ;;  %vm1968_vm0 = vc.u32 %v1943_v51, %v1962_v23  ;;  %v1380_v61 = vsel %vm1254_vm15, 0, %v1378_v57  ;;  %v1966_v62 = vmul.u32 %v4589_v40, %v1912_v5 }
 0x1c3   : > { %v1374_v56 = vmul.f32 %v1373_v27, %v1371_v10  ;;  %v3438_v50 = vadd.s32 4294967169, %v2652_v52  ;;  %v2656_v55 = vor.u32 8388608, %v2655_v16  ;;  %v636_v26 = vand.u32 2139095040, %v4632_v12 }
 0x1c4   : > { %v1969_v22 = vadd.s32 1, %v1965_v19  ;;  %v1397_v9 = vadd.s32 3, %v1380_v61  ;;  %vm1875_vm3 = vcmp.lt.s32.totalorder %v4407_v44, 0  ;;  %v4648_v29 = vadd.s32 %v1962_v23, %v1943_v51 }
 0x1c5   : > { %v1375_v58 = vxor.u32 2147483648, %v1374_v56  ;;  %v2658_v35 = vadd.s32 1, %v3438_v50  ;;  %v4643_v33 = vshll.u32 %v2656_v55, 8  ;;  %v637_v40 = vshrl.u32 %v636_v26, 23 }
 0x1c6   : > { %v1970_v37 = vsel %vm1968_vm0, %v1969_v22, %v1965_v19  ;;  %v4645_v32 = vand.u32 3, %v1397_v9  ;;  %v633_v34 = vand.u32 2147483647, %v4632_v12  ;;  %vm1396_vm8 = vweird.f32 %v4396_v30 }
 0x1c7   : > { %v1376_v48 = vsel %vm1255_vm1, %v1375_v58, %v1374_v56  ;;  %v1971_v14 = vadd.s32 %v1970_v37, %v1966_v62  ;;  %vm2659_vm2 = vcmp.gt.s32.totalorder %v2658_v35, 0  ;;  %v4652_v42 = vand.u32 65535, %v4643_v33 }
 0x1c8   : > { %v1379_v21 = vsel %vm1254_vm15, %v4396_v30, %v1376_v48  ;;  %v2660_v59 = vsel %vm2659_vm2, %v2658_v35, 0  ;;  %v4655_v46 = vshrl.u32 %v4643_v33, 16  ;;  %v4657_v7 = vadd.s32 4294967169, %v637_v40 }
 0x1c9   : > { %v1381_v18 = vmul.f32 %v1379_v21, %v1379_v21  ;;  %v1972_v15 = vadd.s32 536870912, %v1971_v14  ;;  %v2662_v60 = vand.u32 31, %v2660_v59  ;;  %v4659_v43 = vshrl.u32 %v2660_v59, 5 }
 0x1ca   : > { %vm1403_vm4 = vcmp.eq.s32.totalorder %v4645_v32, 2  ;;  %vm1400_vm5 = vcmp.eq.s32.totalorder %v4645_v32, 0  ;;  %vm1399_vm7 = vcmp.lt.s32.totalorder %v4645_v32, 2  ;;  %vm4688_vm9 = vcmp.le.f32.partialorder %v1873_v63, 0.7853982 }
 0x1cb   : > { %v1382_v47 = vmul.f32 -0.001358992, %v1381_v18  ;;  %v1389_v41 = vmul.f32 -0.00019511016, %v1381_v18  ;;  %v1973_v53 = vshrl.u32 %v1972_v15, 30  ;;  %v2663_v11 = vsub.s32 32, %v2662_v60 }
 0x1cc   : > { %v2665_v57 = vshll.u32 %v3713_v0, %v2662_v60  ;;  %v2668_v38 = vshll.u32 %v3714_v2, %v2662_v60  ;;  %v2671_v27 = vshll.u32 %v3715_v4, %v2662_v60  ;;  %v2674_v19 = vshll.u32 %v3716_v6, %v2662_v60 }
 0x1cd   : > { %v1383_v25 = vadd.f32 0.041655596, %v1382_v47  ;;  %v1390_v36 = vadd.f32 0.008332121, %v1389_v41  ;;  %v1974_v54 = vshll.u32 %v1973_v53, 30  ;;  %v2666_v31 = vshrl.u32 %v3714_v2, %v2663_v11 }
 0x1ce   : > { %v2669_v51 = vshrl.u32 %v3715_v4, %v2663_v11  ;;  %v2672_v20 = vshrl.u32 %v3716_v6, %v2663_v11  ;;  %v1997_v23 = vsub.s32 4, %v1973_v53  ;;  %v2675_v52 = vshrl.u32 %v3717_v8, %v2663_v11 }
 0x1cf   : > { %v1384_v13 = vmul.f32 %v1383_v25, %v1381_v18  ;;  %v1391_v28 = vmul.f32 %v1390_v36, %v1381_v18  ;;  %v4662_v39 = vsub.s32 %v1971_v14, %v1974_v54  ;;  %v2667_v5 = vor.u32 %v2666_v31, %v2665_v57 }
 0x1d0   : > { %v2670_v58 = vor.u32 %v2669_v51, %v2668_v38  ;;  %v2677_v61 = vshll.u32 %v3717_v8, %v2662_v60  ;;  %v2678_v22 = vshrl.u32 %v3718_v17, %v2663_v11  ;;  %v2673_v26 = vor.u32 %v2672_v20, %v2671_v27 }
 0x1d1   : > { %v1385_v1 = vadd.f32 -0.4999988, %v1384_v13  ;;  %v1392_v10 = vadd.f32 -0.16666654, %v1391_v28  ;;  %vm1976_vm6 = vcmp.lt.s32.totalorder %v4662_v39, 0  ;;  %v1977_v45 = vsub.s32 0, %v4662_v39 }
 0x1d2   : > { %v4682_v48 = vsel %vm1875_vm3, %v1997_v23, %v1973_v53  ;;  %v2664_v37 = vshrl.u32 %v3713_v0, %v2663_v11  ;;  %v2676_v9 = vor.u32 %v2675_v52, %v2674_v19  ;;  %v2679_v14 = vor.u32 %v2678_v22, %v2677_v61 }
 0x1d3   : > { %v1386_v16 = vmul.f32 %v1385_v1, %v1381_v18  ;;  %v1393_v56 = vmul.f32 %v1392_v10, %v1381_v18  ;;  %v1978_v50 = vsel %vm1976_vm6, %v1977_v45, %v4662_v39  ;;  %vm2680_vm10 = vcmp.lt.s32.totalorder %v4659_v43, 1 }
 0x1d4   : > { %v1979_v35 = vclz %v1978_v50  ;;  %vm2681_vm13 = vcmp.lt.s32.totalorder %v4659_v43, 2  ;;  %vm2682_vm11 = vcmp.lt.s32.totalorder %v4659_v43, 3  ;;  %vm2683_vm12 = vcmp.lt.s32.totalorder %v4659_v43, 4 }
 0x1d5   : > { %v1387_v62 = vadd.f32 1.0, %v1386_v16  ;;  %v1394_v55 = vadd.f32 1.0, %v1393_v56  ;;  %v2684_v40 = vsel %vm2680_vm10, %v2664_v37, %v2667_v5  ;;  %v2692_v41 = vsel %vm2680_vm10, %v2670_v58, %v2673_v26 }
 0x1d6   : > { %v3424_v15 = vadd.s32 4294967294, %v1979_v35  ;;  %v2689_v63 = vsel %vm2683_vm12, %v2676_v9, 920167782  ;;  %v2693_v25 = vsel %vm2683_vm12, %v2679_v14, 1326507024  ;;  %v643_v50 = vadd.s32 1, %v4657_v7 }
 0x1d7   : > { %v1395_v18 = vmul.f32 %v1394_v55, %v1379_v21  ;;  %v1404_v59 = vxor.u32 2147483648, %v1387_v62  ;;  %v2688_v21 = vsel %vm2680_vm10, %v2667_v5, %v2670_v58  ;;  %v2685_v28 = vsel %vm2683_vm12, %v2673_v26, 2102212464 }
 0x1d8   : > { %vm3425_vm14 = vcmp.lt.s32.totalorder %v3424_v15, 0  ;;  %v2690_v38 = vsel %vm2682_vm11, %v2673_v26, %v2689_v63  ;;  %v2694_v51 = vsel %vm2682_vm11, %v2676_v9, %v2693_v25  ;;  %v2686_v32 = vsel %vm2682_vm11, %v2670_v58, %v2685_v28 }
 0x1d9   : > { %v1401_v47 = vxor.u32 2147483648, %v1395_v18  ;;  %v1405_v53 = vsel %vm1403_vm4, %v1404_v59, %v1395_v18  ;;  %v1982_v11 = vsel %vm3425_vm14, 0, %v3424_v15  ;;  %v2691_v20 = vsel %vm2681_vm13, %v2688_v21, %v2690_v38 }
 0x1da   : > { %v1983_v54 = vsub.s32 32, %v1982_v11  ;;  %v1987_v13 = vsub.s32 4294967266, %v1982_v11  ;;  %v1984_v57 = vshll.u32 %v4662_v39, %v1982_v11  ;;  %v2695_v39 = vsel %vm2681_vm13, %v2692_v41, %v2694_v51 }
 0x1db   : > { %v1402_v36 = vsel %vm1400_vm5, %v1387_v62, %v1401_v47  ;;  %v2721_v45 = vand.u32 65535, %v2691_v20  ;;  %v2722_v23 = vshrl.u32 %v2691_v20, 16  ;;  %v2699_v56 = vand.u32 65535, %v2695_v39 }
 0x1dc   : > { %v1406_v31 = vsel %vm1399_vm7, %v1402_v36, %v1405_v53  ;;  %v1985_v10 = vshrl.u32 %v4648_v29, %v1983_v54  ;;  %v1988_v27 = vadd.s32 127, %v1987_v13  ;;  %v2700_v30 = vshrl.u32 %v2695_v39, 16 }
 0x1dd   : > { %v1407_v1 = vsel %vm1396_vm8, nan, %v1406_v31  ;;  %v2724_v5 = vmul.u32 %v2722_v23, %v4652_v42  ;;  %v2725_v29 = vmul.u32 %v2721_v45, %v4655_v46  ;;  %v4720_v19 = vand.u32 8388607, %v633_v34 }
 0x1de   : > { %3274 = vst [vmem:[%s4190_s28 + $0x30] sm:$0xff] %v1407_v1  ;;  %v1986_v52 = vor.u32 %v1985_v10, %v1984_v57  ;;  %v1989_v16 = vshll.u32 %v1988_v27, 23  ;;  %v2000_v61 = vsel %vm4688_vm9, 0, %v4682_v48  ;;  %v4728_v22 = vsel %vm2681_vm13, %v2684_v40, %v2686_v32 }
 0x1df   : > { %v2702_v62 = vmul.u32 %v2700_v30, %v4652_v42  ;;  %v2703_v55 = vmul.u32 %v2699_v56, %v4655_v46  ;;  %v2723_v35 = vmul.u32 %v2721_v45, %v4652_v42  ;;  %v2726_v26 = vmul.u32 %v2722_v23, %v4655_v46 }
 0x1e0   : > { %v1990_v58 = vor.u32 4788187, %v1989_v16  ;;  %v2727_v37 = vshll.u32 %v2724_v5, 16  ;;  %v1993_v7 = vcvt.s32.f32 %v1986_v52  ;;  %v2701_v14 = vmul.u32 %v2699_v56, %v4652_v42 }
 0x1e1   : > { %v2705_v18 = vshll.u32 %v2702_v62, 16  ;;  %v2704_v48 = vmul.u32 %v2700_v30, %v4655_v46  ;;  %v2707_v59 = vshll.u32 %v2703_v55, 16  ;;  %v2729_v43 = vshll.u32 %v2725_v29, 16 }
 0x1e2   : > { %v1991_v9 = vand.u32 2147483647, %v1990_v58  ;;  %vm2731_vm1 = vc.u32 %v2723_v35, %v2727_v37  ;;  %v2733_v41 = vadd.s32 %v2727_v37, %v2723_v35  ;;  %vm644_vm0 = vcmp.gt.s32.totalorder %v643_v50, 0 }
 0x1e3   : > { %vm2709_vm15 = vc.u32 %v2701_v14, %v2705_v18  ;;  %v2711_v40 = vadd.s32 %v2705_v18, %v2701_v14  ;;  %v2732_v47 = vsel %vm2731_vm1, 1, %v3719_v24  ;;  %v645_v42 = vsel %vm644_vm0, %v643_v50, 0 }
 0x1e4   : > { %v1994_v15 = vmul.f32 %v1993_v7, %v1991_v9  ;;  %v2710_v21 = vsel %vm2709_vm15, 1, %v3719_v24  ;;  %v2734_v53 = vadd.s32 %v2732_v47, %v2726_v26  ;;  %v2017_v25 = vadd.s32 3, %v2000_v61 }
 0x1e5   : > { %v2712_v63 = vadd.s32 %v2710_v21, %v2704_v48  ;;  %vm2713_vm2 = vc.u32 %v2711_v40, %v2707_v59  ;;  %v2706_v36 = vshrl.u32 %v2702_v62, 16  ;;  %vm2735_vm4 = vc.u32 %v2733_v41, %v2729_v43 }
 0x1e6   : > { %v1995_v11 = vxor.u32 2147483648, %v1994_v15  ;;  %v2714_v46 = vsel %vm2713_vm2, 1, %v3719_v24  ;;  %v2736_v28 = vsel %vm2735_vm4, 1, %v3719_v24  ;;  %v647_v31 = vand.u32 31, %v645_v42 }
 0x1e7   : > { %v2716_v13 = vadd.s32 %v2714_v46, %v2712_v63  ;;  %v2728_v38 = vshrl.u32 %v2724_v5, 16  ;;  %v2738_v51 = vadd.s32 %v2736_v28, %v2734_v53  ;;  %v2741_v1 = vmul.u32 %v4643_v33, %v4728_v22 }
 0x1e8   : > { %v1996_v54 = vsel %vm1875_vm3, %v1995_v11, %v1994_v15  ;;  %v2708_v27 = vshrl.u32 %v2703_v55, 16  ;;  %v648_v32 = vsub.s32 32, %v647_v31  ;;  %v2730_v39 = vshrl.u32 %v2725_v29, 16 }
 0x1e9   : > { %v1999_v57 = vsel %vm4688_vm9, %v4407_v44, %v1996_v54  ;;  %v2717_v20 = vadd.s32 %v2716_v13, %v2706_v36  ;;  %v4747_v45 = vadd.s32 %v2733_v41, %v2729_v43  ;;  %v2739_v23 = vadd.s32 %v2738_v51, %v2728_v38 }
 0x1ea   : > { %v2001_v10 = vmul.f32 %v1999_v57, %v1999_v57  ;;  %v653_v52 = vshll.u32 %v3714_v2, %v647_v31  ;;  %v4752_v60 = vshrl.u32 %v645_v42, 5  ;;  %v654_v50 = vshrl.u32 %v3715_v4, %v648_v32 }
 0x1eb   : > { %v4750_v30 = vadd.s32 %v2717_v20, %v2708_v27  ;;  %v2740_v5 = vadd.s32 %v2739_v23, %v2730_v39  ;;  %v656_v33 = vshll.u32 %v3715_v4, %v647_v31  ;;  %v657_v58 = vshrl.u32 %v3716_v6, %v648_v32 }
 0x1ec   : > { %v2002_v16 = vmul.f32 -0.001358992, %v2001_v10  ;;  %v2009_v56 = vmul.f32 -0.00019511016, %v2001_v10  ;;  %v659_v22 = vshll.u32 %v3716_v6, %v647_v31  ;;  %v650_v55 = vshll.u32 %v3713_v0, %v647_v31 }
 0x1ed   : > { %vm2743_vm3 = vc.u32 %v4750_v30, %v4747_v45  ;;  %v2744_v62 = vadd.s32 1, %v2740_v5  ;;  %v651_v35 = vshrl.u32 %v3714_v2, %v648_v32  ;;  %v4762_v26 = vor.u32 %v654_v50, %v653_v52 }
 0x1ee   : > { %v2003_v61 = vadd.f32 0.041655596, %v2002_v16  ;;  %v2010_v29 = vadd.f32 0.008332121, %v2009_v56  ;;  %v660_v7 = vshrl.u32 %v3717_v8, %v648_v32  ;;  %v662_v14 = vshll.u32 %v3717_v8, %v647_v31 }
 0x1ef   : > { %v2745_v18 = vsel %vm2743_vm3, %v2744_v62, %v2740_v5  ;;  %v4766_v48 = vor.u32 %v657_v58, %v656_v33  ;;  %v663_v59 = vshrl.u32 %v3718_v17, %v648_v32  ;;  %vm668_vm5 = vcmp.lt.s32.totalorder %v4752_v60, 4 }
 0x1f0   : > { %v2004_v37 = vmul.f32 %v2003_v61, %v2001_v10  ;;  %v2011_v9 = vmul.f32 %v2010_v29, %v2001_v10  ;;  %v2746_v40 = vadd.s32 %v2745_v18, %v2741_v1  ;;  %v661_v47 = vor.u32 %v660_v7, %v659_v22 }
 0x1f1   : > { %v641_v21 = vor.u32 8388608, %v4720_v19  ;;  %v652_v41 = vor.u32 %v651_v35, %v650_v55  ;;  %v664_v53 = vor.u32 %v663_v59, %v662_v14  ;;  %vm665_vm6 = vcmp.lt.s32.totalorder %v4752_v60, 1 }
 0x1f2   : > { %v2005_v43 = vadd.f32 -0.4999988, %v2004_v37  ;;  %v2012_v15 = vadd.f32 -0.16666654, %v2011_v9  ;;  %v2747_v42 = vadd.s32 536870912, %v2746_v40  ;;  %vm667_vm7 = vcmp.lt.s32.totalorder %v4752_v60, 3 }
 0x1f3   : > { %v2018_v36 = vand.u32 3, %v2017_v25  ;;  %v674_v46 = vsel %vm668_vm5, %v661_v47, 920167782  ;;  %v678_v54 = vsel %vm668_vm5, %v664_v53, 1326507024  ;;  %v677_v19 = vsel %vm665_vm6, %v4762_v26, %v4766_v48 }
 0x1f4   : > { %v2006_v11 = vmul.f32 %v2005_v43, %v2001_v10  ;;  %v2013_v63 = vmul.f32 %v2012_v15, %v2001_v10  ;;  %v4777_v31 = vshrl.u32 %v2747_v42, 30  ;;  %v673_v38 = vsel %vm665_vm6, %v652_v41, %v4762_v26 }
 0x1f5   : > { %v675_v25 = vsel %vm667_vm7, %v4766_v48, %v674_v46  ;;  %v679_v51 = vsel %vm667_vm7, %v661_v47, %v678_v54  ;;  %v4791_v1 = vshll.u32 %v641_v21, 8  ;;  %vm666_vm8 = vcmp.lt.s32.totalorder %v4752_v60, 2 }
 0x1f6   : > { %v2007_v13 = vadd.f32 1.0, %v2006_v11  ;;  %v2014_v28 = vadd.f32 1.0, %v2013_v63  ;;  %v2749_v20 = vshll.u32 %v4777_v31, 30  ;;  %vm2019_vm10 = vcmp.lt.s32.totalorder %v2018_v36, 2 }
 0x1f7   : > { %vm2020_vm9 = vcmp.eq.s32.totalorder %v2018_v36, 0  ;;  %vm2023_vm13 = vcmp.eq.s32.totalorder %v2018_v36, 2  ;;  %v680_v39 = vsel %vm666_vm8, %v677_v19, %v679_v51  ;;  %v649_v16 = vshrl.u32 %v3713_v0, %v648_v32 }
 0x1f8   : > { %v2015_v10 = vmul.f32 %v2014_v28, %v1999_v57  ;;  %v2024_v27 = vxor.u32 2147483648, %v2007_v13  ;;  %v2750_v52 = vsub.s32 %v2746_v40, %v2749_v20  ;;  %v676_v56 = vsel %vm666_vm8, %v673_v38, %v675_v25  ;;  %v287_v38 = vpop.f32.mrf.mxu1 }
 0x1f9   : > { %v682_v57 = vand.u32 65535, %v4791_v1  ;;  %v683_v5 = vshrl.u32 %v4791_v1, 16  ;;  %v684_v50 = vand.u32 65535, %v680_v39  ;;  %v685_v33 = vshrl.u32 %v680_v39, 16 }
 0x1fa   : > { %v2021_v23 = vxor.u32 2147483648, %v2015_v10  ;;  %v2025_v61 = vsel %vm2023_vm13, %v2024_v27, %v2015_v10  ;;  %vm2751_vm11 = vcmp.lt.s32.totalorder %v2750_v52, 0  ;;  %v2752_v29 = vsub.s32 0, %v2750_v52 }
 0x1fb   : > { %vm2016_vm12 = vweird.f32 %v4407_v44  ;;  %v687_v62 = vmul.u32 %v685_v33, %v682_v57  ;;  %v688_v32 = vmul.u32 %v684_v50, %v683_v5  ;;  %v706_v37 = vand.u32 65535, %v676_v56 }
 0x1fc   : > { %v2022_v58 = vsel %vm2020_vm9, %v2007_v13, %v2021_v23  ;;  %v2753_v35 = vsel %vm2751_vm11, %v2752_v29, %v2750_v52  ;;  %v707_v9 = vshrl.u32 %v676_v56, 16  ;;  %v686_v14 = vmul.u32 %v684_v50, %v682_v57 }
 0x1fd   : > { %v2026_v22 = vsel %vm2019_vm10, %v2022_v58, %v2025_v61  ;;  %v2754_v7 = vclz %v2753_v35  ;;  %v690_v18 = vshll.u32 %v687_v62, 16  ;;  %v2742_v59 = vadd.s32 %v4747_v45, %v4750_v30 }
 0x1fe   : > { %v2027_v55 = vsel %vm2016_vm12, nan, %v2026_v22  ;;  %v669_v43 = vsel %vm665_vm6, %v649_v16, %v652_v41  ;;  %v689_v15 = vmul.u32 %v685_v33, %v683_v5  ;;  %v692_v40 = vshll.u32 %v688_v32, 16 }
 0x1ff   : > { %3278 = vst [vmem:[%s4190_s28 + $0x50] sm:$0xff] %v2027_v55  ;;  %v3439_v44 = vadd.s32 4294967294, %v2754_v7  ;;  %vm694_vm14 = vc.u32 %v686_v14, %v690_v18  ;;  %v696_v47 = vadd.s32 %v690_v18, %v686_v14  ;;  %vm2650_vm1 = vcmp.lt.s32.totalorder %v4614_v49, 0  ;;  %v299_v18 = vpop.f32.mrf.mxu2 }
 0x200   : > { %v2772_v21 = vsub.s32 4, %v4777_v31  ;;  %v695_v53 = vsel %vm694_vm14, 1, %v3719_v24  ;;  %v709_v11 = vmul.u32 %v707_v9, %v682_v57  ;;  %v710_v63 = vmul.u32 %v706_v37, %v683_v5 }
 0x201   : > { %vm3440_vm15 = vcmp.lt.s32.totalorder %v3439_v44, 0  ;;  %v691_v42 = vshrl.u32 %v687_v62, 16  ;;  %v697_v36 = vadd.s32 %v695_v53, %v689_v15  ;;  %vm698_vm0 = vc.u32 %v696_v47, %v692_v40 }
 0x202   : > { %v2757_v45 = vsel %vm3440_vm15, 0, %v3439_v44  ;;  %v699_v30 = vsel %vm698_vm0, 1, %v3719_v24  ;;  %v708_v41 = vmul.u32 %v706_v37, %v682_v57  ;;  %v712_v46 = vshll.u32 %v709_v11, 16  ;;  %v4820_v57 = vld [vmem:[%s6026_s2] ss:$0 sm:$0xff] }
 0x203   : > { %v2758_v54 = vsub.s32 32, %v2757_v45  ;;  %v2762_v13 = vsub.s32 4294967266, %v2757_v45  ;;  %v701_v28 = vadd.s32 %v699_v30, %v697_v36  ;;  %v711_v19 = vmul.u32 %v707_v9, %v683_v5 }
 0x204   : > { %v2759_v25 = vshll.u32 %v2750_v52, %v2757_v45  ;;  %v714_v51 = vshll.u32 %v710_v63, 16  ;;  %vm716_vm2 = vc.u32 %v708_v41, %v712_v46  ;;  %v718_v10 = vadd.s32 %v712_v46, %v708_v41 }
 0x205   : > { %v2760_v27 = vshrl.u32 %v2742_v59, %v2758_v54  ;;  %v2763_v20 = vadd.s32 127, %v2762_v13  ;;  %v702_v39 = vadd.s32 %v701_v28, %v691_v42  ;;  %v717_v23 = vsel %vm716_vm2, 1, %v3719_v24 }
 0x206   : > { %v670_v16 = vsel %vm668_vm5, %v4766_v48, 2102212464  ;;  %v719_v56 = vadd.s32 %v717_v23, %v711_v19  ;;  %vm720_vm4 = vc.u32 %v718_v10, %v714_v51  ;;  %v4823_v52 = vadd.f32 %v4820_v57, %v287_v38 }
 0x207   : > { %v2761_v5 = vor.u32 %v2760_v27, %v2759_v25  ;;  %v2764_v50 = vshll.u32 %v2763_v20, 23  ;;  %v693_v33 = vshrl.u32 %v688_v32, 16  ;;  %v721_v58 = vsel %vm720_vm4, 1, %v3719_v24 }
 0x208   : > { %v713_v61 = vshrl.u32 %v709_v11, 16  ;;  %v723_v29 = vadd.s32 %v721_v58, %v719_v56  ;;  %v1408_v22 = vand.u32 2147483647, %v4823_v52  ;;  %v1411_v48 = vand.u32 2139095040, %v4823_v52 }
 0x209   : > { %v2765_v62 = vor.u32 4788187, %v2764_v50  ;;  %v2773_v55 = vsel %vm2650_vm1, %v2772_v21, %v4777_v31  ;;  %v671_v35 = vsel %vm667_vm7, %v4762_v26, %v670_v16  ;;  %v703_v37 = vadd.s32 %v702_v39, %v693_v33 }
 0x20a   : > { %v715_v9 = vshrl.u32 %v710_v63, 16  ;;  %v724_v32 = vadd.s32 %v723_v29, %v713_v61  ;;  %v1412_v7 = vshrl.u32 %v1411_v48, 23  ;;  %v1415_v14 = vand.u32 8388607, %v1408_v22 }
 0x20b   : > { %v2766_v59 = vand.u32 2147483647, %v2765_v62  ;;  %v2768_v15 = vcvt.s32.f32 %v2761_v5  ;;  %v722_v44 = vadd.s32 %v718_v10, %v714_v51  ;;  %vm4838_vm3 = vcmp.le.f32.partialorder %v2648_v3, 0.7853982 }
 0x20c   : > { %v672_v26 = vsel %vm666_vm8, %v669_v43, %v671_v35  ;;  %v725_v31 = vadd.s32 %v724_v32, %v715_v9  ;;  %v3414_v47 = vadd.s32 4294967169, %v1412_v7  ;;  %v2775_v53 = vsel %vm4838_vm3, 0, %v2773_v55 }
 0x20d   : > { %v2769_v21 = vmul.f32 %v2768_v15, %v2766_v59  ;;  %vm728_vm5 = vc.u32 %v703_v37, %v722_v44  ;;  %v4847_v11 = vadd.f32 %v4820_v57, %v299_v18  ;;  %v1416_v42 = vor.u32 8388608, %v1415_v14 }
 0x20e   : > { %v729_v63 = vadd.s32 1, %v725_v31  ;;  %v1418_v36 = vadd.s32 1, %v3414_v47  ;;  %v726_v45 = vmul.u32 %v4791_v1, %v672_v26  ;;  %v2792_v30 = vadd.s32 3, %v2775_v53 }
 0x20f   : > { %v2770_v3 = vxor.u32 2147483648, %v2769_v21  ;;  %v2031_v54 = vand.u32 2139095040, %v4847_v11  ;;  %v4858_v19 = vshll.u32 %v1416_v42, 8  ;;  %v2028_v1 = vand.u32 2147483647, %v4847_v11 }
 0x210   : > { %v730_v41 = vsel %vm728_vm5, %v729_v63, %v725_v31  ;;  %vm1419_vm6 = vcmp.gt.s32.totalorder %v1418_v36, 0  ;;  %v4863_v51 = vand.u32 3, %v2792_v30  ;;  %v4865_v10 = vadd.s32 %v722_v44, %v703_v37 }
 0x211   : > { %v2771_v60 = vsel %vm2650_vm1, %v2770_v3, %v2769_v21  ;;  %v731_v43 = vadd.s32 %v730_v41, %v726_v45  ;;  %v1420_v46 = vsel %vm1419_vm6, %v1418_v36, 0  ;;  %v2032_v16 = vshrl.u32 %v2031_v54, 23 }
 0x212   : > { %v4856_v13 = vsel %vm4838_vm3, %v4614_v49, %v2771_v60  ;;  %v1422_v28 = vand.u32 31, %v1420_v46  ;;  %v4872_v50 = vand.u32 65535, %v4858_v19  ;;  %v4876_v33 = vand.u32 8388607, %v2028_v1 }
 0x213   : > { %v2776_v38 = vmul.f32 %v4856_v13, %v4856_v13  ;;  %v732_v25 = vadd.s32 536870912, %v731_v43  ;;  %v4880_v48 = vshrl.u32 %v4858_v19, 16  ;;  %v4888_v14 = vshrl.u32 %v1420_v46, 5 }
 0x214   : > { %v1423_v27 = vsub.s32 32, %v1422_v28  ;;  %v1425_v56 = vshll.u32 %v3713_v0, %v1422_v28  ;;  %v1428_v62 = vshll.u32 %v3714_v2, %v1422_v28  ;;  %v1434_v35 = vshll.u32 %v3716_v6, %v1422_v28 }
 0x215   : > { %v2777_v20 = vmul.f32 -0.001358992, %v2776_v38  ;;  %v2784_v39 = vmul.f32 -0.00019511016, %v2776_v38  ;;  %v4867_v23 = vshrl.u32 %v732_v25, 30  ;;  %vm2798_vm7 = vcmp.eq.s32.totalorder %v4863_v51, 2 }
 0x216   : > { %v1426_v5 = vshrl.u32 %v3714_v2, %v1423_v27  ;;  %v1429_v55 = vshrl.u32 %v3715_v4, %v1423_v27  ;;  %v1435_v37 = vshrl.u32 %v3717_v8, %v1423_v27  ;;  %v1431_v59 = vshll.u32 %v3715_v4, %v1422_v28 }
 0x217   : > { %v2778_v58 = vadd.f32 0.041655596, %v2777_v20  ;;  %v2785_v61 = vadd.f32 0.008332121, %v2784_v39  ;;  %v734_v29 = vshll.u32 %v4867_v23, 30  ;;  %v1432_v15 = vshrl.u32 %v3716_v6, %v1423_v27 }
 0x218   : > { %v4891_v18 = vor.u32 %v1426_v5, %v1425_v56  ;;  %v3426_v44 = vadd.s32 4294967169, %v2032_v16  ;;  %vm2795_vm10 = vcmp.eq.s32.totalorder %v4863_v51, 0  ;;  %v4898_v47 = vor.u32 %v1429_v55, %v1428_v62 }
 0x219   : > { %v2779_v9 = vmul.f32 %v2778_v58, %v2776_v38  ;;  %v2786_v32 = vmul.f32 %v2785_v61, %v2776_v38  ;;  %v4886_v7 = vsub.s32 %v731_v43, %v734_v29  ;;  %v1436_v21 = vor.u32 %v1435_v37, %v1434_v35 }
 0x21a   : > { %v1437_v53 = vshll.u32 %v3717_v8, %v1422_v28  ;;  %v1438_v63 = vshrl.u32 %v3718_v17, %v1423_v27  ;;  %vm2794_vm9 = vcmp.lt.s32.totalorder %v4863_v51, 2  ;;  %vm1440_vm13 = vcmp.lt.s32.totalorder %v4888_v14, 1 }
 0x21b   : > { %v2780_v40 = vadd.f32 -0.4999988, %v2779_v9  ;;  %v2787_v26 = vadd.f32 -0.16666654, %v2786_v32  ;;  %vm736_vm8 = vcmp.lt.s32.totalorder %v4886_v7, 0  ;;  %v737_v31 = vsub.s32 0, %v4886_v7 }
 0x21c   : > { %vm2791_vm11 = vweird.f32 %v4614_v49  ;;  %vm635_vm12 = vcmp.lt.s32.totalorder %v4632_v12, 0  ;;  %v1433_v30 = vor.u32 %v1432_v15, %v1431_v59  ;;  %vm1443_vm14 = vcmp.lt.s32.totalorder %v4888_v14, 4 }
 0x21d   : > { %v2781_v42 = vmul.f32 %v2780_v40, %v2776_v38  ;;  %v2788_v36 = vmul.f32 %v2787_v26, %v2776_v38  ;;  %v738_v3 = vsel %vm736_vm8, %v737_v31, %v4886_v7  ;;  %v2036_v41 = vor.u32 8388608, %v4876_v33 }
 0x21e   : > { %v739_v45 = vclz %v738_v3  ;;  %vm1442_vm1 = vcmp.lt.s32.totalorder %v4888_v14, 3  ;;  %v4910_v46 = vadd.s32 1, %v3426_v44  ;;  %v1439_v28 = vor.u32 %v1438_v63, %v1437_v53 }
 0x21f   : > { %v2782_v60 = vadd.f32 1.0, %v2781_v42  ;;  %v2789_v43 = vadd.f32 1.0, %v2788_v36  ;;  %vm1441_vm15 = vcmp.lt.s32.totalorder %v4888_v14, 2  ;;  %v1448_v38 = vsel %vm1440_vm13, %v4891_v18, %v4898_v47 }
 0x220   : > { %v3400_v54 = vadd.s32 4294967294, %v739_v45  ;;  %vm4920_vm0 = vcmp.le.f32.partialorder %v633_v34, 0.7853982  ;;  %v1424_v16 = vshrl.u32 %v3713_v0, %v1423_v27  ;;  %v1449_v56 = vsel %vm1443_vm14, %v1436_v21, 920167782 }
 0x221   : > { %v2790_v25 = vmul.f32 %v2789_v43, %v4856_v13  ;;  %v2799_v20 = vxor.u32 2147483648, %v2782_v60  ;;  %v757_v5 = vsub.s32 4, %v4867_v23  ;;  %v1450_v58 = vsel %vm1442_vm1, %v1433_v30, %v1449_v56 }
 0x222   : > { %vm3401_vm2 = vcmp.lt.s32.totalorder %v3400_v54, 0  ;;  %v1452_v13 = vsel %vm1440_vm13, %v4898_v47, %v1433_v30  ;;  %v1451_v27 = vsel %vm1441_vm15, %v1448_v38, %v1450_v58  ;;  %v1453_v37 = vsel %vm1443_vm14, %v1439_v28, 1326507024 }
 0x223   : > { %v2796_v61 = vxor.u32 2147483648, %v2790_v25  ;;  %v2800_v34 = vsel %vm2798_vm7, %v2799_v20, %v2790_v25  ;;  %v742_v29 = vsel %vm3401_vm2, 0, %v3400_v54  ;;  %v1454_v32 = vsel %vm1442_vm1, %v1436_v21, %v1453_v37 }
 0x224   : > { %v743_v62 = vsub.s32 32, %v742_v29  ;;  %v744_v55 = vshll.u32 %v4886_v7, %v742_v29  ;;  %v747_v35 = vsub.s32 4294967266, %v742_v29  ;;  %v1481_v59 = vand.u32 65535, %v1451_v27 }
 0x225   : > { %v2797_v9 = vsel %vm2795_vm10, %v2782_v60, %v2796_v61  ;;  %v1482_v15 = vshrl.u32 %v1451_v27, 16  ;;  %v1455_v7 = vsel %vm1441_vm15, %v1452_v13, %v1454_v32  ;;  %v758_v53 = vsel %vm635_vm12, %v757_v5, %v4867_v23 }
 0x226   : > { %v2801_v44 = vsel %vm2794_vm9, %v2797_v9, %v2800_v34  ;;  %v745_v40 = vshrl.u32 %v4865_v10, %v743_v62  ;;  %v748_v26 = vadd.s32 127, %v747_v35  ;;  %v1459_v63 = vand.u32 65535, %v1455_v7 }
 0x227   : > { %v2802_v31 = vsel %vm2791_vm11, nan, %v2801_v44  ;;  %v1460_v21 = vshrl.u32 %v1455_v7, 16  ;;  %v1484_v51 = vmul.u32 %v1482_v15, %v4872_v50  ;;  %v1485_v10 = vmul.u32 %v1481_v59, %v4880_v48 }
 0x228   : > { %3283 = vst [vmem:[%s4190_s28 + $0x78] sm:$0xff] %v2802_v31  ;;  %v746_v42 = vor.u32 %v745_v40, %v744_v55  ;;  %v749_v36 = vshll.u32 %v748_v26, 23  ;;  %v1461_v3 = vmul.u32 %v1459_v63, %v4872_v50  ;;  %v1463_v49 = vmul.u32 %v1459_v63, %v4880_v48 }
 0x229   : > { %v1462_v45 = vmul.u32 %v1460_v21, %v4872_v50  ;;  %v1483_v60 = vmul.u32 %v1481_v59, %v4872_v50  ;;  %v760_v23 = vsel %vm4920_vm0, 0, %v758_v53  ;;  %v1444_v54 = vsel %vm1440_vm13, %v1424_v16, %v4891_v18 }
 0x22a   : > { %v750_v43 = vor.u32 4788187, %v749_v36  ;;  %v1487_v28 = vshll.u32 %v1484_v51, 16  ;;  %v1445_v38 = vsel %vm1443_vm14, %v1433_v30, 2102212464  ;;  %v1464_v25 = vmul.u32 %v1460_v21, %v4880_v48 }
 0x22b   : > { %v1465_v20 = vshll.u32 %v1462_v45, 16  ;;  %v1467_v56 = vshll.u32 %v1463_v49, 16  ;;  %v753_v58 = vcvt.s32.f32 %v746_v42  ;;  %v1486_v50 = vmul.u32 %v1482_v15, %v4880_v48 }
 0x22c   : > { %v751_v5 = vand.u32 2147483647, %v750_v43  ;;  %v1489_v13 = vshll.u32 %v1485_v10, 16  ;;  %vm1491_vm3 = vc.u32 %v1483_v60, %v1487_v28  ;;  %v1493_v34 = vadd.s32 %v1487_v28, %v1483_v60 }
 0x22d   : > { %vm1469_vm4 = vc.u32 %v1461_v3, %v1465_v20  ;;  %v1471_v61 = vadd.s32 %v1465_v20, %v1461_v3  ;;  %v1446_v18 = vsel %vm1442_vm1, %v4898_v47, %v1445_v38  ;;  %v1492_v16 = vsel %vm1491_vm3, 1, %v3719_v24 }
 0x22e   : > { %v754_v29 = vmul.f32 %v753_v58, %v751_v5  ;;  %v1470_v30 = vsel %vm1469_vm4, 1, %v3719_v24  ;;  %v1494_v62 = vadd.s32 %v1492_v16, %v1486_v50  ;;  %vm1495_vm6 = vc.u32 %v1493_v34, %v1489_v13 }
 0x22f   : > { %v1472_v27 = vadd.s32 %v1470_v30, %v1464_v25  ;;  %vm1473_vm5 = vc.u32 %v1471_v61, %v1467_v56  ;;  %v1466_v48 = vshrl.u32 %v1462_v45, 16  ;;  %v1496_v37 = vsel %vm1495_vm6, 1, %v3719_v24 }
 0x230   : > { %v755_v55 = vxor.u32 2147483648, %v754_v29  ;;  %v1474_v35 = vsel %vm1473_vm5, 1, %v3719_v24  ;;  %v1488_v32 = vshrl.u32 %v1484_v51, 16  ;;  %v1498_v59 = vadd.s32 %v1496_v37, %v1494_v62 }
 0x231   : > { %v1476_v9 = vadd.s32 %v1474_v35, %v1472_v27  ;;  %vm2039_vm7 = vcmp.gt.s32.totalorder %v4910_v46, 0  ;;  %v777_v15 = vadd.s32 3, %v760_v23  ;;  %v1468_v44 = vshrl.u32 %v1463_v49, 16 }
 0x232   : > { %v756_v47 = vsel %vm635_vm12, %v755_v55, %v754_v29  ;;  %v2040_v40 = vsel %vm2039_vm7, %v4910_v46, 0  ;;  %v1490_v31 = vshrl.u32 %v1485_v10, 16  ;;  %v1499_v53 = vadd.s32 %v1498_v59, %v1488_v32 }
 0x233   : > { %v759_v26 = vsel %vm4920_vm0, %v4632_v12, %v756_v47  ;;  %v1477_v7 = vadd.s32 %v1476_v9, %v1466_v48  ;;  %v1447_v21 = vsel %vm1441_vm15, %v1444_v54, %v1446_v18  ;;  %v2042_v42 = vand.u32 31, %v2040_v40 }
 0x234   : > { %v761_v63 = vmul.f32 %v759_v26, %v759_v26  ;;  %v4988_v51 = vadd.s32 %v1493_v34, %v1489_v13  ;;  %v1500_v3 = vadd.s32 %v1499_v53, %v1490_v31  ;;  %v4990_v46 = vand.u32 3, %v777_v15 }
 0x235   : > { %v4986_v36 = vadd.s32 %v1477_v7, %v1468_v44  ;;  %v4992_v60 = vsub.s32 32, %v2042_v42  ;;  %v1501_v39 = vmul.u32 %v4858_v19, %v1447_v21  ;;  %v4999_v14 = vshll.u32 %v2036_v41, 8 }
 0x236   : > { %v762_v45 = vmul.f32 -0.001358992, %v761_v63  ;;  %v769_v49 = vmul.f32 -0.00019511016, %v761_v63  ;;  %v1504_v10 = vadd.s32 1, %v1500_v3  ;;  %v5001_v54 = vshrl.u32 %v2040_v40, 5 }
 0x237   : > { %vm1503_vm8 = vc.u32 %v4986_v36, %v4988_v51  ;;  %v2046_v28 = vshrl.u32 %v3714_v2, %v4992_v60  ;;  %v2045_v25 = vshll.u32 %v3713_v0, %v2042_v42  ;;  %v2049_v19 = vshrl.u32 %v3715_v4, %v4992_v60 }
 0x238   : > { %v763_v43 = vadd.f32 0.041655596, %v762_v45  ;;  %v770_v23 = vadd.f32 0.008332121, %v769_v49  ;;  %v1505_v38 = vsel %vm1503_vm8, %v1504_v10, %v1500_v3  ;;  %v2052_v20 = vshrl.u32 %v3716_v6, %v4992_v60 }
 0x239   : > { %v1506_v41 = vadd.s32 %v1505_v38, %v1501_v39  ;;  %v2048_v5 = vshll.u32 %v3714_v2, %v2042_v42  ;;  %v5011_v58 = vor.u32 %v2046_v28, %v2045_v25  ;;  %v2051_v50 = vshll.u32 %v3715_v4, %v2042_v42 }
 0x23a   : > { %v764_v56 = vmul.f32 %v763_v43, %v761_v63  ;;  %v771_v33 = vmul.f32 %v770_v23, %v761_v63  ;;  %v2054_v13 = vshll.u32 %v3716_v6, %v2042_v42  ;;  %v2055_v61 = vshrl.u32 %v3717_v8, %v4992_v60 }
 0x23b   : > { %v1507_v18 = vadd.s32 536870912, %v1506_v41  ;;  %v5017_v30 = vor.u32 %v2049_v19, %v2048_v5  ;;  %v2053_v16 = vor.u32 %v2052_v20, %v2051_v50  ;;  %v2057_v62 = vshll.u32 %v3717_v8, %v2042_v42  ;;  %v314_v20 = vpop.f32.mrf.mxu3 }
 0x23c   : > { %v765_v34 = vadd.f32 -0.4999988, %v764_v56  ;;  %v772_v29 = vadd.f32 -0.16666654, %v771_v33  ;;  %v2056_v27 = vor.u32 %v2055_v61, %v2054_v13  ;;  %v2058_v55 = vshrl.u32 %v3718_v17, %v4992_v60 }
 0x23d   : > { %v5022_v37 = vshrl.u32 %v1507_v18, 30  ;;  %vm2063_vm10 = vcmp.lt.s32.totalorder %v5001_v54, 4  ;;  %vm2060_vm9 = vcmp.lt.s32.totalorder %v5001_v54, 1  ;;  %vm2062_vm13 = vcmp.lt.s32.totalorder %v5001_v54, 3 }
 0x23e   : > { %v766_v48 = vmul.f32 %v765_v34, %v761_v63  ;;  %v773_v35 = vmul.f32 %v772_v29, %v761_v63  ;;  %v2059_v9 = vor.u32 %v2058_v55, %v2057_v62  ;;  %v2069_v32 = vsel %vm2063_vm10, %v2056_v27, 920167782 }
 0x23f   : > { %v1509_v15 = vshll.u32 %v5022_v37, 30  ;;  %v2068_v44 = vsel %vm2060_vm9, %v5011_v58, %v5017_v30  ;;  %vm779_vm11 = vcmp.lt.s32.totalorder %v4990_v46, 2  ;;  %vm2061_vm12 = vcmp.lt.s32.totalorder %v5001_v54, 2 }
 0x240   : > { %v767_v59 = vadd.f32 1.0, %v766_v48  ;;  %v774_v47 = vadd.f32 1.0, %v773_v35  ;;  %v2070_v40 = vsel %vm2062_vm13, %v2053_v16, %v2069_v32  ;;  %v2073_v7 = vsel %vm2063_vm10, %v2059_v9, 1326507024 }
 0x241   : > { %v1510_v63 = vsub.s32 %v1506_v41, %v1509_v15  ;;  %v2072_v21 = vsel %vm2060_vm9, %v5017_v30, %v2053_v16  ;;  %vm780_vm14 = vcmp.eq.s32.totalorder %v4990_v46, 0  ;;  %vm783_vm1 = vcmp.eq.s32.totalorder %v4990_v46, 2 }
 0x242   : > { %v775_v31 = vmul.f32 %v774_v47, %v759_v26  ;;  %v784_v53 = vxor.u32 2147483648, %v767_v59  ;;  %v2071_v42 = vsel %vm2061_vm12, %v2068_v44, %v2070_v40  ;;  %v2074_v3 = vsel %vm2062_vm13, %v2056_v27, %v2073_v7 }
 0x243   : > { %vm1511_vm15 = vcmp.lt.s32.totalorder %v1510_v63, 0  ;;  %v1512_v49 = vsub.s32 0, %v1510_v63  ;;  %v2077_v26 = vand.u32 65535, %v4999_v14  ;;  %v2075_v10 = vsel %vm2061_vm12, %v2072_v21, %v2074_v3 }
 0x244   : > { %v781_v45 = vxor.u32 2147483648, %v775_v31  ;;  %v785_v39 = vsel %vm783_vm1, %v784_v53, %v775_v31  ;;  %v2078_v43 = vshrl.u32 %v4999_v14, 16  ;;  %v2101_v23 = vand.u32 65535, %v2071_v42 }
 0x245   : > { %v1513_v38 = vsel %vm1511_vm15, %v1512_v49, %v1510_v63  ;;  %v2079_v25 = vand.u32 65535, %v2075_v10  ;;  %v2080_v19 = vshrl.u32 %v2075_v10, 16  ;;  %vm776_vm0 = vweird.f32 %v4632_v12 }
 0x246   : > { %v782_v28 = vsel %vm780_vm14, %v767_v59, %v781_v45  ;;  %v1514_v33 = vclz %v1513_v38  ;;  %v2102_v41 = vshrl.u32 %v2071_v42, 16  ;;  %v1502_v61 = vadd.s32 %v4988_v51, %v4986_v36 }
 0x247   : > { %v786_v56 = vsel %vm779_vm11, %v782_v28, %v785_v39  ;;  %v2082_v50 = vmul.u32 %v2080_v19, %v2077_v26  ;;  %v2083_v13 = vmul.u32 %v2079_v25, %v2078_v43  ;;  %v2044_v29 = vshrl.u32 %v3713_v0, %v4992_v60 }
 0x248   : > { %v787_v5 = vsel %vm776_vm0, nan, %v786_v56  ;;  %v3415_v34 = vadd.s32 4294967294, %v1514_v33  ;;  %v5062_v18 = vadd.f32 %v4820_v57, %v314_v20  ;;  %v2065_v12 = vsel %vm2063_vm10, %v2053_v16, 2102212464 }
 0x249   : > { %3270 = vst [vmem:[%s4190_s28 + $0x10] sm:$0xff] %v787_v5  ;;  %v2081_v46 = vmul.u32 %v2079_v25, %v2077_v26  ;;  %v2085_v27 = vshll.u32 %v2082_v50, 16  ;;  %v2103_v62 = vmul.u32 %v2101_v23, %v2077_v26  ;;  %v2084_v55 = vmul.u32 %v2080_v19, %v2078_v43 }
 0x24a   : > { %vm3416_vm2 = vcmp.lt.s32.totalorder %v3415_v34, 0  ;;  %v2087_v48 = vshll.u32 %v2083_v13, 16  ;;  %v2104_v35 = vmul.u32 %v2102_v41, %v2077_v26  ;;  %vm1410_vm4 = vcmp.lt.s32.totalorder %v4823_v52, 0 }
 0x24b   : > { %v1517_v36 = vsel %vm3416_vm2, 0, %v3415_v34  ;;  %vm2089_vm3 = vc.u32 %v2081_v46, %v2085_v27  ;;  %v2091_v51 = vadd.s32 %v2085_v27, %v2081_v46  ;;  %v2105_v9 = vmul.u32 %v2101_v23, %v2078_v43 }
 0x24c   : > { %v1518_v60 = vsub.s32 32, %v1517_v36  ;;  %v1522_v32 = vsub.s32 4294967266, %v1517_v36  ;;  %v2086_v59 = vshrl.u32 %v2082_v50, 16  ;;  %v2090_v47 = vsel %vm2089_vm3, 1, %v3719_v24 }
 0x24d   : > { %v2092_v15 = vadd.s32 %v2090_v47, %v2084_v55  ;;  %vm2093_vm5 = vc.u32 %v2091_v51, %v2087_v48  ;;  %v2106_v16 = vmul.u32 %v2102_v41, %v2078_v43  ;;  %v2107_v44 = vshll.u32 %v2104_v35, 16 }
 0x24e   : > { %v1519_v40 = vshll.u32 %v1510_v63, %v1517_v36  ;;  %v1520_v7 = vshrl.u32 %v1502_v61, %v1518_v60  ;;  %v1523_v31 = vadd.s32 127, %v1522_v32  ;;  %v2094_v53 = vsel %vm2093_vm5, 1, %v3719_v24 }
 0x24f   : > { %v2096_v21 = vadd.s32 %v2094_v53, %v2092_v15  ;;  %v2109_v42 = vshll.u32 %v2105_v9, 16  ;;  %vm2111_vm6 = vc.u32 %v2103_v62, %v2107_v44  ;;  %v2113_v3 = vadd.s32 %v2107_v44, %v2103_v62 }
 0x250   : > { %v1521_v45 = vor.u32 %v1520_v7, %v1519_v40  ;;  %v1524_v49 = vshll.u32 %v1523_v31, 23  ;;  %v1532_v26 = vsub.s32 4, %v5022_v37  ;;  %v2112_v39 = vsel %vm2111_vm6, 1, %v3719_v24 }
 0x251   : > { %v2064_v10 = vsel %vm2060_vm9, %v2044_v29, %v5011_v58  ;;  %v2097_v43 = vadd.s32 %v2096_v21, %v2086_v59  ;;  %v2114_v63 = vadd.s32 %v2112_v39, %v2106_v16  ;;  %vm2115_vm7 = vc.u32 %v2113_v3, %v2109_v42 }
 0x252   : > { %v1525_v23 = vor.u32 4788187, %v1524_v49  ;;  %v2088_v28 = vshrl.u32 %v2083_v13, 16  ;;  %v2116_v38 = vsel %vm2115_vm7, 1, %v3719_v24  ;;  %v2803_v25 = vand.u32 2147483647, %v5062_v18 }
 0x253   : > { %v2066_v19 = vsel %vm2062_vm13, %v5017_v30, %v2065_v12  ;;  %v2108_v20 = vshrl.u32 %v2104_v35, 16  ;;  %v2118_v56 = vadd.s32 %v2116_v38, %v2114_v63  ;;  %v2806_v33 = vand.u32 2139095040, %v5062_v18  ;;  %v275_v30 = vpop.f32.mrf.mxu0 }
 0x254   : > { %v1526_v41 = vand.u32 2147483647, %v1525_v23  ;;  %v1528_v5 = vcvt.s32.f32 %v1521_v45  ;;  %v1533_v58 = vsel %vm1410_vm4, %v1532_v26, %v5022_v37  ;;  %v2098_v50 = vadd.s32 %v2097_v43, %v2088_v28 }
 0x255   : > { %v2110_v13 = vshrl.u32 %v2105_v9, 16  ;;  %v2119_v61 = vadd.s32 %v2118_v56, %v2108_v20  ;;  %v2807_v34 = vshrl.u32 %v2806_v33, 23  ;;  %v2810_v29 = vand.u32 8388607, %v2803_v25 }
 0x256   : > { %v1529_v46 = vmul.f32 %v1528_v5, %v1526_v41  ;;  %v2117_v27 = vadd.s32 %v2113_v3, %v2109_v42  ;;  %vm5087_vm8 = vcmp.le.f32.partialorder %v1408_v22, 0.7853982  ;;  %v2067_v62 = vsel %vm2061_vm12, %v2064_v10, %v2066_v19 }
 0x257   : > { %v2120_v37 = vadd.s32 %v2119_v61, %v2110_v13  ;;  %v3441_v55 = vadd.s32 4294967169, %v2807_v34  ;;  %v1535_v35 = vsel %vm5087_vm8, 0, %v1533_v58  ;;  %v2811_v51 = vor.u32 8388608, %v2810_v29 }
 0x258   : > { %v1530_v48 = vxor.u32 2147483648, %v1529_v46  ;;  %vm2123_vm10 = vc.u32 %v2098_v50, %v2117_v27  ;;  %v5096_v60 = vadd.f32 %v4820_v57, %v275_v30  ;;  %v2121_v32 = vmul.u32 %v4999_v14, %v2067_v62 }
 0x259   : > { %v2124_v36 = vadd.s32 1, %v2120_v37  ;;  %v2813_v9 = vadd.s32 1, %v3441_v55  ;;  %v1552_v15 = vadd.s32 3, %v1535_v35  ;;  %v5104_v7 = vshll.u32 %v2811_v51, 8 }
 0x25a   : > { %v1531_v22 = vsel %vm1410_vm4, %v1530_v48, %v1529_v46  ;;  %v791_v57 = vand.u32 2139095040, %v5096_v60  ;;  %v5111_v26 = vadd.s32 %v2117_v27, %v2098_v50  ;;  %vm1551_vm1 = vweird.f32 %v4823_v52 }
 0x25b   : > { %v1534_v54 = vsel %vm5087_vm8, %v4823_v52, %v1531_v22  ;;  %v2125_v59 = vsel %vm2123_vm10, %v2124_v36, %v2120_v37  ;;  %vm2814_vm9 = vcmp.gt.s32.totalorder %v2813_v9, 0  ;;  %v5107_v45 = vand.u32 3, %v1552_v15 }
 0x25c   : > { %v1536_v47 = vmul.f32 %v1534_v54, %v1534_v54  ;;  %v2126_v16 = vadd.s32 %v2125_v59, %v2121_v32  ;;  %v2815_v44 = vsel %vm2814_vm9, %v2813_v9, 0  ;;  %v5114_v39 = vand.u32 65535, %v5104_v7 }
 0x25d   : > { %v2817_v40 = vand.u32 31, %v2815_v44  ;;  %v5117_v10 = vshrl.u32 %v5104_v7, 16  ;;  %v5119_v43 = vshrl.u32 %v791_v57, 23  ;;  %v5122_v38 = vshrl.u32 %v2815_v44, 5 }
 0x25e   : > { %v1537_v31 = vmul.f32 -0.001358992, %v1536_v47  ;;  %v1544_v53 = vmul.f32 -0.00019511016, %v1536_v47  ;;  %v2127_v21 = vadd.s32 536870912, %v2126_v16  ;;  %vm1558_vm13 = vcmp.eq.s32.totalorder %v5107_v45, 2 }
 0x25f   : > { %v2818_v42 = vsub.s32 32, %v2817_v40  ;;  %v2820_v19 = vshll.u32 %v3713_v0, %v2817_v40  ;;  %vm1555_vm11 = vcmp.eq.s32.totalorder %v5107_v45, 0  ;;  %v2823_v13 = vshll.u32 %v3714_v2, %v2817_v40 }
 0x260   : > { %v1538_v14 = vadd.f32 0.041655596, %v1537_v31  ;;  %v1545_v3 = vadd.f32 0.008332121, %v1544_v53  ;;  %v5109_v49 = vshrl.u32 %v2127_v21, 30  ;;  %v2826_v61 = vshll.u32 %v3715_v4, %v2817_v40 }
 0x261   : > { %v2821_v20 = vshrl.u32 %v3714_v2, %v2818_v42  ;;  %v2824_v56 = vshrl.u32 %v3715_v4, %v2818_v42  ;;  %v2827_v33 = vshrl.u32 %v3716_v6, %v2818_v42  ;;  %v2830_v50 = vshrl.u32 %v3717_v8, %v2818_v42 }
 0x262   : > { %v1539_v63 = vmul.f32 %v1538_v14, %v1536_v47  ;;  %v1546_v23 = vmul.f32 %v1545_v3, %v1536_v47  ;;  %v2129_v28 = vshll.u32 %v5109_v49, 30  ;;  %v2829_v34 = vshll.u32 %v3716_v6, %v2817_v40 }
 0x263   : > { %v2833_v29 = vshrl.u32 %v3718_v17, %v2818_v42  ;;  %vm1554_vm12 = vcmp.lt.s32.totalorder %v5107_v45, 2  ;;  %v2822_v12 = vor.u32 %v2821_v20, %v2820_v19  ;;  %v2825_v62 = vor.u32 %v2824_v56, %v2823_v13 }
 0x264   : > { %v1540_v41 = vadd.f32 -0.4999988, %v1539_v63  ;;  %v1547_v5 = vadd.f32 -0.16666654, %v1546_v23  ;;  %v5129_v58 = vsub.s32 %v2126_v16, %v2129_v28  ;;  %v2828_v37 = vor.u32 %v2827_v33, %v2826_v61 }
 0x265   : > { %v2832_v55 = vshll.u32 %v3717_v8, %v2817_v40  ;;  %v2831_v51 = vor.u32 %v2830_v50, %v2829_v34  ;;  %v2152_v22 = vsub.s32 4, %v5109_v49  ;;  %v2819_v32 = vshrl.u32 %v3713_v0, %v2818_v42 }
 0x266   : > { %v1541_v46 = vmul.f32 %v1540_v41, %v1536_v47  ;;  %v1548_v27 = vmul.f32 %v1547_v5, %v1536_v47  ;;  %vm2131_vm14 = vcmp.lt.s32.totalorder %v5129_v58, 0  ;;  %v2132_v30 = vsub.s32 0, %v5129_v58 }
 0x267   : > { %v2834_v59 = vor.u32 %v2833_v29, %v2832_v55  ;;  %vm2835_vm15 = vcmp.lt.s32.totalorder %v5122_v38, 1  ;;  %vm2836_vm0 = vcmp.lt.s32.totalorder %v5122_v38, 2  ;;  %vm2030_vm2 = vcmp.lt.s32.totalorder %v4847_v11, 0 }
 0x268   : > { %v1542_v48 = vadd.f32 1.0, %v1541_v46  ;;  %v1549_v35 = vadd.f32 1.0, %v1548_v27  ;;  %v2133_v36 = vsel %vm2131_vm14, %v2132_v30, %v5129_v58  ;;  %vm2837_vm4 = vcmp.lt.s32.totalorder %v5122_v38, 3 }
 0x269   : > { %v2134_v9 = vclz %v2133_v36  ;;  %vm2838_vm3 = vcmp.lt.s32.totalorder %v5122_v38, 4  ;;  %v2843_v44 = vsel %vm2835_vm15, %v2822_v12, %v2825_v62  ;;  %v2839_v57 = vsel %vm2835_vm15, %v2819_v32, %v2822_v12 }
 0x26a   : > { %v1550_v47 = vmul.f32 %v1549_v35, %v1534_v54  ;;  %v1559_v15 = vxor.u32 2147483648, %v1542_v48  ;;  %v2840_v31 = vsel %vm2838_vm3, %v2828_v37, 2102212464  ;;  %v2844_v53 = vsel %vm2838_vm3, %v2831_v51, 920167782 }
 0x26b   : > { %v3427_v16 = vadd.s32 4294967294, %v2134_v9  ;;  %v2845_v21 = vsel %vm2837_vm4, %v2828_v37, %v2844_v53  ;;  %v2847_v42 = vsel %vm2835_vm15, %v2825_v62, %v2828_v37  ;;  %v2848_v23 = vsel %vm2838_vm3, %v2834_v59, 1326507024 }
 0x26c   : > { %v1556_v40 = vxor.u32 2147483648, %v1550_v47  ;;  %v1560_v54 = vsel %vm1558_vm13, %v1559_v15, %v1550_v47  ;;  %v2846_v63 = vsel %vm2836_vm0, %v2843_v44, %v2845_v21  ;;  %v2841_v56 = vsel %vm2837_vm4, %v2825_v62, %v2840_v31 }
 0x26d   : > { %vm3428_vm5 = vcmp.lt.s32.totalorder %v3427_v16, 0  ;;  %v2849_v41 = vsel %vm2837_vm4, %v2831_v51, %v2848_v23  ;;  %v2876_v5 = vand.u32 65535, %v2846_v63  ;;  %v2877_v50 = vshrl.u32 %v2846_v63, 16 }
 0x26e   : > { %v1557_v14 = vsel %vm1555_vm11, %v1542_v48, %v1556_v40  ;;  %v2137_v3 = vsel %vm3428_vm5, 0, %v3427_v16  ;;  %v2850_v34 = vsel %vm2836_vm0, %v2847_v42, %v2849_v41  ;;  %v788_v52 = vand.u32 2147483647, %v5096_v60 }
 0x26f   : > { %v1561_v28 = vsel %vm1554_vm12, %v1557_v14, %v1560_v54  ;;  %v2138_v19 = vsub.s32 32, %v2137_v3  ;;  %v2142_v20 = vsub.s32 4294967266, %v2137_v3  ;;  %v2139_v13 = vshll.u32 %v5129_v58, %v2137_v3 }
 0x270   : > { %v1562_v33 = vsel %vm1551_vm1, nan, %v1561_v28  ;;  %v2854_v29 = vand.u32 65535, %v2850_v34  ;;  %v2855_v46 = vshrl.u32 %v2850_v34, 16  ;;  %v2879_v27 = vmul.u32 %v2877_v50, %v5114_v39 }
 0x271   : > { %3275 = vst [vmem:[%s4190_s28 + $0x38] sm:$0xff] %v1562_v33  ;;  %v2140_v61 = vshrl.u32 %v5111_v26, %v2138_v19  ;;  %v2143_v45 = vadd.s32 127, %v2142_v20  ;;  %v2880_v62 = vmul.u32 %v2876_v5, %v5117_v10  ;;  %v3402_v37 = vadd.s32 4294967169, %v5119_v43 }
 0x272   : > { %v5178_v26 = vsel %vm2030_vm2, %v2152_v22, %v5109_v49  ;;  %v5182_v58 = vsel %vm2836_vm0, %v2839_v57, %v2841_v56  ;;  %v2857_v55 = vmul.u32 %v2855_v46, %v5114_v39  ;;  %v2858_v48 = vmul.u32 %v2854_v29, %v5117_v10 }
 0x273   : > { %v2141_v30 = vor.u32 %v2140_v61, %v2139_v13  ;;  %v2144_v12 = vshll.u32 %v2143_v45, 23  ;;  %vm5188_vm6 = vcmp.le.f32.partialorder %v2028_v1, 0.7853982  ;;  %v2878_v36 = vmul.u32 %v2876_v5, %v5114_v39 }
 0x274   : > { %v2881_v49 = vmul.u32 %v2877_v50, %v5117_v10  ;;  %v2882_v51 = vshll.u32 %v2879_v27, 16  ;;  %v2856_v38 = vmul.u32 %v2854_v29, %v5114_v39  ;;  %v2859_v22 = vmul.u32 %v2855_v46, %v5117_v10 }
 0x275   : > { %v2145_v43 = vor.u32 4788187, %v2144_v12  ;;  %v2148_v9 = vcvt.s32.f32 %v2141_v30  ;;  %v2860_v32 = vshll.u32 %v2857_v55, 16  ;;  %v2862_v47 = vshll.u32 %v2858_v48, 16 }
 0x276   : > { %v2884_v15 = vshll.u32 %v2880_v62, 16  ;;  %vm2886_vm7 = vc.u32 %v2878_v36, %v2882_v51  ;;  %v2888_v44 = vadd.s32 %v2882_v51, %v2878_v36  ;;  %v798_v53 = vadd.s32 1, %v3402_v37 }
 0x277   : > { %v2146_v59 = vand.u32 2147483647, %v2145_v43  ;;  %vm2864_vm8 = vc.u32 %v2856_v38, %v2860_v32  ;;  %v2866_v1 = vadd.s32 %v2860_v32, %v2856_v38  ;;  %v2887_v16 = vsel %vm2886_vm7, 1, %v3719_v24 }
 0x278   : > { %v2865_v57 = vsel %vm2864_vm8, 1, %v3719_v24  ;;  %v2889_v31 = vadd.s32 %v2887_v16, %v2881_v49  ;;  %v2883_v39 = vshrl.u32 %v2879_v27, 16  ;;  %vm2890_vm9 = vc.u32 %v2888_v44, %v2884_v15 }
 0x279   : > { %v2149_v40 = vmul.f32 %v2148_v9, %v2146_v59  ;;  %v2867_v54 = vadd.s32 %v2865_v57, %v2859_v22  ;;  %vm2868_vm10 = vc.u32 %v2866_v1, %v2862_v47  ;;  %v2891_v42 = vsel %vm2890_vm9, 1, %v3719_v24 }
 0x27a   : > { %v2869_v21 = vsel %vm2868_vm10, 1, %v3719_v24  ;;  %vm799_vm13 = vcmp.gt.s32.totalorder %v798_v53, 0  ;;  %v2861_v14 = vshrl.u32 %v2857_v55, 16  ;;  %v2893_v63 = vadd.s32 %v2891_v42, %v2889_v31 }
 0x27b   : > { %v2150_v10 = vxor.u32 2147483648, %v2149_v40  ;;  %v2871_v3 = vadd.s32 %v2869_v21, %v2867_v54  ;;  %v800_v23 = vsel %vm799_vm13, %v798_v53, 0  ;;  %v2863_v19 = vshrl.u32 %v2858_v48, 16 }
 0x27c   : > { %v795_v20 = vand.u32 8388607, %v788_v52  ;;  %v802_v56 = vand.u32 31, %v800_v23  ;;  %v2885_v5 = vshrl.u32 %v2880_v62, 16  ;;  %v2894_v50 = vadd.s32 %v2893_v63, %v2883_v39 }
 0x27d   : > { %v2151_v28 = vsel %vm2030_vm2, %v2150_v10, %v2149_v40  ;;  %v2872_v41 = vadd.s32 %v2871_v3, %v2861_v14  ;;  %v2155_v13 = vsel %vm5188_vm6, 0, %v5178_v26  ;;  %v2896_v45 = vmul.u32 %v5104_v7, %v5182_v58 }
 0x27e   : > { %v2154_v33 = vsel %vm5188_vm6, %v4847_v11, %v2151_v28  ;;  %v5212_v34 = vsub.s32 32, %v802_v56  ;;  %v5216_v46 = vadd.s32 %v2888_v44, %v2884_v15  ;;  %v2895_v27 = vadd.s32 %v2894_v50, %v2885_v5 }
 0x27f   : > { %v2156_v61 = vmul.f32 %v2154_v33, %v2154_v33  ;;  %v5214_v29 = vadd.s32 %v2872_v41, %v2863_v19  ;;  %v5218_v30 = vshrl.u32 %v800_v23, 5  ;;  %v805_v37 = vshll.u32 %v3713_v0, %v802_v56 }
 0x280   : > { %v808_v55 = vshll.u32 %v3714_v2, %v802_v56  ;;  %v2899_v26 = vadd.s32 1, %v2895_v27  ;;  %v809_v7 = vshrl.u32 %v3715_v4, %v5212_v34  ;;  %v814_v58 = vshll.u32 %v3716_v6, %v802_v56 }
 0x281   : > { %v2157_v12 = vmul.f32 -0.001358992, %v2156_v61  ;;  %v2164_v62 = vmul.f32 -0.00019511016, %v2156_v61  ;;  %vm2898_vm11 = vc.u32 %v5214_v29, %v5216_v46  ;;  %v811_v43 = vshll.u32 %v3715_v4, %v802_v56 }
 0x282   : > { %v812_v36 = vshrl.u32 %v3716_v6, %v5212_v34  ;;  %v2900_v49 = vsel %vm2898_vm11, %v2899_v26, %v2895_v27  ;;  %v806_v51 = vshrl.u32 %v3714_v2, %v5212_v34  ;;  %v815_v9 = vshrl.u32 %v3717_v8, %v5212_v34 }
 0x283   : > { %v2158_v48 = vadd.f32 0.041655596, %v2157_v12  ;;  %v2165_v35 = vadd.f32 0.008332121, %v2164_v62  ;;  %v817_v38 = vshll.u32 %v3717_v8, %v802_v56  ;;  %v2901_v59 = vadd.s32 %v2900_v49, %v2896_v45 }
 0x284   : > { %v796_v47 = vor.u32 8388608, %v795_v20  ;;  %v2172_v15 = vadd.s32 3, %v2155_v13  ;;  %v5235_v1 = vor.u32 %v809_v7, %v808_v55  ;;  %v816_v16 = vor.u32 %v815_v9, %v814_v58 }
 0x285   : > { %v2159_v22 = vmul.f32 %v2158_v48, %v2156_v61  ;;  %v2166_v32 = vmul.f32 %v2165_v35, %v2156_v61  ;;  %v818_v44 = vshrl.u32 %v3718_v17, %v5212_v34  ;;  %v2902_v31 = vadd.s32 536870912, %v2901_v59 }
 0x286   : > { %v813_v53 = vor.u32 %v812_v36, %v811_v43  ;;  %v5239_v54 = vor.u32 %v806_v51, %v805_v37  ;;  %vm820_vm12 = vcmp.lt.s32.totalorder %v5218_v30, 1  ;;  %vm823_vm14 = vcmp.lt.s32.totalorder %v5218_v30, 4  ;;  %v290_v51 = vpop.f32.mrf.mxu1 }
 0x287   : > { %v2160_v40 = vadd.f32 -0.4999988, %v2159_v22  ;;  %v2167_v57 = vadd.f32 -0.16666654, %v2166_v32  ;;  %v819_v39 = vor.u32 %v818_v44, %v817_v38  ;;  %v5243_v42 = vshrl.u32 %v2902_v31, 30 }
 0x288   : > { %vm822_vm1 = vcmp.lt.s32.totalorder %v5218_v30, 3  ;;  %v2173_v14 = vand.u32 3, %v2172_v15  ;;  %v829_v3 = vsel %vm823_vm14, %v816_v16, 920167782  ;;  %v832_v20 = vsel %vm820_vm12, %v5235_v1, %v813_v53 }
 0x289   : > { %v2161_v10 = vmul.f32 %v2160_v40, %v2156_v61  ;;  %v2168_v21 = vmul.f32 %v2167_v57, %v2156_v61  ;;  %v833_v63 = vsel %vm823_vm14, %v819_v39, 1326507024  ;;  %v2904_v19 = vshll.u32 %v5243_v42, 30  ;;  %v5283_v57 = vld [vmem:[%s6026_s2] ss:$0 sm:$0xff] }
 0x28a   : > { %v828_v56 = vsel %vm820_vm12, %v5239_v54, %v5235_v1  ;;  %v830_v41 = vsel %vm822_vm1, %v813_v53, %v829_v3  ;;  %v834_v5 = vsel %vm822_vm1, %v816_v16, %v833_v63  ;;  %v5262_v50 = vshll.u32 %v796_v47, 8 }
 0x28b   : > { %v2162_v23 = vadd.f32 1.0, %v2161_v10  ;;  %v2169_v28 = vadd.f32 1.0, %v2168_v21  ;;  %v2905_v45 = vsub.s32 %v2901_v59, %v2904_v19  ;;  %vm821_vm15 = vcmp.lt.s32.totalorder %v5218_v30, 2 }
 0x28c   : > { %vm2174_vm0 = vcmp.lt.s32.totalorder %v2173_v14, 2  ;;  %vm2175_vm2 = vcmp.eq.s32.totalorder %v2173_v14, 0  ;;  %v835_v27 = vsel %vm821_vm15, %v832_v20, %v834_v5  ;;  %v831_v37 = vsel %vm821_vm15, %v828_v56, %v830_v41 }
 0x28d   : > { %v2170_v13 = vmul.f32 %v2169_v28, %v2154_v33  ;;  %v2179_v61 = vxor.u32 2147483648, %v2162_v23  ;;  %vm2906_vm4 = vcmp.lt.s32.totalorder %v2905_v45, 0  ;;  %v2907_v62 = vsub.s32 0, %v2905_v45 }
 0x28e   : > { %vm2178_vm3 = vcmp.eq.s32.totalorder %v2173_v14, 2  ;;  %v837_v55 = vand.u32 65535, %v5262_v50  ;;  %v839_v33 = vand.u32 65535, %v835_v27  ;;  %v840_v26 = vshrl.u32 %v835_v27, 16 }
 0x28f   : > { %v2176_v12 = vxor.u32 2147483648, %v2170_v13  ;;  %v2180_v58 = vsel %vm2178_vm3, %v2179_v61, %v2170_v13  ;;  %v2908_v48 = vsel %vm2906_vm4, %v2907_v62, %v2905_v45  ;;  %v838_v35 = vshrl.u32 %v5262_v50, 16 }
 0x290   : > { %vm2171_vm5 = vweird.f32 %v4847_v11  ;;  %v2909_v36 = vclz %v2908_v48  ;;  %v862_v49 = vshrl.u32 %v831_v37, 16  ;;  %v842_v38 = vmul.u32 %v840_v26, %v837_v55 }
 0x291   : > { %v2177_v7 = vsel %vm2175_vm2, %v2162_v23, %v2176_v12  ;;  %v843_v22 = vmul.u32 %v839_v33, %v838_v35  ;;  %v861_v32 = vand.u32 65535, %v831_v37  ;;  %v2897_v59 = vadd.s32 %v5216_v46, %v5214_v29 }
 0x292   : > { %v2181_v43 = vsel %vm2174_vm0, %v2177_v7, %v2180_v58  ;;  %v3442_v47 = vadd.s32 4294967294, %v2909_v36  ;;  %v804_v15 = vshrl.u32 %v3713_v0, %v5212_v34  ;;  %v825_v11 = vsel %vm823_vm14, %v813_v53, 2102212464 }
 0x293   : > { %v2182_v9 = vsel %vm2171_vm5, nan, %v2181_v43  ;;  %v841_v16 = vmul.u32 %v839_v33, %v837_v55  ;;  %v844_v44 = vmul.u32 %v840_v26, %v838_v35  ;;  %v845_v40 = vshll.u32 %v842_v38, 16 }
 0x294   : > { %3279 = vst [vmem:[%s4190_s28 + $0x58] sm:$0xff] %v2182_v9  ;;  %v5286_v31 = vadd.f32 %v5283_v57, %v290_v51  ;;  %vm3443_vm6 = vcmp.lt.s32.totalorder %v3442_v47, 0  ;;  %v846_v29 = vshrl.u32 %v842_v38, 16  ;;  %v847_v46 = vshll.u32 %v843_v22, 16 }
 0x295   : > { %v864_v39 = vmul.u32 %v862_v49, %v837_v55  ;;  %vm2805_vm7 = vcmp.lt.s32.totalorder %v5062_v18, 0  ;;  %v2912_v34 = vsel %vm3443_vm6, 0, %v3442_v47  ;;  %vm849_vm8 = vc.u32 %v841_v16, %v845_v40 }
 0x296   : > { %v851_v53 = vadd.s32 %v845_v40, %v841_v16  ;;  %v865_v10 = vmul.u32 %v861_v32, %v838_v35  ;;  %v2913_v21 = vsub.s32 32, %v2912_v34  ;;  %v2917_v14 = vsub.s32 4294967266, %v2912_v34 }
 0x297   : > { %v850_v3 = vsel %vm849_vm8, 1, %v3719_v24  ;;  %v863_v63 = vmul.u32 %v861_v32, %v837_v55  ;;  %v866_v28 = vmul.u32 %v862_v49, %v838_v35  ;;  %v867_v19 = vshll.u32 %v864_v39, 16 }
 0x298   : > { %v852_v23 = vadd.s32 %v850_v3, %v844_v44  ;;  %vm853_vm10 = vc.u32 %v851_v53, %v847_v46  ;;  %v2914_v20 = vshll.u32 %v2905_v45, %v2912_v34  ;;  %v2915_v56 = vshrl.u32 %v2897_v59, %v2913_v21 }
 0x299   : > { %v2918_v41 = vadd.s32 127, %v2917_v14  ;;  %v854_v5 = vsel %vm853_vm10, 1, %v3719_v24  ;;  %v869_v61 = vshll.u32 %v865_v10, 16  ;;  %vm871_vm9 = vc.u32 %v863_v63, %v867_v19 }
 0x29a   : > { %v856_v13 = vadd.s32 %v854_v5, %v852_v23  ;;  %v873_v27 = vadd.s32 %v867_v19, %v863_v63  ;;  %v2916_v12 = vor.u32 %v2915_v56, %v2914_v20  ;;  %v2927_v37 = vsub.s32 4, %v5243_v42 }
 0x29b   : > { %v2919_v62 = vshll.u32 %v2918_v41, 23  ;;  %v872_v33 = vsel %vm871_vm9, 1, %v3719_v24  ;;  %v1563_v7 = vand.u32 2147483647, %v5286_v31  ;;  %v824_v58 = vsel %vm820_vm12, %v804_v15, %v5239_v54 }
 0x29c   : > { %v857_v55 = vadd.s32 %v856_v13, %v846_v29  ;;  %v874_v26 = vadd.s32 %v872_v33, %v866_v28  ;;  %vm875_vm13 = vc.u32 %v873_v27, %v869_v61  ;;  %v848_v48 = vshrl.u32 %v843_v22, 16 }
 0x29d   : > { %v2920_v45 = vor.u32 4788187, %v2919_v62  ;;  %v876_v35 = vsel %vm875_vm13, 1, %v3719_v24  ;;  %v826_v43 = vsel %vm822_vm1, %v5235_v1, %v825_v11  ;;  %v868_v36 = vshrl.u32 %v864_v39, 16  ;;  %v302_v1 = vpop.f32.mrf.mxu2 }
 0x29e   : > { %v878_v49 = vadd.s32 %v876_v35, %v874_v26  ;;  %v1566_v51 = vand.u32 2139095040, %v5286_v31  ;;  %v2923_v38 = vcvt.s32.f32 %v2916_v12  ;;  %v2928_v32 = vsel %vm2805_vm7, %v2927_v37, %v5243_v42 }
 0x29f   : > { %v2921_v9 = vand.u32 2147483647, %v2920_v45  ;;  %v858_v59 = vadd.s32 %v857_v55, %v848_v48  ;;  %v870_v47 = vshrl.u32 %v865_v10, 16  ;;  %v1570_v15 = vand.u32 8388607, %v1563_v7 }
 0x2a0   : > { %v879_v54 = vadd.s32 %v878_v49, %v868_v36  ;;  %v1567_v22 = vshrl.u32 %v1566_v51, 23  ;;  %v877_v44 = vadd.s32 %v873_v27, %v869_v61  ;;  %vm2804_vm11 = vcmp.le.f32.partialorder %v2803_v25, 0.7853982 }
 0x2a1   : > { %v2924_v16 = vmul.f32 %v2923_v38, %v2921_v9  ;;  %v827_v11 = vsel %vm821_vm15, %v824_v58, %v826_v43  ;;  %v2930_v42 = vsel %vm2804_vm11, 0, %v2928_v32  ;;  %v1571_v34 = vor.u32 8388608, %v1570_v15 }
 0x2a2   : > { %v880_v40 = vadd.s32 %v879_v54, %v870_v47  ;;  %v3417_v29 = vadd.s32 4294967169, %v1567_v22  ;;  %vm883_vm12 = vc.u32 %v858_v59, %v877_v44  ;;  %v5312_v10 = vadd.f32 %v5283_v57, %v302_v1 }
 0x2a3   : > { %v2925_v46 = vxor.u32 2147483648, %v2924_v16  ;;  %v881_v14 = vmul.u32 %v5262_v50, %v827_v11  ;;  %v2947_v30 = vadd.s32 3, %v2930_v42  ;;  %v5318_v20 = vshll.u32 %v1571_v34, 8 }
 0x2a4   : > { %v884_v39 = vadd.s32 1, %v880_v40  ;;  %v1573_v53 = vadd.s32 1, %v3417_v29  ;;  %v2186_v56 = vand.u32 2139095040, %v5312_v10  ;;  %v5323_v62 = vadd.s32 %v877_v44, %v858_v59 }
 0x2a5   : > { %v2926_v21 = vsel %vm2805_vm7, %v2925_v46, %v2924_v16  ;;  %v5321_v61 = vand.u32 3, %v2947_v30  ;;  %v5329_v55 = vand.u32 65535, %v5318_v20  ;;  %v2183_v26 = vand.u32 2147483647, %v5312_v10 }
 0x2a6   : > { %v2929_v25 = vsel %vm2804_vm11, %v5062_v18, %v2926_v21  ;;  %v885_v3 = vsel %vm883_vm12, %v884_v39, %v880_v40  ;;  %vm1574_vm14 = vcmp.gt.s32.totalorder %v1573_v53, 0  ;;  %v2187_v45 = vshrl.u32 %v2186_v56, 23 }
 0x2a7   : > { %v2931_v63 = vmul.f32 %v2929_v25, %v2929_v25  ;;  %v886_v23 = vadd.s32 %v885_v3, %v881_v14  ;;  %v1575_v28 = vsel %vm1574_vm14, %v1573_v53, 0  ;;  %vm2953_vm1 = vcmp.eq.s32.totalorder %v5321_v61, 2 }
 0x2a8   : > { %v1577_v19 = vand.u32 31, %v1575_v28  ;;  %v5341_v47 = vshrl.u32 %v1575_v28, 5  ;;  %vm2950_vm15 = vcmp.eq.s32.totalorder %v5321_v61, 0  ;;  %vm2949_vm0 = vcmp.lt.s32.totalorder %v5321_v61, 2 }
 0x2a9   : > { %v2932_v41 = vmul.f32 -0.001358992, %v2931_v63  ;;  %v2939_v5 = vmul.f32 -0.00019511016, %v2931_v63  ;;  %v887_v13 = vadd.s32 536870912, %v886_v23  ;;  %vm790_vm2 = vcmp.lt.s32.totalorder %v5096_v60, 0 }
 0x2aa   : > { %v1578_v27 = vsub.s32 32, %v1577_v19  ;;  %v1580_v33 = vshll.u32 %v3713_v0, %v1577_v19  ;;  %v1583_v43 = vshll.u32 %v3714_v2, %v1577_v19  ;;  %v1589_v51 = vshll.u32 %v3716_v6, %v1577_v19 }
 0x2ab   : > { %v2933_v50 = vadd.f32 0.041655596, %v2932_v41  ;;  %v2940_v12 = vadd.f32 0.008332121, %v2939_v5  ;;  %v5325_v37 = vshrl.u32 %v887_v13, 30  ;;  %v1586_v54 = vshll.u32 %v3715_v4, %v1577_v19 }
 0x2ac   : > { %v1581_v36 = vshrl.u32 %v3714_v2, %v1578_v27  ;;  %v1584_v49 = vshrl.u32 %v3715_v4, %v1578_v27  ;;  %v1590_v9 = vshrl.u32 %v3717_v8, %v1578_v27  ;;  %v1587_v22 = vshrl.u32 %v3716_v6, %v1578_v27 }
 0x2ad   : > { %v2934_v58 = vmul.f32 %v2933_v50, %v2931_v63  ;;  %v2941_v48 = vmul.f32 %v2940_v12, %v2931_v63  ;;  %v889_v35 = vshll.u32 %v5325_v37, 30  ;;  %v1592_v15 = vshll.u32 %v3717_v8, %v1577_v19 }
 0x2ae   : > { %v1593_v16 = vshrl.u32 %v3718_v17, %v1578_v27  ;;  %vm2946_vm3 = vweird.f32 %v5062_v18  ;;  %v1582_v40 = vor.u32 %v1581_v36, %v1580_v33  ;;  %v1585_v29 = vor.u32 %v1584_v49, %v1583_v43 }
 0x2af   : > { %v2935_v38 = vadd.f32 -0.4999988, %v2934_v58  ;;  %v2942_v32 = vadd.f32 -0.16666654, %v2941_v48  ;;  %v5339_v59 = vsub.s32 %v886_v23, %v889_v35  ;;  %v1591_v46 = vor.u32 %v1590_v9, %v1589_v51 }
 0x2b0   : > { %v3429_v42 = vadd.s32 4294967169, %v2187_v45  ;;  %vm1595_vm5 = vcmp.lt.s32.totalorder %v5341_v47, 1  ;;  %v1588_v14 = vor.u32 %v1587_v22, %v1586_v54  ;;  %vm1598_vm6 = vcmp.lt.s32.totalorder %v5341_v47, 4 }
 0x2b1   : > { %v2936_v44 = vmul.f32 %v2935_v38, %v2931_v63  ;;  %v2943_v1 = vmul.f32 %v2942_v32, %v2931_v63  ;;  %vm891_vm4 = vcmp.lt.s32.totalorder %v5339_v59, 0  ;;  %v892_v11 = vsub.s32 0, %v5339_v59 }
 0x2b2   : > { %v1613_v30 = vshrl.u32 %v5318_v20, 16  ;;  %v1594_v23 = vor.u32 %v1593_v16, %v1592_v15  ;;  %vm1597_vm7 = vcmp.lt.s32.totalorder %v5341_v47, 3  ;;  %vm5360_vm8 = vcmp.le.f32.partialorder %v788_v52, 0.7853982 }
 0x2b3   : > { %v2937_v39 = vadd.f32 1.0, %v2936_v44  ;;  %v2944_v34 = vadd.f32 1.0, %v2943_v1  ;;  %v893_v53 = vsel %vm891_vm4, %v892_v11, %v5339_v59  ;;  %v912_v56 = vsub.s32 4, %v5325_v37 }
 0x2b4   : > { %v894_v21 = vclz %v893_v53  ;;  %vm1596_vm10 = vcmp.lt.s32.totalorder %v5341_v47, 2  ;;  %v1603_v41 = vsel %vm1595_vm5, %v1582_v40, %v1585_v29  ;;  %v1604_v13 = vsel %vm1598_vm6, %v1591_v46, 920167782 }
 0x2b5   : > { %v2945_v3 = vmul.f32 %v2944_v34, %v2929_v25  ;;  %v2954_v63 = vxor.u32 2147483648, %v2937_v39  ;;  %v1579_v25 = vshrl.u32 %v3713_v0, %v1578_v27  ;;  %v2193_v50 = vadd.s32 1, %v3429_v42 }
 0x2b6   : > { %v3403_v19 = vadd.s32 4294967294, %v894_v21  ;;  %v1605_v12 = vsel %vm1597_vm7, %v1588_v14, %v1604_v13  ;;  %v1607_v33 = vsel %vm1595_vm5, %v1585_v29, %v1588_v14  ;;  %v1608_v48 = vsel %vm1598_vm6, %v1594_v23, 1326507024 }
 0x2b7   : > { %v2951_v5 = vxor.u32 2147483648, %v2945_v3  ;;  %v2955_v52 = vsel %vm2953_vm1, %v2954_v63, %v2945_v3  ;;  %v1606_v27 = vsel %vm1596_vm10, %v1603_v41, %v1605_v12  ;;  %v5388_v49 = vsel %vm790_vm2, %v912_v56, %v5325_v37 }
 0x2b8   : > { %vm3404_vm9 = vcmp.lt.s32.totalorder %v3403_v19, 0  ;;  %v1609_v9 = vsel %vm1597_vm7, %v1591_v46, %v1608_v48  ;;  %v1636_v38 = vand.u32 65535, %v1606_v27  ;;  %v1637_v32 = vshrl.u32 %v1606_v27, 16 }
 0x2b9   : > { %v2952_v45 = vsel %vm2950_vm15, %v2937_v39, %v2951_v5  ;;  %v897_v58 = vsel %vm3404_vm9, 0, %v3403_v19  ;;  %v1610_v15 = vsel %vm1596_vm10, %v1607_v33, %v1609_v9  ;;  %v1600_v37 = vsel %vm1598_vm6, %v1588_v14, 2102212464 }
 0x2ba   : > { %v2956_v35 = vsel %vm2949_vm0, %v2952_v45, %v2955_v52  ;;  %v898_v43 = vsub.s32 32, %v897_v58  ;;  %v902_v36 = vsub.s32 4294967266, %v897_v58  ;;  %v899_v54 = vshll.u32 %v5339_v59, %v897_v58 }
 0x2bb   : > { %v2957_v51 = vsel %vm2946_vm3, nan, %v2956_v35  ;;  %v1614_v16 = vand.u32 65535, %v1610_v15  ;;  %v1615_v18 = vshrl.u32 %v1610_v15, 16  ;;  %v1639_v44 = vmul.u32 %v1637_v32, %v5329_v55 }
 0x2bc   : > { %3284 = vst [vmem:[%s4190_s28 + $0x80] sm:$0xff] %v2957_v51  ;;  %v900_v61 = vshrl.u32 %v5323_v62, %v898_v43  ;;  %v903_v22 = vadd.s32 127, %v902_v36  ;;  %v1638_v46 = vmul.u32 %v1636_v38, %v5329_v55  ;;  %v1640_v42 = vmul.u32 %v1636_v38, %v1613_v30 }
 0x2bd   : > { %v915_v62 = vsel %vm5360_vm8, 0, %v5388_v49  ;;  %v1616_v59 = vmul.u32 %v1614_v16, %v5329_v55  ;;  %v1617_v39 = vmul.u32 %v1615_v18, %v5329_v55  ;;  %v1618_v34 = vmul.u32 %v1614_v16, %v1613_v30 }
 0x2be   : > { %v901_v1 = vor.u32 %v900_v61, %v899_v54  ;;  %v904_v11 = vshll.u32 %v903_v22, 23  ;;  %v1599_v21 = vsel %vm1595_vm5, %v1579_v25, %v1582_v40  ;;  %v1601_v14 = vsel %vm1597_vm7, %v1585_v29, %v1600_v37 }
 0x2bf   : > { %v1642_v3 = vshll.u32 %v1639_v44, 16  ;;  %v1619_v63 = vmul.u32 %v1615_v18, %v1613_v30  ;;  %v1620_v23 = vshll.u32 %v1617_v39, 16  ;;  %v1622_v19 = vshll.u32 %v1618_v34, 16 }
 0x2c0   : > { %v905_v53 = vor.u32 4788187, %v904_v11  ;;  %v1641_v56 = vmul.u32 %v1637_v32, %v1613_v30  ;;  %v908_v5 = vcvt.s32.f32 %v901_v1  ;;  %v1644_v13 = vshll.u32 %v1640_v42, 16 }
 0x2c1   : > { %vm1646_vm13 = vc.u32 %v1638_v46, %v1642_v3  ;;  %vm1624_vm11 = vc.u32 %v1616_v59, %v1620_v23  ;;  %v1626_v52 = vadd.s32 %v1620_v23, %v1616_v59  ;;  %v1648_v12 = vadd.s32 %v1642_v3, %v1638_v46 }
 0x2c2   : > { %v906_v41 = vand.u32 2147483647, %v905_v53  ;;  %v1647_v55 = vsel %vm1646_vm13, 1, %v3719_v24  ;;  %v1625_v40 = vsel %vm1624_vm11, 1, %v3719_v24  ;;  %vm2194_vm12 = vcmp.gt.s32.totalorder %v2193_v50, 0 }
 0x2c3   : > { %v1649_v25 = vadd.s32 %v1647_v55, %v1641_v56  ;;  %v1627_v29 = vadd.s32 %v1625_v40, %v1619_v63  ;;  %vm1628_vm14 = vc.u32 %v1626_v52, %v1622_v19  ;;  %v1643_v45 = vshrl.u32 %v1639_v44, 16 }
 0x2c4   : > { %v909_v33 = vmul.f32 %v908_v5, %v906_v41  ;;  %vm1650_vm1 = vc.u32 %v1648_v12, %v1644_v13  ;;  %v1629_v30 = vsel %vm1628_vm14, 1, %v3719_v24  ;;  %v2195_v48 = vsel %vm2194_vm12, %v2193_v50, 0 }
 0x2c5   : > { %v1651_v27 = vsel %vm1650_vm1, 1, %v3719_v24  ;;  %v1621_v35 = vshrl.u32 %v1617_v39, 16  ;;  %v1631_v43 = vadd.s32 %v1629_v30, %v1627_v29  ;;  %v2197_v49 = vand.u32 31, %v2195_v48 }
 0x2c6   : > { %v910_v58 = vxor.u32 2147483648, %v909_v33  ;;  %v1653_v36 = vadd.s32 %v1651_v27, %v1649_v25  ;;  %v1602_v9 = vsel %vm1596_vm10, %v1599_v21, %v1601_v14  ;;  %v1623_v38 = vshrl.u32 %v1618_v34, 16 }
 0x2c7   : > { %v1645_v32 = vshrl.u32 %v1640_v42, 16  ;;  %v1632_v61 = vadd.s32 %v1631_v43, %v1621_v35  ;;  %v5423_v15 = vsub.s32 32, %v2197_v49  ;;  %v932_v37 = vadd.s32 3, %v915_v62 }
 0x2c8   : > { %v911_v51 = vsel %vm790_vm2, %v910_v58, %v909_v33  ;;  %v1654_v22 = vadd.s32 %v1653_v36, %v1643_v45  ;;  %v2190_v16 = vand.u32 8388607, %v2183_v26  ;;  %v5429_v44 = vadd.s32 %v1648_v12, %v1644_v13 }
 0x2c9   : > { %v914_v54 = vsel %vm5360_vm8, %v5096_v60, %v911_v51  ;;  %v5427_v18 = vadd.s32 %v1632_v61, %v1623_v38  ;;  %v1656_v1 = vmul.u32 %v5318_v20, %v1602_v9  ;;  %v5432_v28 = vshrl.u32 %v2195_v48, 5 }
 0x2ca   : > { %v916_v50 = vmul.f32 %v914_v54, %v914_v54  ;;  %v1655_v47 = vadd.s32 %v1654_v22, %v1645_v32  ;;  %v2203_v42 = vshll.u32 %v3714_v2, %v2197_v49  ;;  %v2204_v59 = vshrl.u32 %v3715_v4, %v5423_v15 }
 0x2cb   : > { %vm1658_vm15 = vc.u32 %v5427_v18, %v5429_v44  ;;  %v2207_v39 = vshrl.u32 %v3716_v6, %v5423_v15  ;;  %v2201_v20 = vshrl.u32 %v3714_v2, %v5423_v15  ;;  %v2206_v21 = vshll.u32 %v3715_v4, %v2197_v49 }
 0x2cc   : > { %v917_v11 = vmul.f32 -0.001358992, %v916_v50  ;;  %v924_v46 = vmul.f32 -0.00019511016, %v916_v50  ;;  %v1659_v62 = vadd.s32 1, %v1655_v47  ;;  %v2209_v3 = vshll.u32 %v3716_v6, %v2197_v49 }
 0x2cd   : > { %v2210_v63 = vshrl.u32 %v3717_v8, %v5423_v15  ;;  %v2212_v23 = vshll.u32 %v3717_v8, %v2197_v49  ;;  %v2213_v5 = vshrl.u32 %v3718_v17, %v5423_v15  ;;  %v2200_v13 = vshll.u32 %v3713_v0, %v2197_v49 }
 0x2ce   : > { %v918_v34 = vadd.f32 0.041655596, %v917_v11  ;;  %v925_v53 = vadd.f32 0.008332121, %v924_v46  ;;  %v1660_v14 = vsel %vm1658_vm15, %v1659_v62, %v1655_v47  ;;  %v5451_v52 = vor.u32 %v2204_v59, %v2203_v42  ;;  %v317_v62 = vpop.f32.mrf.mxu3 }
 0x2cf   : > { %v1661_v41 = vadd.s32 %v1660_v14, %v1656_v1  ;;  %v2208_v55 = vor.u32 %v2207_v39, %v2206_v21  ;;  %v2211_v12 = vor.u32 %v2210_v63, %v2209_v3  ;;  %v2214_v29 = vor.u32 %v2213_v5, %v2212_v23 }
 0x2d0   : > { %v919_v19 = vmul.f32 %v918_v34, %v916_v50  ;;  %v926_v56 = vmul.f32 %v925_v53, %v916_v50  ;;  %v933_v45 = vand.u32 3, %v932_v37  ;;  %v2191_v58 = vor.u32 8388608, %v2190_v16 }
 0x2d1   : > { %v1662_v25 = vadd.s32 536870912, %v1661_v41  ;;  %v5453_v30 = vor.u32 %v2201_v20, %v2200_v13  ;;  %vm2218_vm0 = vcmp.lt.s32.totalorder %v5432_v28, 4  ;;  %vm2215_vm2 = vcmp.lt.s32.totalorder %v5432_v28, 1 }
 0x2d2   : > { %v920_v33 = vadd.f32 -0.4999988, %v919_v19  ;;  %v927_v40 = vadd.f32 -0.16666654, %v926_v56  ;;  %vm2217_vm4 = vcmp.lt.s32.totalorder %v5432_v28, 3  ;;  %v2227_v38 = vsel %vm2215_vm2, %v5451_v52, %v2208_v55 }
 0x2d3   : > { %v5455_v35 = vshrl.u32 %v1662_v25, 30  ;;  %v2224_v43 = vsel %vm2218_vm0, %v2211_v12, 920167782  ;;  %v2228_v36 = vsel %vm2218_vm0, %v2214_v29, 1326507024  ;;  %v2223_v32 = vsel %vm2215_vm2, %v5453_v30, %v5451_v52 }
 0x2d4   : > { %v921_v27 = vmul.f32 %v920_v33, %v916_v50  ;;  %v928_v48 = vmul.f32 %v927_v40, %v916_v50  ;;  %v2225_v61 = vsel %vm2217_vm4, %v2208_v55, %v2224_v43  ;;  %v2229_v22 = vsel %vm2217_vm4, %v2211_v12, %v2228_v36 }
 0x2d5   : > { %v1664_v9 = vshll.u32 %v5455_v35, 30  ;;  %v5476_v50 = vshll.u32 %v2191_v58, 8  ;;  %vm2216_vm3 = vcmp.lt.s32.totalorder %v5432_v28, 2  ;;  %vm931_vm5 = vweird.f32 %v5096_v60 }
 0x2d6   : > { %v922_v49 = vadd.f32 1.0, %v921_v27  ;;  %v929_v51 = vadd.f32 1.0, %v928_v48  ;;  %vm934_vm6 = vcmp.lt.s32.totalorder %v933_v45, 2  ;;  %vm935_vm7 = vcmp.eq.s32.totalorder %v933_v45, 0 }
 0x2d7   : > { %v1665_v47 = vsub.s32 %v1661_v41, %v1664_v9  ;;  %v2230_v1 = vsel %vm2216_vm3, %v2227_v38, %v2229_v22  ;;  %v2226_v42 = vsel %vm2216_vm3, %v2223_v32, %v2225_v61  ;;  %vm938_vm10 = vcmp.eq.s32.totalorder %v933_v45, 2 }
 0x2d8   : > { %v930_v37 = vmul.f32 %v929_v51, %v914_v54  ;;  %v939_v16 = vxor.u32 2147483648, %v922_v49  ;;  %v2232_v54 = vand.u32 65535, %v5476_v50  ;;  %v2234_v59 = vand.u32 65535, %v2230_v1 }
 0x2d9   : > { %vm1666_vm8 = vcmp.lt.s32.totalorder %v1665_v47, 0  ;;  %v1667_v46 = vsub.s32 0, %v1665_v47  ;;  %v2235_v39 = vshrl.u32 %v2230_v1, 16  ;;  %v2233_v21 = vshrl.u32 %v5476_v50, 16 }
 0x2da   : > { %v936_v11 = vxor.u32 2147483648, %v930_v37  ;;  %v940_v53 = vsel %vm938_vm10, %v939_v16, %v930_v37  ;;  %v2257_v63 = vshrl.u32 %v2226_v42, 16  ;;  %v5488_v23 = vadd.f32 %v5283_v57, %v317_v62 }
 0x2db   : > { %v1668_v20 = vsel %vm1666_vm8, %v1667_v46, %v1665_v47  ;;  %v2237_v56 = vmul.u32 %v2235_v39, %v2232_v54  ;;  %v2238_v41 = vmul.u32 %v2234_v59, %v2233_v21  ;;  %v2256_v5 = vand.u32 65535, %v2226_v42 }
 0x2dc   : > { %v937_v34 = vsel %vm935_vm7, %v922_v49, %v936_v11  ;;  %v1669_v3 = vclz %v1668_v20  ;;  %v1657_v13 = vadd.s32 %v5429_v44, %v5427_v18  ;;  %v2199_v33 = vshrl.u32 %v3713_v0, %v5423_v15 }
 0x2dd   : > { %v941_v14 = vsel %vm934_vm6, %v937_v34, %v940_v53  ;;  %v2220_v40 = vsel %vm2218_vm0, %v2208_v55, 2102212464  ;;  %v1687_v25 = vsub.s32 4, %v5455_v35  ;;  %v2236_v29 = vmul.u32 %v2234_v59, %v2232_v54 }
 0x2de   : > { %v942_v19 = vsel %vm931_vm5, nan, %v941_v14  ;;  %v3418_v12 = vadd.s32 4294967294, %v1669_v3  ;;  %v2239_v45 = vmul.u32 %v2235_v39, %v2233_v21  ;;  %v2240_v60 = vshll.u32 %v2237_v56, 16  ;;  %v278_v14 = vpop.f32.mrf.mxu0 }
 0x2df   : > { %3271 = vst [vmem:[%s4190_s28 + $0x18] sm:$0xff] %v942_v19  ;;  %vm1565_vm9 = vcmp.lt.s32.totalorder %v5286_v31, 0  ;;  %v2241_v58 = vshrl.u32 %v2237_v56, 16  ;;  %v2242_v27 = vshll.u32 %v2238_v41, 16  ;;  %v2259_v48 = vmul.u32 %v2257_v63, %v2232_v54 }
 0x2e0   : > { %vm3419_vm13 = vcmp.lt.s32.totalorder %v3418_v12, 0  ;;  %vm2244_vm11 = vc.u32 %v2236_v29, %v2240_v60  ;;  %v2246_v18 = vadd.s32 %v2240_v60, %v2236_v29  ;;  %v2260_v44 = vmul.u32 %v2256_v5, %v2233_v21 }
 0x2e1   : > { %v1672_v43 = vsel %vm3419_vm13, 0, %v3418_v12  ;;  %v2245_v49 = vsel %vm2244_vm11, 1, %v3719_v24  ;;  %v2258_v55 = vmul.u32 %v2256_v5, %v2232_v54  ;;  %v2261_v9 = vmul.u32 %v2257_v63, %v2233_v21 }
 0x2e2   : > { %v1673_v36 = vsub.s32 32, %v1672_v43  ;;  %v1677_v15 = vsub.s32 4294967266, %v1672_v43  ;;  %v2247_v51 = vadd.s32 %v2245_v49, %v2239_v45  ;;  %vm2248_vm12 = vc.u32 %v2246_v18, %v2242_v27 }
 0x2e3   : > { %v2262_v38 = vshll.u32 %v2259_v48, 16  ;;  %v1674_v32 = vshll.u32 %v1665_v47, %v1672_v43  ;;  %v2249_v37 = vsel %vm2248_vm12, 1, %v3719_v24  ;;  %v2264_v1 = vshll.u32 %v2260_v44, 16 }
 0x2e4   : > { %v1675_v61 = vshrl.u32 %v1657_v13, %v1673_v36  ;;  %v1678_v22 = vadd.s32 127, %v1677_v15  ;;  %v2251_v16 = vadd.s32 %v2249_v37, %v2247_v51  ;;  %v2219_v62 = vsel %vm2215_vm2, %v2199_v33, %v5453_v30 }
 0x2e5   : > { %vm2266_vm14 = vc.u32 %v2258_v55, %v2262_v38  ;;  %v2268_v11 = vadd.s32 %v2262_v38, %v2258_v55  ;;  %v2958_v47 = vand.u32 2147483647, %v5488_v23  ;;  %v2221_v53 = vsel %vm2217_vm4, %v5451_v52, %v2220_v40 }
 0x2e6   : > { %v1676_v46 = vor.u32 %v1675_v61, %v1674_v32  ;;  %v1679_v42 = vshll.u32 %v1678_v22, 23  ;;  %v2267_v54 = vsel %vm2266_vm14, 1, %v3719_v24  ;;  %v2252_v59 = vadd.s32 %v2251_v16, %v2241_v58 }
 0x2e7   : > { %v2269_v39 = vadd.s32 %v2267_v54, %v2261_v9  ;;  %vm2270_vm1 = vc.u32 %v2268_v11, %v2264_v1  ;;  %v2243_v20 = vshrl.u32 %v2238_v41, 16  ;;  %v1688_v30 = vsel %vm1565_vm9, %v1687_v25, %v5455_v35 }
 0x2e8   : > { %v1680_v34 = vor.u32 4788187, %v1679_v42  ;;  %v2271_v21 = vsel %vm2270_vm1, 1, %v3719_v24  ;;  %v2263_v3 = vshrl.u32 %v2259_v48, 16  ;;  %v2961_v19 = vand.u32 2139095040, %v5488_v23 }
 0x2e9   : > { %v2273_v63 = vadd.s32 %v2271_v21, %v2269_v39  ;;  %v1683_v5 = vcvt.s32.f32 %v1676_v46  ;;  %v2253_v13 = vadd.s32 %v2252_v59, %v2243_v20  ;;  %v2265_v12 = vshrl.u32 %v2260_v44, 16 }
 0x2ea   : > { %v1681_v56 = vand.u32 2147483647, %v1680_v34  ;;  %v2962_v29 = vshrl.u32 %v2961_v19, 23  ;;  %v2965_v52 = vand.u32 8388607, %v2958_v47  ;;  %v5519_v41 = vadd.f32 %v5283_v57, %v278_v14 }
 0x2eb   : > { %v2274_v33 = vadd.s32 %v2273_v63, %v2263_v3  ;;  %v2272_v45 = vadd.s32 %v2268_v11, %v2264_v1  ;;  %vm5523_vm15 = vcmp.le.f32.partialorder %v1563_v7, 0.7853982  ;;  %v2222_v25 = vsel %vm2216_vm3, %v2219_v62, %v2221_v53 }
 0x2ec   : > { %v1684_v40 = vmul.f32 %v1683_v5, %v1681_v56  ;;  %v3444_v58 = vadd.s32 4294967169, %v2962_v29  ;;  %v1690_v48 = vsel %vm5523_vm15, 0, %v1688_v30  ;;  %v2966_v43 = vor.u32 8388608, %v2965_v52 }
 0x2ed   : > { %v2275_v60 = vadd.s32 %v2274_v33, %v2265_v12  ;;  %vm2278_vm0 = vc.u32 %v2253_v13, %v2272_v45  ;;  %v946_v44 = vand.u32 2139095040, %v5519_v41  ;;  %v2276_v36 = vmul.u32 %v5476_v50, %v2222_v25 }
 0x2ee   : > { %v1685_v27 = vxor.u32 2147483648, %v1684_v40  ;;  %v2968_v18 = vadd.s32 1, %v3444_v58  ;;  %v1707_v55 = vadd.s32 3, %v1690_v48  ;;  %v5538_v32 = vshll.u32 %v2966_v43, 8 }
 0x2ef   : > { %v2279_v57 = vadd.s32 1, %v2275_v60  ;;  %v947_v61 = vshrl.u32 %v946_v44, 23  ;;  %v5544_v62 = vadd.s32 %v2272_v45, %v2253_v13  ;;  %vm1706_vm7 = vweird.f32 %v5286_v31 }
 0x2f0   : > { %v1686_v7 = vsel %vm1565_vm9, %v1685_v27, %v1684_v40  ;;  %vm2969_vm2 = vcmp.gt.s32.totalorder %v2968_v18, 0  ;;  %v5540_v46 = vand.u32 3, %v1707_v55  ;;  %v5547_v54 = vand.u32 65535, %v5538_v32 }
 0x2f1   : > { %v1689_v28 = vsel %vm5523_vm15, %v5286_v31, %v1686_v7  ;;  %v2280_v15 = vsel %vm2278_vm0, %v2279_v57, %v2275_v60  ;;  %v2970_v9 = vsel %vm2969_vm2, %v2968_v18, 0  ;;  %v5550_v59 = vshrl.u32 %v5538_v32, 16 }
 0x2f2   : > { %v1691_v49 = vmul.f32 %v1689_v28, %v1689_v28  ;;  %v2281_v51 = vadd.s32 %v2280_v15, %v2276_v36  ;;  %v2972_v38 = vand.u32 31, %v2970_v9  ;;  %v5552_v39 = vadd.s32 4294967169, %v947_v61 }
 0x2f3   : > { %v5555_v21 = vshrl.u32 %v2970_v9, 5  ;;  %vm1713_vm4 = vcmp.eq.s32.totalorder %v5540_v46, 2  ;;  %vm1710_vm3 = vcmp.eq.s32.totalorder %v5540_v46, 0  ;;  %vm1709_vm5 = vcmp.lt.s32.totalorder %v5540_v46, 2 }
 0x2f4   : > { %v1692_v22 = vmul.f32 -0.001358992, %v1691_v49  ;;  %v1699_v37 = vmul.f32 -0.00019511016, %v1691_v49  ;;  %v2282_v16 = vadd.s32 536870912, %v2281_v51  ;;  %v2973_v1 = vsub.s32 32, %v2972_v38 }
 0x2f5   : > { %v2975_v14 = vshll.u32 %v3713_v0, %v2972_v38  ;;  %v2978_v12 = vshll.u32 %v3714_v2, %v2972_v38  ;;  %v2981_v33 = vshll.u32 %v3715_v4, %v2972_v38  ;;  %v2984_v29 = vshll.u32 %v3716_v6, %v2972_v38 }
 0x2f6   : > { %v1693_v11 = vadd.f32 0.041655596, %v1692_v22  ;;  %v1700_v50 = vadd.f32 0.008332121, %v1699_v37  ;;  %v5542_v42 = vshrl.u32 %v2282_v16, 30  ;;  %v2976_v30 = vshrl.u32 %v3714_v2, %v2973_v1 }
 0x2f7   : > { %v2979_v3 = vshrl.u32 %v3715_v4, %v2973_v1  ;;  %v2982_v63 = vshrl.u32 %v3716_v6, %v2973_v1  ;;  %v2985_v13 = vshrl.u32 %v3717_v8, %v2973_v1  ;;  %v2988_v52 = vshrl.u32 %v3718_v17, %v2973_v1 }
 0x2f8   : > { %v1694_v34 = vmul.f32 %v1693_v11, %v1691_v49  ;;  %v1701_v53 = vmul.f32 %v1700_v50, %v1691_v49  ;;  %v2284_v20 = vshll.u32 %v5542_v42, 30  ;;  %v2977_v25 = vor.u32 %v2976_v30, %v2975_v14 }
 0x2f9   : > { %v2980_v60 = vor.u32 %v2979_v3, %v2978_v12  ;;  %v2983_v58 = vor.u32 %v2982_v63, %v2981_v33  ;;  %v2987_v27 = vshll.u32 %v3717_v8, %v2972_v38  ;;  %v2986_v18 = vor.u32 %v2985_v13, %v2984_v29 }
 0x2fa   : > { %v1695_v19 = vadd.f32 -0.4999988, %v1694_v34  ;;  %v1702_v56 = vadd.f32 -0.16666654, %v1701_v53  ;;  %v5562_v5 = vsub.s32 %v2281_v51, %v2284_v20  ;;  %v2307_v7 = vsub.s32 4, %v5542_v42 }
 0x2fb   : > { %v2974_v36 = vshrl.u32 %v3713_v0, %v2973_v1  ;;  %v2989_v15 = vor.u32 %v2988_v52, %v2987_v27  ;;  %vm2990_vm8 = vcmp.lt.s32.totalorder %v5555_v21, 1  ;;  %vm2991_vm10 = vcmp.lt.s32.totalorder %v5555_v21, 2 }
 0x2fc   : > { %v1696_v40 = vmul.f32 %v1695_v19, %v1691_v49  ;;  %v1703_v45 = vmul.f32 %v1702_v56, %v1691_v49  ;;  %vm2286_vm6 = vcmp.lt.s32.totalorder %v5562_v5, 0  ;;  %v2287_v35 = vsub.s32 0, %v5562_v5 }
 0x2fd   : > { %vm2185_vm9 = vcmp.lt.s32.totalorder %v5312_v10, 0  ;;  %vm2992_vm13 = vcmp.lt.s32.totalorder %v5555_v21, 3  ;;  %vm2993_vm11 = vcmp.lt.s32.totalorder %v5555_v21, 4  ;;  %v2998_v9 = vsel %vm2990_vm8, %v2977_v25, %v2980_v60 }
 0x2fe   : > { %v1697_v48 = vadd.f32 1.0, %v1696_v40  ;;  %v1704_v57 = vadd.f32 1.0, %v1703_v45  ;;  %v2288_v43 = vsel %vm2286_vm6, %v2287_v35, %v5562_v5  ;;  %v2994_v61 = vsel %vm2990_vm8, %v2974_v36, %v2977_v25 }
 0x2ff   : > { %v2289_v44 = vclz %v2288_v43  ;;  %v2995_v22 = vsel %vm2993_vm11, %v2983_v58, 2102212464  ;;  %v2999_v37 = vsel %vm2993_vm11, %v2986_v18, 920167782  ;;  %v3002_v1 = vsel %vm2990_vm8, %v2980_v60, %v2983_v58 }
 0x300   : > { %v1705_v49 = vmul.f32 %v1704_v57, %v1689_v28  ;;  %v1714_v55 = vxor.u32 2147483648, %v1697_v48  ;;  %v3000_v16 = vsel %vm2992_vm13, %v2983_v58, %v2999_v37  ;;  %v3003_v53 = vsel %vm2993_vm11, %v2989_v15, 1326507024 }
 0x301   : > { %v3430_v51 = vadd.s32 4294967294, %v2289_v44  ;;  %v3001_v34 = vsel %vm2991_vm10, %v2998_v9, %v3000_v16  ;;  %v2996_v3 = vsel %vm2992_vm13, %v2980_v60, %v2995_v22  ;;  %v3004_v19 = vsel %vm2992_vm13, %v2986_v18, %v3003_v53 }
 0x302   : > { %v1711_v38 = vxor.u32 2147483648, %v1705_v49  ;;  %v1715_v28 = vsel %vm1713_vm4, %v1714_v55, %v1705_v49  ;;  %v3031_v56 = vand.u32 65535, %v3001_v34  ;;  %v3032_v13 = vshrl.u32 %v3001_v34, 16 }
 0x303   : > { %vm3431_vm12 = vcmp.lt.s32.totalorder %v3430_v51, 0  ;;  %v3005_v29 = vsel %vm2991_vm10, %v3002_v1, %v3004_v19  ;;  %v943_v31 = vand.u32 2147483647, %v5519_v41  ;;  %v953_v58 = vadd.s32 1, %v5552_v39 }
 0x304   : > { %v1712_v11 = vsel %vm1710_vm3, %v1697_v48, %v1711_v38  ;;  %v2292_v50 = vsel %vm3431_vm12, 0, %v3430_v51  ;;  %v3009_v52 = vand.u32 65535, %v3005_v29  ;;  %v3010_v40 = vshrl.u32 %v3005_v29, 16 }
 0x305   : > { %v1716_v20 = vsel %vm1709_vm5, %v1712_v11, %v1715_v28  ;;  %v2293_v14 = vsub.s32 32, %v2292_v50  ;;  %v2297_v30 = vsub.s32 4294967266, %v2292_v50  ;;  %v2294_v12 = vshll.u32 %v5562_v5, %v2292_v50 }
 0x306   : > { %v1717_v63 = vsel %vm1706_vm7, nan, %v1716_v20  ;;  %v3034_v45 = vmul.u32 %v3032_v13, %v5547_v54  ;;  %v3035_v60 = vmul.u32 %v3031_v56, %v5550_v59  ;;  %v5615_v5 = vsel %vm2991_vm10, %v2994_v61, %v2996_v3 }
 0x307   : > { %3276 = vst [vmem:[%s4190_s28 + $0x40] sm:$0xff] %v1717_v63  ;;  %v2295_v33 = vshrl.u32 %v5544_v62, %v2293_v14  ;;  %v2298_v46 = vadd.s32 127, %v2297_v30  ;;  %v5611_v62 = vsel %vm2185_vm9, %v2307_v7, %v5542_v42  ;;  %v3012_v27 = vmul.u32 %v3010_v40, %v5547_v54 }
 0x308   : > { %v3013_v48 = vmul.u32 %v3009_v52, %v5550_v59  ;;  %v3033_v43 = vmul.u32 %v3031_v56, %v5547_v54  ;;  %v3036_v18 = vmul.u32 %v3032_v13, %v5550_v59  ;;  %v3037_v44 = vshll.u32 %v3034_v45, 16 }
 0x309   : > { %v2296_v35 = vor.u32 %v2295_v33, %v2294_v12  ;;  %v2299_v25 = vshll.u32 %v2298_v46, 23  ;;  %v3011_v36 = vmul.u32 %v3009_v52, %v5547_v54  ;;  %v3014_v42 = vmul.u32 %v3010_v40, %v5550_v59 }
 0x30a   : > { %v3015_v7 = vshll.u32 %v3012_v27, 16  ;;  %v3017_v21 = vshll.u32 %v3013_v48, 16  ;;  %v3039_v49 = vshll.u32 %v3035_v60, 16  ;;  %vm3041_vm14 = vc.u32 %v3033_v43, %v3037_v44 }
 0x30b   : > { %v2300_v57 = vor.u32 4788187, %v2299_v25  ;;  %v2303_v39 = vcvt.s32.f32 %v2296_v35  ;;  %v3042_v51 = vsel %vm3041_vm14, 1, %v3719_v24  ;;  %v3043_v9 = vadd.s32 %v3037_v44, %v3033_v43 }
 0x30c   : > { %vm3019_vm1 = vc.u32 %v3011_v36, %v3015_v7  ;;  %v3021_v55 = vadd.s32 %v3015_v7, %v3011_v36  ;;  %v3044_v22 = vadd.s32 %v3042_v51, %v3036_v18  ;;  %vm954_vm15 = vcmp.gt.s32.totalorder %v953_v58, 0 }
 0x30d   : > { %v2301_v15 = vand.u32 2147483647, %v2300_v57  ;;  %v3020_v61 = vsel %vm3019_vm1, 1, %v3719_v24  ;;  %v3038_v54 = vshrl.u32 %v3034_v45, 16  ;;  %vm3045_vm2 = vc.u32 %v3043_v9, %v3039_v49 }
 0x30e   : > { %v3022_v37 = vadd.s32 %v3020_v61, %v3014_v42  ;;  %vm3023_vm0 = vc.u32 %v3021_v55, %v3017_v21  ;;  %v3046_v16 = vsel %vm3045_vm2, 1, %v3719_v24  ;;  %v955_v1 = vsel %vm954_vm15, %v953_v58, 0 }
 0x30f   : > { %v2304_v38 = vmul.f32 %v2303_v39, %v2301_v15  ;;  %v3024_v28 = vsel %vm3023_vm0, 1, %v3719_v24  ;;  %v3016_v11 = vshrl.u32 %v3012_v27, 16  ;;  %v3048_v34 = vadd.s32 %v3046_v16, %v3044_v22 }
 0x310   : > { %v3026_v50 = vadd.s32 %v3024_v28, %v3022_v37  ;;  %v957_v53 = vand.u32 31, %v955_v1  ;;  %vm5629_vm4 = vcmp.le.f32.partialorder %v2183_v26, 0.7853982  ;;  %v3018_v30 = vshrl.u32 %v3013_v48, 16 }
 0x311   : > { %v2305_v59 = vxor.u32 2147483648, %v2304_v38  ;;  %v3040_v3 = vshrl.u32 %v3035_v60, 16  ;;  %v3049_v56 = vadd.s32 %v3048_v34, %v3038_v54  ;;  %v2310_v26 = vsel %vm5629_vm4, 0, %v5611_v62 }
 0x312   : > { %v3027_v19 = vadd.s32 %v3026_v50, %v3016_v11  ;;  %v5638_v13 = vsub.s32 32, %v957_v53  ;;  %v3051_v33 = vmul.u32 %v5538_v32, %v5615_v5  ;;  %v950_v46 = vand.u32 8388607, %v943_v31 }
 0x313   : > { %v2306_v14 = vsel %vm2185_vm9, %v2305_v59, %v2304_v38  ;;  %v5649_v52 = vadd.s32 %v3043_v9, %v3039_v49  ;;  %v3050_v40 = vadd.s32 %v3049_v56, %v3040_v3  ;;  %v5651_v45 = vshrl.u32 %v955_v1, 5 }
 0x314   : > { %v2309_v63 = vsel %vm5629_vm4, %v5312_v10, %v2306_v14  ;;  %v5647_v29 = vadd.s32 %v3027_v19, %v3018_v30  ;;  %v963_v60 = vshll.u32 %v3714_v2, %v957_v53  ;;  %v966_v58 = vshll.u32 %v3715_v4, %v957_v53 }
 0x315   : > { %v2311_v12 = vmul.f32 %v2309_v63, %v2309_v63  ;;  %v3054_v32 = vadd.s32 1, %v3050_v40  ;;  %v964_v62 = vshrl.u32 %v3715_v4, %v5638_v13  ;;  %v967_v5 = vshrl.u32 %v3716_v6, %v5638_v13 }
 0x316   : > { %vm3053_vm3 = vc.u32 %v5647_v29, %v5649_v52  ;;  %v960_v57 = vshll.u32 %v3713_v0, %v957_v53  ;;  %v961_v43 = vshrl.u32 %v3714_v2, %v5638_v13  ;;  %v969_v44 = vshll.u32 %v3716_v6, %v957_v53 }
 0x317   : > { %v2312_v35 = vmul.f32 -0.001358992, %v2311_v12  ;;  %v2319_v25 = vmul.f32 -0.00019511016, %v2311_v12  ;;  %v3055_v18 = vsel %vm3053_vm3, %v3054_v32, %v3050_v40  ;;  %v970_v39 = vshrl.u32 %v3717_v8, %v5638_v13 }
 0x318   : > { %v972_v36 = vshll.u32 %v3717_v8, %v957_v53  ;;  %v3056_v15 = vadd.s32 %v3055_v18, %v3051_v33  ;;  %v973_v21 = vshrl.u32 %v3718_v17, %v5638_v13  ;;  %v2327_v49 = vadd.s32 3, %v2310_v26 }
 0x319   : > { %v2313_v27 = vadd.f32 0.041655596, %v2312_v35  ;;  %v2320_v48 = vadd.f32 0.008332121, %v2319_v25  ;;  %v5670_v55 = vor.u32 %v964_v62, %v963_v60  ;;  %v968_v51 = vor.u32 %v967_v5, %v966_v58  ;;  %v305_v60 = vpop.f32.mrf.mxu2 }
 0x31a   : > { %v971_v9 = vor.u32 %v970_v39, %v969_v44  ;;  %v3057_v22 = vadd.s32 536870912, %v3056_v15  ;;  %v974_v37 = vor.u32 %v973_v21, %v972_v36  ;;  %v951_v54 = vor.u32 8388608, %v950_v46  ;;  %v5714_v39 = vld [vmem:[%s6026_s2] ss:$0 sm:$0xff] }
 0x31b   : > { %v2314_v42 = vmul.f32 %v2313_v27, %v2311_v12  ;;  %v2321_v7 = vmul.f32 %v2320_v48, %v2311_v12  ;;  %v5672_v59 = vor.u32 %v961_v43, %v960_v57  ;;  %vm975_vm5 = vcmp.lt.s32.totalorder %v5651_v45, 1 }
 0x31c   : > { %vm978_vm6 = vcmp.lt.s32.totalorder %v5651_v45, 4  ;;  %v5676_v1 = vshrl.u32 %v3057_v22, 30  ;;  %vm977_vm7 = vcmp.lt.s32.totalorder %v5651_v45, 3  ;;  %v2328_v11 = vand.u32 3, %v2327_v49 }
 0x31d   : > { %v2315_v38 = vadd.f32 -0.4999988, %v2314_v42  ;;  %v2322_v61 = vadd.f32 -0.16666654, %v2321_v7  ;;  %v984_v50 = vsel %vm978_vm6, %v971_v9, 920167782  ;;  %v987_v30 = vsel %vm975_vm5, %v5670_v55, %v968_v51 }
 0x31e   : > { %v988_v34 = vsel %vm978_vm6, %v974_v37, 1326507024  ;;  %v3059_v14 = vshll.u32 %v5676_v1, 30  ;;  %v983_v3 = vsel %vm975_vm5, %v5672_v59, %v5670_v55  ;;  %v985_v19 = vsel %vm977_vm7, %v968_v51, %v984_v50 }
 0x31f   : > { %v2316_v28 = vmul.f32 %v2315_v38, %v2311_v12  ;;  %v2323_v16 = vmul.f32 %v2322_v61, %v2311_v12  ;;  %v989_v56 = vsel %vm977_vm7, %v971_v9, %v988_v34  ;;  %v5695_v26 = vshll.u32 %v951_v54, 8 }
 0x320   : > { %v5697_v46 = vsub.s32 %v3056_v15, %v3059_v14  ;;  %vm976_vm8 = vcmp.lt.s32.totalorder %v5651_v45, 2  ;;  %vm2326_vm10 = vweird.f32 %v5312_v10  ;;  %vm2329_vm9 = vcmp.lt.s32.totalorder %v2328_v11, 2 }
 0x321   : > { %v2317_v53 = vadd.f32 1.0, %v2316_v28  ;;  %v2324_v20 = vadd.f32 1.0, %v2323_v16  ;;  %vm2330_vm13 = vcmp.eq.s32.totalorder %v2328_v11, 0  ;;  %v990_v40 = vsel %vm976_vm8, %v987_v30, %v989_v56 }
 0x322   : > { %vm3061_vm11 = vcmp.lt.s32.totalorder %v5697_v46, 0  ;;  %v3062_v25 = vsub.s32 0, %v5697_v46  ;;  %vm2333_vm12 = vcmp.eq.s32.totalorder %v2328_v11, 2  ;;  %v992_v58 = vand.u32 65535, %v5695_v26 }
 0x323   : > { %v2325_v12 = vmul.f32 %v2324_v20, %v2309_v63  ;;  %v2334_v33 = vxor.u32 2147483648, %v2317_v53  ;;  %v986_v63 = vsel %vm976_vm8, %v983_v3, %v985_v19  ;;  %v994_v32 = vand.u32 65535, %v990_v40 }
 0x324   : > { %v995_v62 = vshrl.u32 %v990_v40, 16  ;;  %v3063_v48 = vsel %vm3061_vm11, %v3062_v25, %v5697_v46  ;;  %v993_v57 = vshrl.u32 %v5695_v26, 16  ;;  %v1017_v44 = vshrl.u32 %v986_v63, 16 }
 0x325   : > { %v2331_v35 = vxor.u32 2147483648, %v2325_v12  ;;  %v2335_v27 = vsel %vm2333_vm12, %v2334_v33, %v2325_v12  ;;  %v3064_v18 = vclz %v3063_v48  ;;  %v5717_v36 = vadd.f32 %v5714_v39, %v305_v60 }
 0x326   : > { %v997_v7 = vmul.u32 %v995_v62, %v992_v58  ;;  %v998_v15 = vmul.u32 %v994_v32, %v993_v57  ;;  %v1016_v21 = vand.u32 65535, %v986_v63  ;;  %v3052_v49 = vadd.s32 %v5649_v52, %v5647_v29 }
 0x327   : > { %v2332_v5 = vsel %vm2330_vm13, %v2317_v53, %v2331_v35  ;;  %v3445_v9 = vadd.s32 4294967294, %v3064_v18  ;;  %v959_v38 = vshrl.u32 %v3713_v0, %v5638_v13  ;;  %v980_v61 = vsel %vm978_vm6, %v968_v51, 2102212464 }
 0x328   : > { %v2336_v43 = vsel %vm2329_vm9, %v2332_v5, %v2335_v27  ;;  %v3082_v22 = vsub.s32 4, %v5676_v1  ;;  %v996_v37 = vmul.u32 %v994_v32, %v992_v58  ;;  %v999_v54 = vmul.u32 %v995_v62, %v993_v57 }
 0x329   : > { %v2337_v42 = vsel %vm2326_vm10, nan, %v2336_v43  ;;  %v1000_v10 = vshll.u32 %v997_v7, 16  ;;  %vm2960_vm14 = vcmp.lt.s32.totalorder %v5488_v23, 0  ;;  %vm3446_vm1 = vcmp.lt.s32.totalorder %v3445_v9, 0  ;;  %v320_v43 = vpop.f32.mrf.mxu3 }
 0x32a   : > { %3280 = vst [vmem:[%s4190_s28 + $0x60] sm:$0xff] %v2337_v42  ;;  %v1001_v28 = vshrl.u32 %v997_v7, 16  ;;  %v1002_v16 = vshll.u32 %v998_v15, 16  ;;  %v1019_v11 = vmul.u32 %v1017_v44, %v992_v58  ;;  %v3067_v50 = vsel %vm3446_vm1, 0, %v3445_v9 }
 0x32b   : > { %vm1004_vm15 = vc.u32 %v996_v37, %v1000_v10  ;;  %v1006_v29 = vadd.s32 %v1000_v10, %v996_v37  ;;  %v1020_v52 = vmul.u32 %v1016_v21, %v993_v57  ;;  %v3068_v34 = vsub.s32 32, %v3067_v50 }
 0x32c   : > { %v3072_v13 = vsub.s32 4294967266, %v3067_v50  ;;  %v1005_v53 = vsel %vm1004_vm15, 1, %v3719_v24  ;;  %v1018_v51 = vmul.u32 %v1016_v21, %v992_v58  ;;  %v1021_v14 = vmul.u32 %v1017_v44, %v993_v57 }
 0x32d   : > { %v1007_v20 = vadd.s32 %v1005_v53, %v999_v54  ;;  %vm1008_vm0 = vc.u32 %v1006_v29, %v1002_v16  ;;  %v1022_v30 = vshll.u32 %v1019_v11, 16  ;;  %v3069_v3 = vshll.u32 %v5697_v46, %v3067_v50 }
 0x32e   : > { %v3070_v19 = vshrl.u32 %v3052_v49, %v3068_v34  ;;  %v3073_v56 = vadd.s32 127, %v3072_v13  ;;  %v1009_v12 = vsel %vm1008_vm0, 1, %v3719_v24  ;;  %v1024_v40 = vshll.u32 %v1020_v52, 16 }
 0x32f   : > { %v1011_v33 = vadd.s32 %v1009_v12, %v1007_v20  ;;  %vm1026_vm2 = vc.u32 %v1018_v51, %v1022_v30  ;;  %v1028_v35 = vadd.s32 %v1022_v30, %v1018_v51  ;;  %v979_v60 = vsel %vm975_vm5, %v959_v38, %v5672_v59 }
 0x330   : > { %v3071_v25 = vor.u32 %v3070_v19, %v3069_v3  ;;  %v3074_v63 = vshll.u32 %v3073_v56, 23  ;;  %v1027_v58 = vsel %vm1026_vm2, 1, %v3719_v24  ;;  %v2338_v46 = vand.u32 2147483647, %v5717_v36 }
 0x331   : > { %v1012_v32 = vadd.s32 %v1011_v33, %v1001_v28  ;;  %v1029_v62 = vadd.s32 %v1027_v58, %v1021_v14  ;;  %vm1030_vm4 = vc.u32 %v1028_v35, %v1024_v40  ;;  %v981_v27 = vsel %vm977_vm7, %v5670_v55, %v980_v61 }
 0x332   : > { %v3075_v5 = vor.u32 4788187, %v3074_v63  ;;  %v1003_v48 = vshrl.u32 %v998_v15, 16  ;;  %v1031_v57 = vsel %vm1030_vm4, 1, %v3719_v24  ;;  %v3083_v59 = vsel %vm2960_vm14, %v3082_v22, %v5676_v1 }
 0x333   : > { %v1023_v18 = vshrl.u32 %v1019_v11, 16  ;;  %v1033_v44 = vadd.s32 %v1031_v57, %v1029_v62  ;;  %v2341_v42 = vand.u32 2139095040, %v5717_v36  ;;  %v3078_v21 = vcvt.s32.f32 %v3071_v25 }
 0x334   : > { %v3076_v7 = vand.u32 2147483647, %v3075_v5  ;;  %v1013_v49 = vadd.s32 %v1012_v32, %v1003_v48  ;;  %v1025_v9 = vshrl.u32 %v1020_v52, 16  ;;  %v2345_v55 = vand.u32 8388607, %v2338_v46 }
 0x335   : > { %v1034_v38 = vadd.s32 %v1033_v44, %v1023_v18  ;;  %v2342_v37 = vshrl.u32 %v2341_v42, 23  ;;  %v5749_v15 = vadd.f32 %v5714_v39, %v320_v43  ;;  %v1032_v54 = vadd.s32 %v1028_v35, %v1024_v40 }
 0x336   : > { %v3079_v61 = vmul.f32 %v3078_v21, %v3076_v7  ;;  %vm5753_vm3 = vcmp.le.f32.partialorder %v2958_v47, 0.7853982  ;;  %v982_v22 = vsel %vm976_vm8, %v979_v60, %v981_v27  ;;  %v2346_v50 = vor.u32 8388608, %v2345_v55 }
 0x337   : > { %v1035_v10 = vadd.s32 %v1034_v38, %v1025_v9  ;;  %v3432_v28 = vadd.s32 4294967169, %v2342_v37  ;;  %v3085_v11 = vsel %vm5753_vm3, 0, %v3083_v59  ;;  %vm1038_vm5 = vc.u32 %v1013_v49, %v1032_v54 }
 0x338   : > { %v3080_v16 = vxor.u32 2147483648, %v3079_v61  ;;  %v3116_v52 = vand.u32 2139095040, %v5749_v15  ;;  %v1036_v34 = vmul.u32 %v5695_v26, %v982_v22  ;;  %v3102_v51 = vadd.s32 3, %v3085_v11 }
 0x339   : > { %v1039_v39 = vadd.s32 1, %v1035_v10  ;;  %v2348_v29 = vadd.s32 1, %v3432_v28  ;;  %v5768_v3 = vshll.u32 %v2346_v50, 8  ;;  %v5774_v60 = vadd.s32 %v1032_v54, %v1013_v49 }
 0x33a   : > { %v3081_v47 = vsel %vm2960_vm14, %v3080_v16, %v3079_v61  ;;  %v3117_v19 = vshrl.u32 %v3116_v52, 23  ;;  %v5772_v25 = vand.u32 3, %v3102_v51  ;;  %v3113_v32 = vand.u32 2147483647, %v5749_v15 }
 0x33b   : > { %v3084_v45 = vsel %vm5753_vm3, %v5488_v23, %v3081_v47  ;;  %v1040_v13 = vsel %vm1038_vm5, %v1039_v39, %v1035_v10  ;;  %vm2349_vm6 = vcmp.gt.s32.totalorder %v2348_v29, 0  ;;  %v5777_v58 = vand.u32 65535, %v5768_v3 }
 0x33c   : > { %v3086_v53 = vmul.f32 %v3084_v45, %v3084_v45  ;;  %v1041_v20 = vadd.s32 %v1040_v13, %v1036_v34  ;;  %v2350_v14 = vsel %vm2349_vm6, %v2348_v29, 0  ;;  %v3447_v62 = vadd.s32 4294967169, %v3117_v19 }
 0x33d   : > { %v2352_v30 = vand.u32 31, %v2350_v14  ;;  %vm945_vm7 = vcmp.lt.s32.totalorder %v5519_v41, 0  ;;  %v5781_v57 = vshrl.u32 %v2350_v14, 5  ;;  %vm3108_vm8 = vcmp.eq.s32.totalorder %v5772_v25, 2 }
 0x33e   : > { %v3087_v56 = vmul.f32 -0.001358992, %v3086_v53  ;;  %v3094_v12 = vmul.f32 -0.00019511016, %v3086_v53  ;;  %v1042_v33 = vadd.s32 536870912, %v1041_v20  ;;  %vm3105_vm10 = vcmp.eq.s32.totalorder %v5772_v25, 0 }
 0x33f   : > { %v5770_v40 = vsub.s32 32, %v2352_v30  ;;  %v2355_v43 = vshll.u32 %v3713_v0, %v2352_v30  ;;  %v2358_v49 = vshll.u32 %v3714_v2, %v2352_v30  ;;  %v2361_v9 = vshll.u32 %v3715_v4, %v2352_v30 }
 0x340   : > { %v3088_v26 = vadd.f32 0.041655596, %v3087_v56  ;;  %v3095_v35 = vadd.f32 0.008332121, %v3094_v12  ;;  %v1043_v63 = vshrl.u32 %v1042_v33, 30  ;;  %v2364_v37 = vshll.u32 %v3716_v6, %v2352_v30 }
 0x341   : > { %v2356_v59 = vshrl.u32 %v3714_v2, %v5770_v40  ;;  %v2359_v18 = vshrl.u32 %v3715_v4, %v5770_v40  ;;  %v2365_v44 = vshrl.u32 %v3717_v8, %v5770_v40  ;;  %v2362_v38 = vshrl.u32 %v3716_v6, %v5770_v40 }
 0x342   : > { %v3089_v5 = vmul.f32 %v3088_v26, %v3086_v53  ;;  %v3096_v27 = vmul.f32 %v3095_v35, %v3086_v53  ;;  %v1044_v48 = vshll.u32 %v1043_v63, 30  ;;  %v2368_v55 = vshrl.u32 %v3718_v17, %v5770_v40 }
 0x343   : > { %vm3104_vm9 = vcmp.lt.s32.totalorder %v5772_v25, 2  ;;  %vm3101_vm11 = vweird.f32 %v5488_v23  ;;  %v1067_v22 = vsub.s32 4, %v1043_v63  ;;  %v2357_v10 = vor.u32 %v2356_v59, %v2355_v43 }
 0x344   : > { %v3090_v42 = vadd.f32 -0.4999988, %v3089_v5  ;;  %v3097_v7 = vadd.f32 -0.16666654, %v3096_v27  ;;  %v5791_v21 = vsub.s32 %v1041_v20, %v1044_v48  ;;  %v2360_v28 = vor.u32 %v2359_v18, %v2358_v49 }
 0x345   : > { %v2366_v16 = vor.u32 %v2365_v44, %v2364_v37  ;;  %v2367_v29 = vshll.u32 %v3717_v8, %v2352_v30  ;;  %v2363_v47 = vor.u32 %v2362_v38, %v2361_v9  ;;  %v2388_v34 = vshrl.u32 %v5768_v3, 16 }
 0x346   : > { %v3091_v61 = vmul.f32 %v3090_v42, %v3086_v53  ;;  %v3098_v54 = vmul.f32 %v3097_v7, %v3086_v53  ;;  %vm1046_vm13 = vcmp.lt.s32.totalorder %v5791_v21, 0  ;;  %v1047_v1 = vsub.s32 0, %v5791_v21 }
 0x347   : > { %v5808_v13 = vadd.s32 1, %v3447_v62  ;;  %vm5812_vm12 = vcmp.le.f32.partialorder %v943_v31, 0.7853982  ;;  %v2369_v14 = vor.u32 %v2368_v55, %v2367_v29  ;;  %vm2370_vm14 = vcmp.lt.s32.totalorder %v5781_v57, 1 }
 0x348   : > { %v3092_v11 = vadd.f32 1.0, %v3091_v61  ;;  %v3099_v39 = vadd.f32 1.0, %v3098_v54  ;;  %v1048_v50 = vsel %vm1046_vm13, %v1047_v1, %v5791_v21  ;;  %v5819_v30 = vsel %vm945_vm7, %v1067_v22, %v1043_v63 }
 0x349   : > { %v1049_v52 = vclz %v1048_v50  ;;  %vm2373_vm1 = vcmp.lt.s32.totalorder %v5781_v57, 4  ;;  %vm2371_vm15 = vcmp.lt.s32.totalorder %v5781_v57, 2  ;;  %vm2372_vm0 = vcmp.lt.s32.totalorder %v5781_v57, 3 }
 0x34a   : > { %v3100_v53 = vmul.f32 %v3099_v39, %v3084_v45  ;;  %v3109_v51 = vxor.u32 2147483648, %v3092_v11  ;;  %v2378_v45 = vsel %vm2370_vm14, %v2357_v10, %v2360_v28  ;;  %v2379_v31 = vsel %vm2373_vm1, %v2366_v16, 920167782 }
 0x34b   : > { %v3406_v19 = vadd.s32 4294967294, %v1049_v52  ;;  %v2380_v33 = vsel %vm2372_vm0, %v2363_v47, %v2379_v31  ;;  %v2382_v26 = vsel %vm2370_vm14, %v2360_v28, %v2363_v47  ;;  %v2383_v5 = vsel %vm2373_vm1, %v2369_v14, 1326507024 }
 0x34c   : > { %v3106_v56 = vxor.u32 2147483648, %v3100_v53  ;;  %v3110_v12 = vsel %vm3108_vm8, %v3109_v51, %v3100_v53  ;;  %v2381_v62 = vsel %vm2371_vm15, %v2378_v45, %v2380_v33  ;;  %v2375_v59 = vsel %vm2373_vm1, %v2363_v47, 2102212464 }
 0x34d   : > { %vm3407_vm2 = vcmp.lt.s32.totalorder %v3406_v19, 0  ;;  %v2384_v44 = vsel %vm2372_vm0, %v2366_v16, %v2383_v5  ;;  %v2411_v42 = vand.u32 65535, %v2381_v62  ;;  %v2412_v7 = vshrl.u32 %v2381_v62, 16 }
 0x34e   : > { %v3107_v35 = vsel %vm3105_vm10, %v3092_v11, %v3106_v56  ;;  %v1052_v63 = vsel %vm3407_vm2, 0, %v3406_v19  ;;  %v2385_v38 = vsel %vm2371_vm15, %v2382_v26, %v2384_v44  ;;  %v2354_v37 = vshrl.u32 %v3713_v0, %v5770_v40 }
 0x34f   : > { %v3111_v27 = vsel %vm3104_vm9, %v3107_v35, %v3110_v12  ;;  %v1053_v48 = vsub.s32 32, %v1052_v63  ;;  %v1057_v43 = vsub.s32 4294967266, %v1052_v63  ;;  %v1054_v49 = vshll.u32 %v5791_v21, %v1052_v63 }
 0x350   : > { %v3112_v18 = vsel %vm3101_vm11, nan, %v3111_v27  ;;  %v2389_v55 = vand.u32 65535, %v2385_v38  ;;  %v2390_v23 = vshrl.u32 %v2385_v38, 16  ;;  %v2414_v61 = vmul.u32 %v2412_v7, %v5777_v58 }
 0x351   : > { %3285 = vst [vmem:[%s4190_s28 + $0x88] sm:$0xff] %v3112_v18  ;;  %v1055_v9 = vshrl.u32 %v5774_v60, %v1053_v48  ;;  %v1058_v25 = vadd.s32 127, %v1057_v43  ;;  %v1070_v22 = vsel %vm5812_vm12, 0, %v5819_v30  ;;  %v2415_v21 = vmul.u32 %v2411_v42, %v2388_v34 }
 0x352   : > { %v2374_v60 = vsel %vm2370_vm14, %v2354_v37, %v2357_v10  ;;  %v2376_v16 = vsel %vm2372_vm0, %v2360_v28, %v2375_v59  ;;  %v2392_v11 = vmul.u32 %v2390_v23, %v5777_v58  ;;  %v2393_v40 = vmul.u32 %v2389_v55, %v2388_v34 }
 0x353   : > { %v1056_v54 = vor.u32 %v1055_v9, %v1054_v49  ;;  %v1059_v1 = vshll.u32 %v1058_v25, 23  ;;  %v2413_v50 = vmul.u32 %v2411_v42, %v5777_v58  ;;  %v2416_v29 = vmul.u32 %v2412_v7, %v2388_v34 }
 0x354   : > { %v2417_v52 = vshll.u32 %v2414_v61, 16  ;;  %v2391_v53 = vmul.u32 %v2389_v55, %v5777_v58  ;;  %v2394_v51 = vmul.u32 %v2390_v23, %v2388_v34  ;;  %v2395_v14 = vshll.u32 %v2392_v11, 16 }
 0x355   : > { %v1060_v39 = vor.u32 4788187, %v1059_v1  ;;  %v1063_v47 = vcvt.s32.f32 %v1056_v54  ;;  %v2397_v30 = vshll.u32 %v2393_v40, 16  ;;  %v2419_v45 = vshll.u32 %v2415_v21, 16 }
 0x356   : > { %vm2421_vm4 = vc.u32 %v2413_v50, %v2417_v52  ;;  %vm2399_vm3 = vc.u32 %v2391_v53, %v2395_v14  ;;  %v2401_v10 = vadd.s32 %v2395_v14, %v2391_v53  ;;  %v2423_v56 = vadd.s32 %v2417_v52, %v2413_v50 }
 0x357   : > { %v1061_v19 = vand.u32 2147483647, %v1060_v39  ;;  %v2422_v28 = vsel %vm2421_vm4, 1, %v3719_v24  ;;  %v2400_v12 = vsel %vm2399_vm3, 1, %v3719_v24  ;;  %vm3124_vm5 = vcmp.gt.s32.totalorder %v5808_v13, 0 }
 0x358   : > { %v2424_v33 = vadd.s32 %v2422_v28, %v2416_v29  ;;  %v2402_v26 = vadd.s32 %v2400_v12, %v2394_v51  ;;  %vm2403_vm6 = vc.u32 %v2401_v10, %v2397_v30  ;;  %v2418_v58 = vshrl.u32 %v2414_v61, 16 }
 0x359   : > { %v1064_v31 = vmul.f32 %v1063_v47, %v1061_v19  ;;  %vm2425_vm8 = vc.u32 %v2423_v56, %v2419_v45  ;;  %v2404_v35 = vsel %vm2403_vm6, 1, %v3719_v24  ;;  %v3125_v62 = vsel %vm3124_vm5, %v5808_v13, 0 }
 0x35a   : > { %v2426_v63 = vsel %vm2425_vm8, 1, %v3719_v24  ;;  %v2396_v5 = vshrl.u32 %v2392_v11, 16  ;;  %v2406_v27 = vadd.s32 %v2404_v35, %v2402_v26  ;;  %v3127_v43 = vand.u32 31, %v3125_v62 }
 0x35b   : > { %v1065_v34 = vxor.u32 2147483648, %v1064_v31  ;;  %v2428_v48 = vadd.s32 %v2426_v63, %v2424_v33  ;;  %v2377_v18 = vsel %vm2371_vm15, %v2374_v60, %v2376_v16  ;;  %v2398_v44 = vshrl.u32 %v2393_v40, 16 }
 0x35c   : > { %v2420_v42 = vshrl.u32 %v2415_v21, 16  ;;  %v2407_v49 = vadd.s32 %v2406_v27, %v2396_v5  ;;  %v5879_v25 = vsub.s32 32, %v3127_v43  ;;  %v1087_v38 = vadd.s32 3, %v1070_v22 }
 0x35d   : > { %v1066_v59 = vsel %vm945_vm7, %v1065_v34, %v1064_v31  ;;  %v2429_v9 = vadd.s32 %v2428_v48, %v2418_v58  ;;  %v3120_v37 = vand.u32 8388607, %v3113_v32  ;;  %v5885_v23 = vadd.s32 %v2423_v56, %v2419_v45 }
 0x35e   : > { %v1069_v7 = vsel %vm5812_vm12, %v5519_v41, %v1066_v59  ;;  %v5883_v55 = vadd.s32 %v2407_v49, %v2398_v44  ;;  %v2431_v61 = vmul.u32 %v5768_v3, %v2377_v18  ;;  %v5888_v20 = vshrl.u32 %v3125_v62, 5 }
 0x35f   : > { %v1071_v13 = vmul.f32 %v1069_v7, %v1069_v7  ;;  %v2430_v57 = vadd.s32 %v2429_v9, %v2420_v42  ;;  %v3133_v21 = vshll.u32 %v3714_v2, %v3127_v43  ;;  %v3134_v60 = vshrl.u32 %v3715_v4, %v5879_v25 }
 0x360   : > { %vm2433_vm7 = vc.u32 %v5883_v55, %v5885_v23  ;;  %v3137_v16 = vshrl.u32 %v3716_v6, %v5879_v25  ;;  %v3131_v3 = vshrl.u32 %v3714_v2, %v5879_v25  ;;  %v3136_v39 = vshll.u32 %v3715_v4, %v3127_v43 }
 0x361   : > { %v1072_v54 = vmul.f32 -0.001358992, %v1071_v13  ;;  %v1079_v1 = vmul.f32 -0.00019511016, %v1071_v13  ;;  %v2434_v22 = vadd.s32 1, %v2430_v57  ;;  %v3139_v29 = vshll.u32 %v3716_v6, %v3127_v43 }
 0x362   : > { %v3140_v52 = vshrl.u32 %v3717_v8, %v5879_v25  ;;  %v3142_v47 = vshll.u32 %v3717_v8, %v3127_v43  ;;  %v3143_v19 = vshrl.u32 %v3718_v17, %v5879_v25  ;;  %v3130_v30 = vshll.u32 %v3713_v0, %v3127_v43 }
 0x363   : > { %v1073_v11 = vadd.f32 0.041655596, %v1072_v54  ;;  %v1080_v40 = vadd.f32 0.008332121, %v1079_v1  ;;  %v2435_v50 = vsel %vm2433_vm7, %v2434_v22, %v2430_v57  ;;  %v5907_v45 = vor.u32 %v3134_v60, %v3133_v21 }
 0x364   : > { %v2436_v14 = vadd.s32 %v2435_v50, %v2431_v61  ;;  %v5909_v2 = vor.u32 %v3137_v16, %v3136_v39  ;;  %v3141_v4 = vor.u32 %v3140_v52, %v3139_v29  ;;  %v3144_v56 = vor.u32 %v3143_v19, %v3142_v47 }
 0x365   : > { %v1074_v53 = vmul.f32 %v1073_v11, %v1071_v13  ;;  %v1081_v51 = vmul.f32 %v1080_v40, %v1071_v13  ;;  %v1088_v31 = vand.u32 3, %v1087_v38  ;;  %v3121_v12 = vor.u32 8388608, %v3120_v37 }
 0x366   : > { %v2437_v28 = vadd.s32 536870912, %v2436_v14  ;;  %v5911_v8 = vor.u32 %v3131_v3, %v3130_v30  ;;  %vm3148_vm10 = vcmp.lt.s32.totalorder %v5888_v20, 4  ;;  %vm3145_vm9 = vcmp.lt.s32.totalorder %v5888_v20, 1 }
 0x367   : > { %v1075_v10 = vadd.f32 -0.4999988, %v1074_v53  ;;  %v1082_v6 = vadd.f32 -0.16666654, %v1081_v51  ;;  %vm3147_vm13 = vcmp.lt.s32.totalorder %v5888_v20, 3  ;;  %v3157_v5 = vsel %vm3145_vm9, %v5907_v45, %v5909_v2 }
 0x368   : > { %v5913_v58 = vshrl.u32 %v2437_v28, 30  ;;  %v3154_v17 = vsel %vm3148_vm10, %v3141_v4, 920167782  ;;  %v3158_v34 = vsel %vm3148_vm10, %v3144_v56, 1326507024  ;;  %v3153_v27 = vsel %vm3145_vm9, %v5911_v8, %v5907_v45 }
 0x369   : > { %v1076_v33 = vmul.f32 %v1075_v10, %v1071_v13  ;;  %v1083_v26 = vmul.f32 %v1082_v6, %v1071_v13  ;;  %v3155_v48 = vsel %vm3147_vm13, %v5909_v2, %v3154_v17  ;;  %v3159_v43 = vsel %vm3147_vm13, %v3141_v4, %v3158_v34 }
 0x36a   : > { %v2439_v62 = vshll.u32 %v5913_v58, 30  ;;  %v5936_v59 = vshll.u32 %v3121_v12, 8  ;;  %vm3146_vm11 = vcmp.lt.s32.totalorder %v5888_v20, 2  ;;  %vm1089_vm12 = vcmp.lt.s32.totalorder %v1088_v31, 2 }
 0x36b   : > { %v1077_v35 = vadd.f32 1.0, %v1076_v33  ;;  %v1084_v63 = vadd.f32 1.0, %v1083_v26  ;;  %vm1090_vm14 = vcmp.eq.s32.totalorder %v1088_v31, 0  ;;  %v3160_v49 = vsel %vm3146_vm11, %v3157_v5, %v3159_v43 }
 0x36c   : > { %v2440_v42 = vsub.s32 %v2436_v14, %v2439_v62  ;;  %v3156_v38 = vsel %vm3146_vm11, %v3153_v27, %v3155_v48  ;;  %vm1093_vm15 = vcmp.eq.s32.totalorder %v1088_v31, 2  ;;  %v3162_v37 = vand.u32 65535, %v5936_v59 }
 0x36d   : > { %v1085_v18 = vmul.f32 %v1084_v63, %v1069_v7  ;;  %v1094_v44 = vxor.u32 2147483648, %v1077_v35  ;;  %v3164_v7 = vand.u32 65535, %v3160_v49  ;;  %v3165_v57 = vshrl.u32 %v3160_v49, 16 }
 0x36e   : > { %vm2441_vm1 = vcmp.lt.s32.totalorder %v2440_v42, 0  ;;  %v2442_v13 = vsub.s32 0, %v2440_v42  ;;  %v3163_v21 = vshrl.u32 %v5936_v59, 16  ;;  %vm1086_vm0 = vweird.f32 %v5519_v41 }
 0x36f   : > { %v1091_v9 = vxor.u32 2147483648, %v1085_v18  ;;  %v1095_v54 = vsel %vm1093_vm15, %v1094_v44, %v1085_v18  ;;  %v3187_v16 = vshrl.u32 %v3156_v38, 16  ;;  %v3167_v40 = vmul.u32 %v3165_v57, %v3162_v37 }
 0x370   : > { %v2443_v1 = vsel %vm2441_vm1, %v2442_v13, %v2440_v42  ;;  %v3168_v3 = vmul.u32 %v3164_v7, %v3163_v21  ;;  %v3186_v39 = vand.u32 65535, %v3156_v38  ;;  %v2432_v29 = vadd.s32 %v5885_v23, %v5883_v55 }
 0x371   : > { %v1092_v61 = vsel %vm1090_vm14, %v1077_v35, %v1091_v9  ;;  %v2444_v60 = vclz %v2443_v1  ;;  %v3166_v52 = vmul.u32 %v3164_v7, %v3162_v37  ;;  %v3169_v47 = vmul.u32 %v3165_v57, %v3163_v21 }
 0x372   : > { %v1096_v22 = vsel %vm1089_vm12, %v1092_v61, %v1095_v54  ;;  %v3170_v53 = vshll.u32 %v3167_v40, 16  ;;  %v3171_v51 = vshrl.u32 %v3167_v40, 16  ;;  %v3172_v14 = vshll.u32 %v3168_v3, 16 }
 0x373   : > { %v1097_v11 = vsel %vm1086_vm0, nan, %v1096_v22  ;;  %v3433_v50 = vadd.s32 4294967294, %v2444_v60  ;;  %v3189_v41 = vmul.u32 %v3187_v16, %v3162_v37  ;;  %v3190_v4 = vmul.u32 %v3186_v39, %v3163_v21 }
 0x374   : > { %3272 = vst [vmem:[%s4190_s28 + $0x20] sm:$0xff] %v1097_v11  ;;  %vm3174_vm4 = vc.u32 %v3166_v52, %v3170_v53  ;;  %v3176_v30 = vadd.s32 %v3170_v53, %v3166_v52  ;;  %v3188_v56 = vmul.u32 %v3186_v39, %v3162_v37  ;;  %v3191_v12 = vmul.u32 %v3187_v16, %v3163_v21 }
 0x375   : > { %vm3434_vm2 = vcmp.lt.s32.totalorder %v3433_v50, 0  ;;  %v3175_v28 = vsel %vm3174_vm4, 1, %v3719_v24  ;;  %v3192_v55 = vshll.u32 %v3189_v41, 16  ;;  %v3194_v35 = vshll.u32 %v3190_v4, 16 }
 0x376   : > { %v2447_v19 = vsel %vm3434_vm2, 0, %v3433_v50  ;;  %v3177_v31 = vadd.s32 %v3175_v28, %v3169_v47  ;;  %vm3178_vm3 = vc.u32 %v3176_v30, %v3172_v14  ;;  %v3129_v27 = vshrl.u32 %v3713_v0, %v5879_v25 }
 0x377   : > { %v2448_v10 = vsub.s32 32, %v2447_v19  ;;  %v2452_v6 = vsub.s32 4294967266, %v2447_v19  ;;  %v2449_v23 = vshll.u32 %v2440_v42, %v2447_v19  ;;  %v3179_v17 = vsel %vm3178_vm3, 1, %v3719_v24 }
 0x378   : > { %v3181_v34 = vadd.s32 %v3179_v17, %v3177_v31  ;;  %vm3196_vm5 = vc.u32 %v3188_v56, %v3192_v55  ;;  %v3198_v63 = vadd.s32 %v3192_v55, %v3188_v56  ;;  %v3150_v43 = vsel %vm3148_vm10, %v5909_v2, 2102212464 }
 0x379   : > { %v2450_v33 = vshrl.u32 %v2432_v29, %v2448_v10  ;;  %v2453_v26 = vadd.s32 127, %v2452_v6  ;;  %v3197_v48 = vsel %vm3196_vm5, 1, %v3719_v24  ;;  %v3173_v49 = vshrl.u32 %v3168_v3, 16 }
 0x37a   : > { %v3182_v18 = vadd.s32 %v3181_v34, %v3171_v51  ;;  %v3199_v44 = vadd.s32 %v3197_v48, %v3191_v12  ;;  %vm3200_vm6 = vc.u32 %v3198_v63, %v3194_v35  ;;  %v3149_v13 = vsel %vm3145_vm9, %v3129_v27, %v5911_v8 }
 0x37b   : > { %v2451_v62 = vor.u32 %v2450_v33, %v2449_v23  ;;  %v2454_v5 = vshll.u32 %v2453_v26, 23  ;;  %v3201_v9 = vsel %vm3200_vm6, 1, %v3719_v24  ;;  %v3193_v38 = vshrl.u32 %v3189_v41, 16 }
 0x37c   : > { %v3203_v37 = vadd.s32 %v3201_v9, %v3199_v44  ;;  %v3151_v7 = vsel %vm3147_vm13, %v5907_v45, %v3150_v43  ;;  %v3183_v2 = vadd.s32 %v3182_v18, %v3173_v49  ;;  %v3195_v57 = vshrl.u32 %v3190_v4, 16 }
 0x37d   : > { %v2455_v42 = vor.u32 4788187, %v2454_v5  ;;  %v2458_v25 = vcvt.s32.f32 %v2451_v62  ;;  %v3202_v1 = vadd.s32 %v3198_v63, %v3194_v35  ;;  %v3152_v24 = vsel %vm3146_vm11, %v3149_v13, %v3151_v7 }
 0x37e   : > { %v3204_v61 = vadd.s32 %v3203_v37, %v3193_v38  ;;  %vm2340_vm7 = vcmp.lt.s32.totalorder %v5717_v36, 0  ;;  %vm5970_vm10 = vcmp.le.f32.partialorder %v2338_v46, 0.7853982  ;;  %v3206_v16 = vmul.u32 %v5936_v59, %v3152_v24 }
 0x37f   : > { %v2456_v0 = vand.u32 2147483647, %v2455_v42  ;;  %vm3208_vm8 = vc.u32 %v3183_v2, %v3202_v1  ;;  %v2462_v11 = vsub.s32 4, %v5913_v58  ;;  %vm2481_vm13 = vweird.f32 %v5717_v36 }
 0x380   : > { %v3205_v21 = vadd.s32 %v3204_v61, %v3195_v57  ;;  %v3207_v48 = vadd.s32 %v3202_v1, %v3183_v2  ;;  %vm3115_vm15 = vcmp.lt.s32.totalorder %v5749_v15, 0  ;;  %vm3114_vm0 = vcmp.le.f32.partialorder %v3113_v32, 0.7853982 }
 0x381   : > { %v2459_v54 = vmul.f32 %v2458_v25, %v2456_v0  ;;  %v2463_v46 = vsel %vm2340_vm7, %v2462_v11, %v5913_v58  ;;  %vm3256_vm5 = vweird.f32 %v5749_v15 }
 0x382   : > { %v3209_v8 = vadd.s32 1, %v3205_v21  ;;  %v2465_v59 = vsel %vm5970_vm10, 0, %v2463_v46 }
 0x383   : > { %v2460_v22 = vxor.u32 2147483648, %v2459_v54  ;;  %v2482_v6 = vadd.s32 3, %v2465_v59 }
 0x384   : > { %v3210_v40 = vsel %vm3208_vm8, %v3209_v8, %v3205_v21 }
 0x385   : > { %v2461_v45 = vsel %vm2340_vm7, %v2460_v22, %v2459_v54  ;;  %v3211_v39 = vadd.s32 %v3210_v40, %v3206_v16  ;;  %v2483_v23 = vand.u32 3, %v2482_v6 }
 0x386   : > { %v2464_v20 = vsel %vm5970_vm10, %v5717_v36, %v2461_v45 }
 0x387   : > { %v2466_v3 = vmul.f32 %v2464_v20, %v2464_v20  ;;  %v3212_v52 = vadd.s32 536870912, %v3211_v39  ;;  %vm2485_vm11 = vcmp.eq.s32.totalorder %v2483_v23, 0  ;;  %vm2488_vm12 = vcmp.eq.s32.totalorder %v2483_v23, 2 }
 0x388   : > { %vm2484_vm1 = vcmp.lt.s32.totalorder %v2483_v23, 2 }
 0x389   : > { %v2467_v50 = vmul.f32 -0.001358992, %v2466_v3  ;;  %v2474_v29 = vmul.f32 -0.00019511016, %v2466_v3  ;;  %v3213_v51 = vshrl.u32 %v3212_v52, 30 }
 0x38b   : > { %v2468_v47 = vadd.f32 0.041655596, %v2467_v50  ;;  %v2475_v53 = vadd.f32 0.008332121, %v2474_v29  ;;  %v3214_v19 = vshll.u32 %v3213_v51, 30  ;;  %v3237_v57 = vsub.s32 4, %v3213_v51 }
 0x38d   : > { %v2469_v14 = vmul.f32 %v2468_v47, %v2466_v3  ;;  %v2476_v41 = vmul.f32 %v2475_v53, %v2466_v3  ;;  %v3215_v10 = vsub.s32 %v3211_v39, %v3214_v19  ;;  %v3238_v21 = vsel %vm3115_vm15, %v3237_v57, %v3213_v51 }
 0x38e   : > { %v3240_v60 = vsel %vm3114_vm0, 0, %v3238_v21 }
 0x38f   : > { %v2470_v30 = vadd.f32 -0.4999988, %v2469_v14  ;;  %v2477_v4 = vadd.f32 -0.16666654, %v2476_v41  ;;  %vm3216_vm9 = vcmp.lt.s32.totalorder %v3215_v10, 0  ;;  %v3217_v31 = vsub.s32 0, %v3215_v10 }
 0x390   : > { %v3257_v40 = vadd.s32 3, %v3240_v60 }
 0x391   : > { %v2471_v28 = vmul.f32 %v2470_v30, %v2466_v3  ;;  %v2478_v56 = vmul.f32 %v2477_v4, %v2466_v3  ;;  %v3218_v58 = vsel %vm3216_vm9, %v3217_v31, %v3215_v10 }
 0x392   : > { %v3219_v33 = vclz %v3218_v58  ;;  %v3258_v29 = vand.u32 3, %v3257_v40 }
 0x393   : > { %v2472_v12 = vadd.f32 1.0, %v2471_v28  ;;  %v2479_v55 = vadd.f32 1.0, %v2478_v56 }
 0x394   : > { %v3448_v34 = vadd.s32 4294967294, %v3219_v33  ;;  %vm3260_vm2 = vcmp.eq.s32.totalorder %v3258_v29, 0  ;;  %vm3263_vm4 = vcmp.eq.s32.totalorder %v3258_v29, 2  ;;  %vm3259_vm3 = vcmp.lt.s32.totalorder %v3258_v29, 2 }
 0x395   : > { %v2480_v26 = vmul.f32 %v2479_v55, %v2464_v20  ;;  %v2489_v17 = vxor.u32 2147483648, %v2472_v12 }
 0x396   : > { %vm3449_vm14 = vcmp.lt.s32.totalorder %v3448_v34, 0 }
 0x397   : > { %v2486_v35 = vxor.u32 2147483648, %v2480_v26  ;;  %v2490_v62 = vsel %vm2488_vm12, %v2489_v17, %v2480_v26  ;;  %v3222_v5 = vsel %vm3449_vm14, 0, %v3448_v34 }
 0x398   : > { %v3223_v43 = vsub.s32 32, %v3222_v5  ;;  %v3227_v18 = vsub.s32 4294967266, %v3222_v5  ;;  %v3224_v42 = vshll.u32 %v3215_v10, %v3222_v5 }
 0x399   : > { %v2487_v63 = vsel %vm2485_vm11, %v2472_v12, %v2486_v35 }
 0x39a   : > { %v2491_v27 = vsel %vm2484_vm1, %v2487_v63, %v2490_v62  ;;  %v3225_v49 = vshrl.u32 %v3207_v48, %v3223_v43  ;;  %v3228_v9 = vadd.s32 127, %v3227_v18 }
 0x39b   : > { %v2492_v44 = vsel %vm2481_vm13, nan, %v2491_v27 }
 0x39c   : > { %3281 = vst [vmem:[%s4190_s28 + $0x68] sm:$0xff] %v2492_v44  ;;  %v3226_v13 = vor.u32 %v3225_v49, %v3224_v42  ;;  %v3229_v38 = vshll.u32 %v3228_v9, 23 }
 0x39e   : > { %v3230_v37 = vor.u32 4788187, %v3229_v38  ;;  %v3233_v0 = vcvt.s32.f32 %v3226_v13 }
 0x3a0   : > { %v3231_v36 = vand.u32 2147483647, %v3230_v37 }
 0x3a2   : > { %v3234_v25 = vmul.f32 %v3233_v0, %v3231_v36 }
 0x3a4   : > { %v3235_v7 = vxor.u32 2147483648, %v3234_v25 }
 0x3a6   : > { %v3236_v2 = vsel %vm3115_vm15, %v3235_v7, %v3234_v25 }
 0x3a7   : > { %v3239_v61 = vsel %vm3114_vm0, %v5749_v15, %v3236_v2 }
 0x3a8   : > { %v3241_v54 = vmul.f32 %v3239_v61, %v3239_v61 }
 0x3aa   : > { %v3242_v1 = vmul.f32 -0.001358992, %v3241_v54  ;;  %v3249_v24 = vmul.f32 -0.00019511016, %v3241_v54 }
 0x3ac   : > { %v3243_v22 = vadd.f32 0.041655596, %v3242_v1  ;;  %v3250_v8 = vadd.f32 0.008332121, %v3249_v24 }
 0x3ae   : > { %v3244_v45 = vmul.f32 %v3243_v22, %v3241_v54  ;;  %v3251_v16 = vmul.f32 %v3250_v8, %v3241_v54 }
 0x3b0   : > { %v3245_v11 = vadd.f32 -0.4999988, %v3244_v45  ;;  %v3252_v20 = vadd.f32 -0.16666654, %v3251_v16 }
 0x3b2   : > { %v3246_v32 = vmul.f32 %v3245_v11, %v3241_v54  ;;  %v3253_v3 = vmul.f32 %v3252_v20, %v3241_v54 }
 0x3b4   : > { %v3247_v39 = vadd.f32 1.0, %v3246_v32  ;;  %v3254_v50 = vadd.f32 1.0, %v3253_v3 }
 0x3b6   : > { %v3255_v52 = vmul.f32 %v3254_v50, %v3239_v61  ;;  %v3264_v46 = vxor.u32 2147483648, %v3247_v39 }
 0x3b8   : > { %v3261_v47 = vxor.u32 2147483648, %v3255_v52  ;;  %v3265_v51 = vsel %vm3263_vm4, %v3264_v46, %v3255_v52 }
 0x3ba   : > { %v3262_v53 = vsel %vm3260_vm2, %v3247_v39, %v3261_v47 }
 0x3bb   : > { %v3266_v59 = vsel %vm3259_vm3, %v3262_v53, %v3265_v51 }
 0x3bc   : > { %v3267_v14 = vsel %vm3256_vm5, nan, %v3266_v59 }
 0x3bd   : > { %3286 = vst [vmem:[%s4190_s28 + $0x90] sm:$0xff] %v3267_v14 }
 0x3be   : > { %3665 = shalt.err (!%p3662_p10)
}
 0x3bf   : > { %s3720_s8 = smov 128   ;;  %s3721_s28 = smov 8  }
 0x3c0   : > { %3511 = dma.vmem_to_hbm [thread:$0]  (%p3812_p7), %s3301_s11, 2432, %s3303_s21, %s3288_s16, %s3720_s8, %s3720_s8, %s3721_s28  }
 0x3c1 PF: > { %s3317_s29 = sand.u32 1, %s3696_s12   ;;  %p6065_p12 = scmp.ge.s32.totalorder %s3708_s15, 2 }
 0x3c2   : > { %s3318_s30 = scalar_lea.sflag [#allocation4], %s3317_s29 }
 0x3c3   : > { %p3522_p13 = pnand %p6065_p12, %p3777_p6 }
 0x3c5   : > { %p3523_p0 = pneg %p3522_p13 }
 0x3c7   : > { %3691 = dma.done.wait (%p3523_p0), %s3318_s30, 2432  }
 0x3c8   : > { %3693 = vsyncadd (%p3523_p0), %s3318_s30, 4294964864  ;;  %p17_p3 = scmp.ge.s32.totalorder %s3795_s26, 4   ;;  %s6066_s12 = smov %s3700_s13 }
 0x3c9   : > { %s6067_s13 = smov %s3704_s14  ;;  %s6068_s14 = smov %s3808_s4 }
 0x3ca   : > { %s6069_s15 = smov %s3795_s26  ;;  %19 = sbr.rel (!%p17_p3) target bundleno = 6 (0x6), region = 81 }
 0x3cf   :  { %3324 = vsyncpa [#allocation3], 1 }
 0x3d0   :  { %3326 = vsyncpa [#allocation3 + $0x1], 1 }
 0x3d1   :  { %3327 = vsyncpa [#allocation6], 1 }
 0x3d2   :  { %3328 = vsyncpa [#allocation4], 1 }
 0x3d3   :  { %3330 = vsyncpa [#allocation4 + $0x1], 1 }

</bundles_post_ra>
